<compile_context>
chip_gen: v5e
topology: v5e:2x2
jax: 0.10.0
libtpu: 0.0.40
codegen_flags: <defaults>
</compile_context>

<pallas_src>
import functools
import math

import jax
import jax.numpy as jnp
from jax.experimental import pallas as pl
from jax.experimental.pallas import tpu as pltpu

_VMEM_LIMIT_BYTES = 32 * 1024 * 1024  # v7x-safe (64 MiB/TC total)
_LN_EPS = 1e-6  # annotated-transformer LayerNorm (modules.Transformer) uses 1e-6


# ----------------------------------------------------------------------------
# in-kernel helpers (traced inside Pallas kernels; f32 elementwise math)
# ----------------------------------------------------------------------------
def _ln(x, g, b):
    mu = jnp.mean(x, axis=-1, keepdims=True)
    var = jnp.mean(jnp.square(x - mu), axis=-1, keepdims=True)
    return (x - mu) * jax.lax.rsqrt(var + _LN_EPS) * g + b


def _mha(q, k, v, bias, h, dk):
    """Batched-head scaled dot-product attention.
       q: (Lq, D) f32, k/v: (Lk, D) bf16, bias: (1, Lk) f32 or None."""
    lq = q.shape[0]
    lk = k.shape[0]
    scale = 1.0 / math.sqrt(dk)
    qh = jnp.swapaxes(q.reshape(lq, h, dk), 0, 1).astype(jnp.bfloat16)  # (h,Lq,dk)
    kh = jnp.swapaxes(k.reshape(lk, h, dk), 0, 1)                        # (h,Lk,dk)
    vh = jnp.swapaxes(v.reshape(lk, h, dk), 0, 1)                        # (h,Lk,dk)
    s = jnp.einsum("hqd,hkd->hqk", qh, kh,
                   preferred_element_type=jnp.float32) * scale           # (h,Lq,Lk)
    if bias is not None:
        s = s + bias                                   # (1,Lk) bias over keys
    s = s - jnp.max(s, axis=-1, keepdims=True)
    p = jnp.exp(s)
    p = p * pl.reciprocal(jnp.sum(p, axis=-1, keepdims=True), approx=True)
    o = jnp.einsum("hqk,hkd->hqd", p.astype(jnp.bfloat16), vh,
                   preferred_element_type=jnp.float32)                   # (h,Lq,dk)
    return jnp.swapaxes(o, 0, 1).reshape(lq, h * dk)                     # (Lq,D) f32


def _attn_ff(x, k, v, bias, h, wq, bq, wo, bo, w1, b1, w2, b2,
             ln0g, ln0b, ln1g, ln1b):
    """Pre-LN cross-attention sublayer + pre-LN FFN sublayer (both residual)."""
    d = x.shape[-1]
    dk = d // h
    xn = _ln(x, ln0g, ln0b)
    q = jnp.dot(xn.astype(jnp.bfloat16), wq,
                preferred_element_type=jnp.float32) + bq
    attn = _mha(q, k, v, bias, h, dk)
    x = x + (jnp.dot(attn.astype(jnp.bfloat16), wo,
                     preferred_element_type=jnp.float32) + bo)
    xn = _ln(x, ln1g, ln1b)
    hid = jnp.maximum(
        jnp.dot(xn.astype(jnp.bfloat16), w1,
                preferred_element_type=jnp.float32) + b1, 0.0)
    x = x + (jnp.dot(hid.astype(jnp.bfloat16), w2,
                     preferred_element_type=jnp.float32) + b2)
    return x


# ----------------------------------------------------------------------------
# Pallas kernels
# ----------------------------------------------------------------------------
def _linear_kernel(x_ref, w_ref, b_ref, o_ref):
    # x: (bm, K) any float dtype, w: (K, N) bf16, b: (1, N) f32 -> o: (bm, N) bf16
    x = x_ref[...].astype(jnp.bfloat16)
    o_ref[...] = (jnp.dot(x, w_ref[...], preferred_element_type=jnp.float32)
                  + b_ref[...]).astype(o_ref.dtype)


def _entity_kv_bias_kernel(chest_ref, rel_ref, we_ref, be_ref, wr_ref, br_ref,
                           wk_ref, bk_ref, wv_ref, bv_ref,
                           k_ref, v_ref, bias_ref):
    # chest/rel: (Ne, 400) f32; we: (400, D) bf16; wr: (1, 400) bf16
    ent = (jnp.dot(chest_ref[...].astype(jnp.bfloat16), we_ref[...],
                   preferred_element_type=jnp.float32) + be_ref[...])
    ent_b = ent.astype(jnp.bfloat16)
    k_ref[...] = (jnp.dot(ent_b, wk_ref[...],
                          preferred_element_type=jnp.float32)
                  + bk_ref[...]).astype(k_ref.dtype)
    v_ref[...] = (jnp.dot(ent_b, wv_ref[...],
                          preferred_element_type=jnp.float32)
                  + bv_ref[...]).astype(v_ref.dtype)
    # relation bias: contract the last dims directly (q@k^T pattern) so the
    # output is lane-dense (1, Ne) and no XLA-side relation.T is needed.
    bias_ref[...] = (jnp.einsum("od,nd->on", wr_ref[...],
                                rel_ref[...].astype(jnp.bfloat16),
                                preferred_element_type=jnp.float32)
                     + br_ref[...])


def _kg_block_kernel(x_ref, k_ref, v_ref, bias_ref,
                     wq_ref, bq_ref, wo_ref, bo_ref,
                     w1_ref, b1_ref, w2_ref, b2_ref,
                     ln0g_ref, ln0b_ref, ln1g_ref, ln1b_ref,
                     o_ref, *, h):
    """KG_MHA_FF over batch-flattened queries; entity K/V + relation bias resident."""
    x = x_ref[...].astype(jnp.float32)          # (bm, D)
    out = _attn_ff(x, k_ref[...], v_ref[...], bias_ref[...], h,
                   wq_ref[...], bq_ref[...], wo_ref[...], bo_ref[...],
                   w1_ref[...], b1_ref[...], w2_ref[...], b2_ref[...],
                   ln0g_ref[...], ln0b_ref[...], ln1g_ref[...], ln1b_ref[...])
    o_ref[...] = out.astype(o_ref.dtype)


def _know_kv_kernel(e_ref, wb_ref, bb_ref, wk_ref, bk_ref, wv_ref, bv_ref,
                    k_ref, v_ref):
    """Fused proj_bert_embedding + K/V projections over flattened (B*Nk, 768)."""
    f = (jnp.dot(e_ref[...].astype(jnp.bfloat16), wb_ref[...],
                 preferred_element_type=jnp.float32) + bb_ref[...])
    fb = f.astype(jnp.bfloat16)
    k_ref[...] = (jnp.dot(fb, wk_ref[...],
                          preferred_element_type=jnp.float32)
                  + bk_ref[...]).astype(k_ref.dtype)
    v_ref[...] = (jnp.dot(fb, wv_ref[...],
                          preferred_element_type=jnp.float32)
                  + bv_ref[...]).astype(v_ref.dtype)


def _know_block_kernel(x_ref, k_ref, v_ref,
                       wq_ref, bq_ref, wo_ref, bo_ref,
                       w1_ref, b1_ref, w2_ref, b2_ref,
                       ln0g_ref, ln0b_ref, ln1g_ref, ln1b_ref,
                       o_ref, *, h):
    """MHA_FF (no bias); K/V already projected (per-batch blocks)."""
    x = x_ref[0].astype(jnp.float32)            # (Lq, D)
    out = _attn_ff(x, k_ref[0], v_ref[0], None, h,
                   wq_ref[...], bq_ref[...], wo_ref[...], bo_ref[...],
                   w1_ref[...], b1_ref[...], w2_ref[...], b2_ref[...],
                   ln0g_ref[...], ln0b_ref[...], ln1g_ref[...], ln1b_ref[...])
    o_ref[0] = out.astype(o_ref.dtype)


# ----------------------------------------------------------------------------
# Pallas wrappers
# ----------------------------------------------------------------------------
def _fixed_spec(a):
    # whole-array block, resident across the grid (block 0)
    nd = a.ndim
    return pl.BlockSpec(a.shape, lambda i, _nd=nd: (0,) * _nd)


def _pick_block(m, block_m):
    """Largest tile <= block_m that is a multiple of 8 and divides M exactly
       (prefers >= 2 tiles so both v7x TensorCores get work); else full M."""
    if m < 16 or m % 8 != 0:
        return m
    bm = min(block_m, max(8, (m // 2 // 8) * 8))
    while m % bm != 0:
        bm -= 8
    return bm


def linear(x, w_bf16, b_f32, *, block_m=256):
    """y = x @ w + b (bf16 out). Feature axis last. M-axis grid, resident weights."""
    lead = x.shape[:-1]
    k_dim = x.shape[-1]
    n_dim = w_bf16.shape[-1]
    x2 = x.reshape(-1, k_dim)                    # no wrapper-side dtype cast
    m = x2.shape[0]
    bm = _pick_block(m, block_m)
    out = pl.pallas_call(
        _linear_kernel,
        out_shape=jax.ShapeDtypeStruct((m, n_dim), jnp.bfloat16),
        grid=(m // bm,),
        in_specs=[pl.BlockSpec((bm, k_dim), lambda i: (i, 0)),
                  pl.BlockSpec((k_dim, n_dim), lambda i: (0, 0)),
                  pl.BlockSpec((1, n_dim), lambda i: (0, 0))],
        out_specs=pl.BlockSpec((bm, n_dim), lambda i: (i, 0)),
        compiler_params=pltpu.CompilerParams(
            dimension_semantics=("parallel",),
            vmem_limit_bytes=_VMEM_LIMIT_BYTES),
    )(x2, w_bf16, b_f32)
    return out.reshape(*lead, n_dim)


def entity_kv_and_bias(chest, relation, we, be, wr, br, wk, bk, wv, bv):
    """One call: proj_entity -> K/V projections of entities + relation bias."""
    ne = chest.shape[0]
    d = we.shape[-1]
    return pl.pallas_call(
        _entity_kv_bias_kernel,
        out_shape=(jax.ShapeDtypeStruct((ne, d), jnp.bfloat16),
                   jax.ShapeDtypeStruct((ne, d), jnp.bfloat16),
                   jax.ShapeDtypeStruct((1, ne), jnp.float32)),
        compiler_params=pltpu.CompilerParams(
            vmem_limit_bytes=_VMEM_LIMIT_BYTES),
    )(chest, relation, we, be, wr, br, wk, bk, wv, bv)


def kg_block(p, x, k_ent, v_ent, bias, *, block_m=256):
    """Fused KG_MHA_FF over batch-flattened queries (entity K/V batch-invariant)."""
    b, lq, d = x.shape
    m = b * lq
    xf = x.reshape(m, d)
    bm = _pick_block(m, block_m)
    consts = (k_ent, v_ent, bias,
              p["wq"], p["bq"], p["wo"], p["bo"],
              p["ff_w1"], p["ff_b1"], p["ff_w2"], p["ff_b2"],
              p["ln0_g"], p["ln0_b"], p["ln1_g"], p["ln1_b"])
    out = pl.pallas_call(
        functools.partial(_kg_block_kernel, h=p["h"]),
        out_shape=jax.ShapeDtypeStruct((m, d), jnp.bfloat16),
        grid=(m // bm,),
        in_specs=[pl.BlockSpec((bm, d), lambda i: (i, 0))]
                 + [_fixed_spec(a) for a in consts],
        out_specs=pl.BlockSpec((bm, d), lambda i: (i, 0)),
        compiler_params=pltpu.CompilerParams(
            dimension_semantics=("parallel",),
            vmem_limit_bytes=_VMEM_LIMIT_BYTES),
    )(xf, *consts)
    return out.reshape(b, lq, d)


def know_kv(emb, wb, bb, wk, bk, wv, bv, *, block_m=256):
    """Fused bert-projection + K/V projection over flattened (B*Nk, 768)."""
    b, nk, e = emb.shape
    m = b * nk
    e2 = emb.reshape(m, e)
    bm = _pick_block(m, block_m)
    d = wb.shape[-1]
    consts = (wb, bb, wk, bk, wv, bv)
    k, v = pl.pallas_call(
        _know_kv_kernel,
        out_shape=(jax.ShapeDtypeStruct((m, d), jnp.bfloat16),
                   jax.ShapeDtypeStruct((m, d), jnp.bfloat16)),
        grid=(m // bm,),
        in_specs=[pl.BlockSpec((bm, e), lambda i: (i, 0))]
                 + [_fixed_spec(a) for a in consts],
        out_specs=(pl.BlockSpec((bm, d), lambda i: (i, 0)),
                   pl.BlockSpec((bm, d), lambda i: (i, 0))),
        compiler_params=pltpu.CompilerParams(
            dimension_semantics=("parallel",),
            vmem_limit_bytes=_VMEM_LIMIT_BYTES),
    )(e2, *consts)
    return k.reshape(b, nk, d), v.reshape(b, nk, d)


def know_block(p, x, k, v):
    """Fused MHA_FF (no bias), gridded over batch; K/V pre-projected."""
    b, lq, d = x.shape
    lk = k.shape[1]
    consts = (p["wq"], p["bq"], p["wo"], p["bo"],
              p["ff_w1"], p["ff_b1"], p["ff_w2"], p["ff_b2"],
              p["ln0_g"], p["ln0_b"], p["ln1_g"], p["ln1_b"])
    return pl.pallas_call(
        functools.partial(_know_block_kernel, h=p["h"]),
        out_shape=jax.ShapeDtypeStruct((b, lq, d), jnp.bfloat16),
        grid=(b,),
        in_specs=[pl.BlockSpec((1, lq, d), lambda i: (i, 0, 0)),
                  pl.BlockSpec((1, lk, d), lambda i: (i, 0, 0)),
                  pl.BlockSpec((1, lk, d), lambda i: (i, 0, 0))]
                 + [_fixed_spec(a) for a in consts],
        out_specs=pl.BlockSpec((1, lq, d), lambda i: (i, 0, 0)),
        compiler_params=pltpu.CompilerParams(
            dimension_semantics=("parallel",),
            vmem_limit_bytes=_VMEM_LIMIT_BYTES),
    )(x, k, v, *consts)


# ----------------------------------------------------------------------------
# Module-level composition (matches the PyTorch forward semantics)
# ----------------------------------------------------------------------------
def kgmodel_v1_forward(params, att_feats_raw, fc_feats_raw,
                       chest_embedding, relation_embedding, knowledges):
    """KGModel_v1.forward knowledge-fusion path (eval-mode dropout, up to generator)."""
    # visual feature projections (forward_iu_xray tail)
    fc_feats = linear(fc_feats_raw, params["proj_v1_w"], params["proj_v1_b"])    # (B,2,D)
    att_feats = linear(att_feats_raw, params["proj_v2_w"], params["proj_v2_b"])  # (B,Na,D)

    # batch-invariant entity K/V + relation bias, computed once (fused kernel)
    kg = params["kg_att"]
    k_ent, v_ent, bias = entity_kv_and_bias(
        chest_embedding, relation_embedding,
        params["proj_entity_w"], params["proj_entity_b"],
        params["proj_relation_w"], params["proj_relation_b"],
        kg["wk"], kg["bk"], kg["wv"], kg["bv"])

    # clinic knowledge attention (KG_MHA_FF with relation bias), batch-flattened
    clinic_embed = kg_block(kg, fc_feats, k_ent, v_ent, bias)

    # entity-embedding knowledge branch (bf16 table gather stays in XLA)
    know = jnp.take(params["know_emb"], knowledges, axis=0)                      # (B,Nk,768) bf16
    ka = params["know_att"]
    know_k, know_v = know_kv(know, params["proj_bert_w"], params["proj_bert_b"],
                             ka["wk"], ka["bk"], ka["wv"], ka["bv"])
    know_embed = know_block(ka, att_feats, know_k, know_v)

    att_feats = jnp.concatenate([att_feats, clinic_embed, know_embed], axis=1)
    # TODO(synk): self.generator (TransformerModel) is not provided; return the
    #             fused features that would be fed to it.
    return att_feats, fc_feats


# ----------------------------------------------------------------------------
# Deterministic parameter construction
# ----------------------------------------------------------------------------
def _kaiming(key, shape):
    fan_in = shape[0]
    return jax.random.normal(key, shape, jnp.float32) * jnp.sqrt(2.0 / fan_in)


def _torch_linear(key, k_in, k_out):
    kw, kb = jax.random.split(key)
    bound = 1.0 / jnp.sqrt(float(k_in))
    w = jax.random.uniform(kw, (k_in, k_out), jnp.float32, -bound, bound)
    b = jax.random.uniform(kb, (1, k_out), jnp.float32, -bound, bound)
    return w, b


def make_mha_ff_params(key, d_model, d_ff, h):
    ks = jax.random.split(key, 6)
    wq, bq = _torch_linear(ks[0], d_model, d_model)
    wk, bk = _torch_linear(ks[1], d_model, d_model)
    wv, bv = _torch_linear(ks[2], d_model, d_model)
    wo, bo = _torch_linear(ks[3], d_model, d_model)
    w1, b1 = _torch_linear(ks[4], d_model, d_ff)
    w2, b2 = _torch_linear(ks[5], d_ff, d_model)
    return {
        "h": h,
        # bf16 MXU operands (accumulation stays f32 inside the kernels)
        "wq": wq.astype(jnp.bfloat16),
        "wk": wk.astype(jnp.bfloat16),
        "wv": wv.astype(jnp.bfloat16),
        "wo": wo.astype(jnp.bfloat16),
        "ff_w1": w1.astype(jnp.bfloat16),
        "ff_w2": w2.astype(jnp.bfloat16),
        # f32 biases / LayerNorm params (f32 elementwise math inside kernels)
        "bq": bq, "bk": bk, "bv": bv, "bo": bo,
        "ff_b1": b1, "ff_b2": b2,
        "ln0_g": jnp.ones((1, d_model), jnp.float32),
        "ln0_b": jnp.zeros((1, d_model), jnp.float32),
        "ln1_g": jnp.ones((1, d_model), jnp.float32),
        "ln1_b": jnp.zeros((1, d_model), jnp.float32),
    }


def make_params(key, *, d_vf, d_model, d_ff, h, know_vocab, kg_entity_dim=400,
                bert_dim=768):
    ks = jax.random.split(key, 8)
    params = {
        "proj_v1_w": _kaiming(ks[0], (d_vf, d_model)).astype(jnp.bfloat16),
        "proj_v1_b": jnp.zeros((1, d_model), jnp.float32),
        "proj_v2_w": _kaiming(ks[1], (d_vf, d_model)).astype(jnp.bfloat16),
        "proj_v2_b": jnp.zeros((1, d_model), jnp.float32),
        "proj_entity_w": _kaiming(ks[2], (kg_entity_dim, d_model)).astype(jnp.bfloat16),
        "proj_entity_b": jnp.zeros((1, d_model), jnp.float32),
        # torch layout (out=1, in=400); contracted against relation's last dim
        "proj_relation_w": _kaiming(ks[3], (kg_entity_dim, 1)).T.astype(jnp.bfloat16),
        "proj_relation_b": jnp.zeros((1, 1), jnp.float32),
        "proj_bert_w": _kaiming(ks[4], (bert_dim, d_model)).astype(jnp.bfloat16),
        "proj_bert_b": jnp.zeros((1, d_model), jnp.float32),
        "kg_att": make_mha_ff_params(ks[5], d_model, d_ff, h),
        "know_att": make_mha_ff_params(ks[6], d_model, d_ff, h),
    }
    emb = jax.random.normal(ks[7], (know_vocab, bert_dim), jnp.float32) * 0.02
    emb = emb.at[0].set(0.0)  # padding_idx
    params["know_emb"] = emb.astype(jnp.bfloat16)   # halve embedding-table HBM reads
    return params


# ----------------------------------------------------------------------------
if __name__ == "__main__":
    # small, module-consistent shapes
    B, D_VF, D_MODEL, D_FF, H = 2, 48, 32, 64, 4
    N_ATT, N_FC = 8, 2            # iu_xray: two views -> 2 fc tokens, concat patches
    N_ENT, KG_DIM = 16, 400       # chest KG entities / KG_ENTITY_DIM
    N_KNOW, KNOW_VOCAB = 8, 50    # retrieved knowledge token ids

    key = jax.random.PRNGKey(0)
    k_par, k1, k2, k3, k4, k5 = jax.random.split(key, 6)

    params = make_params(k_par, d_vf=D_VF, d_model=D_MODEL, d_ff=D_FF, h=H,
                         know_vocab=KNOW_VOCAB)

    att_feats_raw = jax.random.normal(k1, (B, N_ATT, D_VF), jnp.float32)
    fc_feats_raw = jax.random.normal(k2, (B, N_FC, D_VF), jnp.float32)
    chest_embedding = jax.random.normal(k3, (N_ENT, KG_DIM), jnp.float32)
    relation_embedding = jax.random.normal(k4, (N_ENT, KG_DIM), jnp.float32)
    knowledges = jax.random.randint(k5, (B, N_KNOW), 0, KNOW_VOCAB, jnp.int32)

    fwd = jax.jit(functools.partial(kgmodel_v1_forward, params))
    att_out, fc_out = fwd(att_feats_raw, fc_feats_raw,
                          chest_embedding, relation_embedding, knowledges)
    jax.block_until_ready((att_out, fc_out))

    assert att_out.shape == (B, N_ATT + N_FC + N_ATT, D_MODEL)
    assert fc_out.shape == (B, N_FC, D_MODEL)
    print("KERNEL_OK")
</pallas_src>

<mosaic_0001>
module attributes {stable_mosaic.version = 11 : i64} {
  func.func @_linear_kernel(%arg0: i32, %arg1: memref<4x48xf32, #tpu.memory_space<vmem>>, %arg2: memref<48x32xbf16, #tpu.memory_space<vmem>>, %arg3: memref<1x32xf32, #tpu.memory_space<vmem>>, %arg4: memref<4x32xbf16, #tpu.memory_space<vmem>>) attributes {dimension_semantics = [#tpu.dimension_semantics<parallel>], iteration_bounds = array<i64: 1>, scalar_prefetch = 0 : i64, scratch_operands = 0 : i64, tpu.core_type = #tpu.core_type<tc>, window_params = [{transform_indices = @transform_0, window_bounds = array<i64: 4, 48>}, {pipeline_mode = #tpu.pipeline_mode<synchronous>, transform_indices = @transform_1, window_bounds = array<i64: 48, 32>}, {pipeline_mode = #tpu.pipeline_mode<synchronous>, transform_indices = @transform_2, window_bounds = array<i64: 1, 32>}, {transform_indices = @transform_3, window_bounds = array<i64: 4, 32>}]} {
    %c0 = arith.constant 0 : index
    %c0_0 = arith.constant 0 : index
    %0 = vector.load %arg1[%c0, %c0_0] : memref<4x48xf32, #tpu.memory_space<vmem>>, vector<4x48xf32>
    %1 = arith.truncf %0 : vector<4x48xf32> to vector<4x48xbf16>
    %c0_1 = arith.constant 0 : index
    %c0_2 = arith.constant 0 : index
    %2 = vector.load %arg2[%c0_1, %c0_2] : memref<48x32xbf16, #tpu.memory_space<vmem>>, vector<48x32xbf16>
    %cst = arith.constant dense<0.000000e+00> : vector<4x32xf32>
    %3 = tpu.matmul %1, %2, %cst {dimension_numbers = #tpu.dot_dimension_numbers<[1], [0], [0], [1], [0, 0, 1, 1], [], []>} : vector<4x48xbf16>, vector<48x32xbf16>, vector<4x32xf32> -> vector<4x32xf32>
    %c0_3 = arith.constant 0 : index
    %c0_4 = arith.constant 0 : index
    %4 = vector.load %arg3[%c0_3, %c0_4] : memref<1x32xf32, #tpu.memory_space<vmem>>, vector<1x32xf32>
    %5 = vector.broadcast %4 : vector<1x32xf32> to vector<4x32xf32>
    %6 = arith.addf %3, %5 : vector<4x32xf32>
    %7 = arith.truncf %6 : vector<4x32xf32> to vector<4x32xbf16>
    %c0_5 = arith.constant 0 : index
    %c0_6 = arith.constant 0 : index
    %8 = vector.load %arg4[%c0_5, %c0_6] : memref<4x32xbf16, #tpu.memory_space<vmem>>, vector<4x32xbf16>
    tpu.vector_store %arg4[%c0_5, %c0_6], %7 {strides = array<i32>} : memref<4x32xbf16, #tpu.memory_space<vmem>>, vector<4x32xbf16>,
    return
  }
  func.func @transform_0(%arg0: i32) -> (i32, i32) {
    %c0_i32 = arith.constant 0 : i32
    %c0_i32_0 = arith.constant 0 : i32
    return %arg0, %c0_i32 : i32, i32
  }
  func.func @transform_1(%arg0: i32) -> (i32, i32) {
    %c0_i32 = arith.constant 0 : i32
    %c0_i32_0 = arith.constant 0 : i32
    %c0_i32_1 = arith.constant 0 : i32
    return %c0_i32, %c0_i32_0 : i32, i32
  }
  func.func @transform_2(%arg0: i32) -> (i32, i32) {
    %c0_i32 = arith.constant 0 : i32
    %c0_i32_0 = arith.constant 0 : i32
    %c0_i32_1 = arith.constant 0 : i32
    return %c0_i32, %c0_i32_0 : i32, i32
  }
  func.func @transform_3(%arg0: i32) -> (i32, i32) {
    %c0_i32 = arith.constant 0 : i32
    %c0_i32_0 = arith.constant 0 : i32
    return %arg0, %c0_i32 : i32, i32
  }
}

module attributes {stable_mosaic.version = 11 : i64} {
  func.func @_entity_kv_bias_kernel(%arg0: memref<16x400xf32, #tpu.memory_space<vmem>>, %arg1: memref<16x400xf32, #tpu.memory_space<vmem>>, %arg2: memref<400x32xbf16, #tpu.memory_space<vmem>>, %arg3: memref<1x32xf32, #tpu.memory_space<vmem>>, %arg4: memref<1x400xbf16, #tpu.memory_space<vmem>>, %arg5: memref<1x1xf32, #tpu.memory_space<vmem>>, %arg6: memref<32x32xbf16, #tpu.memory_space<vmem>>, %arg7: memref<1x32xf32, #tpu.memory_space<vmem>>, %arg8: memref<32x32xbf16, #tpu.memory_space<vmem>>, %arg9: memref<1x32xf32, #tpu.memory_space<vmem>>, %arg10: memref<16x32xbf16, #tpu.memory_space<vmem>>, %arg11: memref<16x32xbf16, #tpu.memory_space<vmem>>, %arg12: memref<1x16xf32, #tpu.memory_space<vmem>>) attributes {dimension_semantics = [], scalar_prefetch = 0 : i64, scratch_operands = 0 : i64, tpu.core_type = #tpu.core_type<tc>} {
    %c0 = arith.constant 0 : index
    %c0_0 = arith.constant 0 : index
    %0 = vector.load %arg0[%c0, %c0_0] : memref<16x400xf32, #tpu.memory_space<vmem>>, vector<16x400xf32>
    %1 = arith.truncf %0 : vector<16x400xf32> to vector<16x400xbf16>
    %c0_1 = arith.constant 0 : index
    %c0_2 = arith.constant 0 : index
    %2 = vector.load %arg2[%c0_1, %c0_2] : memref<400x32xbf16, #tpu.memory_space<vmem>>, vector<400x32xbf16>
    %cst = arith.constant dense<0.000000e+00> : vector<16x32xf32>
    %3 = tpu.matmul %1, %2, %cst {dimension_numbers = #tpu.dot_dimension_numbers<[1], [0], [0], [1], [0, 0, 1, 1], [], []>} : vector<16x400xbf16>, vector<400x32xbf16>, vector<16x32xf32> -> vector<16x32xf32>
    %c0_3 = arith.constant 0 : index
    %c0_4 = arith.constant 0 : index
    %4 = vector.load %arg3[%c0_3, %c0_4] : memref<1x32xf32, #tpu.memory_space<vmem>>, vector<1x32xf32>
    %5 = vector.broadcast %4 : vector<1x32xf32> to vector<16x32xf32>
    %6 = arith.addf %3, %5 : vector<16x32xf32>
    %7 = arith.truncf %6 : vector<16x32xf32> to vector<16x32xbf16>
    %c0_5 = arith.constant 0 : index
    %c0_6 = arith.constant 0 : index
    %8 = vector.load %arg6[%c0_5, %c0_6] : memref<32x32xbf16, #tpu.memory_space<vmem>>, vector<32x32xbf16>
    %cst_7 = arith.constant dense<0.000000e+00> : vector<16x32xf32>
    %9 = tpu.matmul %7, %8, %cst_7 {dimension_numbers = #tpu.dot_dimension_numbers<[1], [0], [0], [1], [0, 0, 1, 1], [], []>} : vector<16x32xbf16>, vector<32x32xbf16>, vector<16x32xf32> -> vector<16x32xf32>
    %c0_8 = arith.constant 0 : index
    %c0_9 = arith.constant 0 : index
    %10 = vector.load %arg7[%c0_8, %c0_9] : memref<1x32xf32, #tpu.memory_space<vmem>>, vector<1x32xf32>
    %11 = vector.broadcast %10 : vector<1x32xf32> to vector<16x32xf32>
    %12 = arith.addf %9, %11 : vector<16x32xf32>
    %13 = arith.truncf %12 : vector<16x32xf32> to vector<16x32xbf16>
    %c0_10 = arith.constant 0 : index
    %c0_11 = arith.constant 0 : index
    %14 = vector.load %arg10[%c0_10, %c0_11] : memref<16x32xbf16, #tpu.memory_space<vmem>>, vector<16x32xbf16>
    tpu.vector_store %arg10[%c0_10, %c0_11], %13 {strides = array<i32>} : memref<16x32xbf16, #tpu.memory_space<vmem>>, vector<16x32xbf16>,
    %c0_12 = arith.constant 0 : index
    %c0_13 = arith.constant 0 : index
    %15 = vector.load %arg8[%c0_12, %c0_13] : memref<32x32xbf16, #tpu.memory_space<vmem>>, vector<32x32xbf16>
    %cst_14 = arith.constant dense<0.000000e+00> : vector<16x32xf32>
    %16 = tpu.matmul %7, %15, %cst_14 {dimension_numbers = #tpu.dot_dimension_numbers<[1], [0], [0], [1], [0, 0, 1, 1], [], []>} : vector<16x32xbf16>, vector<32x32xbf16>, vector<16x32xf32> -> vector<16x32xf32>
    %c0_15 = arith.constant 0 : index
    %c0_16 = arith.constant 0 : index
    %17 = vector.load %arg9[%c0_15, %c0_16] : memref<1x32xf32, #tpu.memory_space<vmem>>, vector<1x32xf32>
    %18 = vector.broadcast %17 : vector<1x32xf32> to vector<16x32xf32>
    %19 = arith.addf %16, %18 : vector<16x32xf32>
    %20 = arith.truncf %19 : vector<16x32xf32> to vector<16x32xbf16>
    %c0_17 = arith.constant 0 : index
    %c0_18 = arith.constant 0 : index
    %21 = vector.load %arg11[%c0_17, %c0_18] : memref<16x32xbf16, #tpu.memory_space<vmem>>, vector<16x32xbf16>
    tpu.vector_store %arg11[%c0_17, %c0_18], %20 {strides = array<i32>} : memref<16x32xbf16, #tpu.memory_space<vmem>>, vector<16x32xbf16>,
    %c0_19 = arith.constant 0 : index
    %c0_20 = arith.constant 0 : index
    %22 = vector.load %arg4[%c0_19, %c0_20] : memref<1x400xbf16, #tpu.memory_space<vmem>>, vector<1x400xbf16>
    %c0_21 = arith.constant 0 : index
    %c0_22 = arith.constant 0 : index
    %23 = vector.load %arg1[%c0_21, %c0_22] : memref<16x400xf32, #tpu.memory_space<vmem>>, vector<16x400xf32>
    %24 = arith.truncf %23 : vector<16x400xf32> to vector<16x400xbf16>
    "tpu.trace_start"() <{level = 10 : i32, message = "od,nd->on"}> : () -> ()
    %cst_23 = arith.constant dense<0.000000e+00> : vector<1x16xf32>
    %25 = tpu.matmul %22, %24, %cst_23 {dimension_numbers = #tpu.dot_dimension_numbers<[1], [1], [0], [0], [0, 0, 1, 0], [], []>} : vector<1x400xbf16>, vector<16x400xbf16>, vector<1x16xf32> -> vector<1x16xf32>
    "tpu.trace_stop"() : () -> ()
    %c0_24 = arith.constant 0 : index
    %c0_25 = arith.constant 0 : index
    %26 = vector.load %arg5[%c0_24, %c0_25] : memref<1x1xf32, #tpu.memory_space<vmem>>, vector<1x1xf32>
    %27 = vector.broadcast %26 : vector<1x1xf32> to vector<1x16xf32>
    %28 = arith.addf %25, %27 : vector<1x16xf32>
    %c0_26 = arith.constant 0 : index
    %c0_27 = arith.constant 0 : index
    %29 = vector.load %arg12[%c0_26, %c0_27] : memref<1x16xf32, #tpu.memory_space<vmem>>, vector<1x16xf32>
    tpu.vector_store %arg12[%c0_26, %c0_27], %28 {strides = array<i32>} : memref<1x16xf32, #tpu.memory_space<vmem>>, vector<1x16xf32>,
    return
  }
}

module attributes {stable_mosaic.version = 11 : i64} {
  func.func @_kg_block_kernel(%arg0: i32, %arg1: memref<4x32xbf16, #tpu.memory_space<vmem>>, %arg2: memref<16x32xbf16, #tpu.memory_space<vmem>>, %arg3: memref<16x32xbf16, #tpu.memory_space<vmem>>, %arg4: memref<1x16xf32, #tpu.memory_space<vmem>>, %arg5: memref<32x32xbf16, #tpu.memory_space<vmem>>, %arg6: memref<1x32xf32, #tpu.memory_space<vmem>>, %arg7: memref<32x32xbf16, #tpu.memory_space<vmem>>, %arg8: memref<1x32xf32, #tpu.memory_space<vmem>>, %arg9: memref<32x64xbf16, #tpu.memory_space<vmem>>, %arg10: memref<1x64xf32, #tpu.memory_space<vmem>>, %arg11: memref<64x32xbf16, #tpu.memory_space<vmem>>, %arg12: memref<1x32xf32, #tpu.memory_space<vmem>>, %arg13: memref<1x32xf32, #tpu.memory_space<vmem>>, %arg14: memref<1x32xf32, #tpu.memory_space<vmem>>, %arg15: memref<1x32xf32, #tpu.memory_space<vmem>>, %arg16: memref<1x32xf32, #tpu.memory_space<vmem>>, %arg17: memref<4x32xbf16, #tpu.memory_space<vmem>>) attributes {dimension_semantics = [#tpu.dimension_semantics<parallel>], iteration_bounds = array<i64: 1>, scalar_prefetch = 0 : i64, scratch_operands = 0 : i64, tpu.core_type = #tpu.core_type<tc>, window_params = [{transform_indices = @transform_0, window_bounds = array<i64: 4, 32>}, {pipeline_mode = #tpu.pipeline_mode<synchronous>, transform_indices = @transform_1, window_bounds = array<i64: 16, 32>}, {pipeline_mode = #tpu.pipeline_mode<synchronous>, transform_indices = @transform_2, window_bounds = array<i64: 16, 32>}, {pipeline_mode = #tpu.pipeline_mode<synchronous>, transform_indices = @transform_3, window_bounds = array<i64: 1, 16>}, {pipeline_mode = #tpu.pipeline_mode<synchronous>, transform_indices = @transform_4, window_bounds = array<i64: 32, 32>}, {pipeline_mode = #tpu.pipeline_mode<synchronous>, transform_indices = @transform_5, window_bounds = array<i64: 1, 32>}, {pipeline_mode = #tpu.pipeline_mode<synchronous>, transform_indices = @transform_6, window_bounds = array<i64: 32, 32>}, {pipeline_mode = #tpu.pipeline_mode<synchronous>, transform_indices = @transform_7, window_bounds = array<i64: 1, 32>}, {pipeline_mode = #tpu.pipeline_mode<synchronous>, transform_indices = @transform_8, window_bounds = array<i64: 32, 64>}, {pipeline_mode = #tpu.pipeline_mode<synchronous>, transform_indices = @transform_9, window_bounds = array<i64: 1, 64>}, {pipeline_mode = #tpu.pipeline_mode<synchronous>, transform_indices = @transform_10, window_bounds = array<i64: 64, 32>}, {pipeline_mode = #tpu.pipeline_mode<synchronous>, transform_indices = @transform_11, window_bounds = array<i64: 1, 32>}, {pipeline_mode = #tpu.pipeline_mode<synchronous>, transform_indices = @transform_12, window_bounds = array<i64: 1, 32>}, {pipeline_mode = #tpu.pipeline_mode<synchronous>, transform_indices = @transform_13, window_bounds = array<i64: 1, 32>}, {pipeline_mode = #tpu.pipeline_mode<synchronous>, transform_indices = @transform_14, window_bounds = array<i64: 1, 32>}, {pipeline_mode = #tpu.pipeline_mode<synchronous>, transform_indices = @transform_15, window_bounds = array<i64: 1, 32>}, {transform_indices = @transform_16, window_bounds = array<i64: 4, 32>}]} {
    %c0 = arith.constant 0 : index
    %c0_0 = arith.constant 0 : index
    %0 = vector.load %arg1[%c0, %c0_0] : memref<4x32xbf16, #tpu.memory_space<vmem>>, vector<4x32xbf16>
    %1 = arith.extf %0 : vector<4x32xbf16> to vector<4x32xf32>
    %c0_1 = arith.constant 0 : index
    %c0_2 = arith.constant 0 : index
    %2 = vector.load %arg2[%c0_1, %c0_2] : memref<16x32xbf16, #tpu.memory_space<vmem>>, vector<16x32xbf16>
    %c0_3 = arith.constant 0 : index
    %c0_4 = arith.constant 0 : index
    %3 = vector.load %arg3[%c0_3, %c0_4] : memref<16x32xbf16, #tpu.memory_space<vmem>>, vector<16x32xbf16>
    %c0_5 = arith.constant 0 : index
    %c0_6 = arith.constant 0 : index
    %4 = vector.load %arg4[%c0_5, %c0_6] : memref<1x16xf32, #tpu.memory_space<vmem>>, vector<1x16xf32>
    %c0_7 = arith.constant 0 : index
    %c0_8 = arith.constant 0 : index
    %5 = vector.load %arg5[%c0_7, %c0_8] : memref<32x32xbf16, #tpu.memory_space<vmem>>, vector<32x32xbf16>
    %c0_9 = arith.constant 0 : index
    %c0_10 = arith.constant 0 : index
    %6 = vector.load %arg6[%c0_9, %c0_10] : memref<1x32xf32, #tpu.memory_space<vmem>>, vector<1x32xf32>
    %c0_11 = arith.constant 0 : index
    %c0_12 = arith.constant 0 : index
    %7 = vector.load %arg7[%c0_11, %c0_12] : memref<32x32xbf16, #tpu.memory_space<vmem>>, vector<32x32xbf16>
    %c0_13 = arith.constant 0 : index
    %c0_14 = arith.constant 0 : index
    %8 = vector.load %arg8[%c0_13, %c0_14] : memref<1x32xf32, #tpu.memory_space<vmem>>, vector<1x32xf32>
    %c0_15 = arith.constant 0 : index
    %c0_16 = arith.constant 0 : index
    %9 = vector.load %arg9[%c0_15, %c0_16] : memref<32x64xbf16, #tpu.memory_space<vmem>>, vector<32x64xbf16>
    %c0_17 = arith.constant 0 : index
    %c0_18 = arith.constant 0 : index
    %10 = vector.load %arg10[%c0_17, %c0_18] : memref<1x64xf32, #tpu.memory_space<vmem>>, vector<1x64xf32>
    %c0_19 = arith.constant 0 : index
    %c0_20 = arith.constant 0 : index
    %11 = vector.load %arg11[%c0_19, %c0_20] : memref<64x32xbf16, #tpu.memory_space<vmem>>, vector<64x32xbf16>
    %c0_21 = arith.constant 0 : index
    %c0_22 = arith.constant 0 : index
    %12 = vector.load %arg12[%c0_21, %c0_22] : memref<1x32xf32, #tpu.memory_space<vmem>>, vector<1x32xf32>
    %c0_23 = arith.constant 0 : index
    %c0_24 = arith.constant 0 : index
    %13 = vector.load %arg13[%c0_23, %c0_24] : memref<1x32xf32, #tpu.memory_space<vmem>>, vector<1x32xf32>
    %c0_25 = arith.constant 0 : index
    %c0_26 = arith.constant 0 : index
    %14 = vector.load %arg14[%c0_25, %c0_26] : memref<1x32xf32, #tpu.memory_space<vmem>>, vector<1x32xf32>
    %c0_27 = arith.constant 0 : index
    %c0_28 = arith.constant 0 : index
    %15 = vector.load %arg15[%c0_27, %c0_28] : memref<1x32xf32, #tpu.memory_space<vmem>>, vector<1x32xf32>
    %c0_29 = arith.constant 0 : index
    %c0_30 = arith.constant 0 : index
    %16 = vector.load %arg16[%c0_29, %c0_30] : memref<1x32xf32, #tpu.memory_space<vmem>>, vector<1x32xf32>
    %cst = arith.constant dense<0.000000e+00> : vector<4xf32>
    %17 = vector.multi_reduction <add>, %1, %cst [1] : vector<4x32xf32> to vector<4xf32>
    %18 = vector.shape_cast %17 : vector<4xf32> to vector<4x1xf32>
    %cst_31 = arith.constant 3.200000e+01 : f32
    %19 = vector.broadcast %cst_31 : f32 to vector<4x1xf32>
    %20 = arith.divf %18, %19 : vector<4x1xf32>
    %21 = vector.broadcast %20 : vector<4x1xf32> to vector<4x32xf32>
    %22 = arith.subf %1, %21 : vector<4x32xf32>
    %23 = arith.mulf %22, %22 : vector<4x32xf32>
    %cst_32 = arith.constant dense<0.000000e+00> : vector<4xf32>
    %24 = vector.multi_reduction <add>, %23, %cst_32 [1] : vector<4x32xf32> to vector<4xf32>
    %25 = vector.shape_cast %24 : vector<4xf32> to vector<4x1xf32>
    %cst_33 = arith.constant 3.200000e+01 : f32
    %26 = vector.broadcast %cst_33 : f32 to vector<4x1xf32>
    %27 = arith.divf %25, %26 : vector<4x1xf32>
    %28 = vector.broadcast %20 : vector<4x1xf32> to vector<4x32xf32>
    %29 = arith.subf %1, %28 : vector<4x32xf32>
    %cst_34 = arith.constant 9.99999997E-7 : f32
    %30 = vector.broadcast %cst_34 : f32 to vector<4x1xf32>
    %31 = arith.addf %27, %30 : vector<4x1xf32>
    %32 = math.rsqrt %31 : vector<4x1xf32>
    %33 = vector.broadcast %32 : vector<4x1xf32> to vector<4x32xf32>
    %34 = arith.mulf %29, %33 : vector<4x32xf32>
    %35 = vector.broadcast %13 : vector<1x32xf32> to vector<4x32xf32>
    %36 = arith.mulf %34, %35 : vector<4x32xf32>
    %37 = vector.broadcast %14 : vector<1x32xf32> to vector<4x32xf32>
    %38 = arith.addf %36, %37 : vector<4x32xf32>
    %39 = arith.truncf %38 : vector<4x32xf32> to vector<4x32xbf16>
    %cst_35 = arith.constant dense<0.000000e+00> : vector<4x32xf32>
    %40 = tpu.matmul %39, %5, %cst_35 {dimension_numbers = #tpu.dot_dimension_numbers<[1], [0], [0], [1], [0, 0, 1, 1], [], []>} : vector<4x32xbf16>, vector<32x32xbf16>, vector<4x32xf32> -> vector<4x32xf32>
    %41 = vector.broadcast %6 : vector<1x32xf32> to vector<4x32xf32>
    %42 = arith.addf %40, %41 : vector<4x32xf32>
    %43 = vector.shape_cast %42 : vector<4x32xf32> to vector<4x4x8xf32>
    %44 = tpu.transpose %43, [1, 0, 2] : vector<4x4x8xf32> -> vector<4x4x8xf32>
    %45 = arith.truncf %44 : vector<4x4x8xf32> to vector<4x4x8xbf16>
    %46 = vector.shape_cast %2 : vector<16x32xbf16> to vector<16x4x8xbf16>
    %47 = tpu.transpose %46, [1, 0, 2] : vector<16x4x8xbf16> -> vector<4x16x8xbf16>
    %48 = vector.shape_cast %3 : vector<16x32xbf16> to vector<16x4x8xbf16>
    %49 = tpu.transpose %48, [1, 0, 2] : vector<16x4x8xbf16> -> vector<4x16x8xbf16>
    "tpu.trace_start"() <{level = 10 : i32, message = "hqd,hkd->hqk"}> : () -> ()
    %cst_36 = arith.constant dense<0.000000e+00> : vector<4x4x16xf32>
    %50 = tpu.matmul %45, %47, %cst_36 {dimension_numbers = #tpu.dot_dimension_numbers<[2], [2], [1], [1], [0, 0, 0, 1, 1, 1], [0], [0]>} : vector<4x4x8xbf16>, vector<4x16x8xbf16>, vector<4x4x16xf32> -> vector<4x4x16xf32>
    "tpu.trace_stop"() : () -> ()
    %cst_37 = arith.constant 0.353553385 : f32
    %51 = vector.broadcast %cst_37 : f32 to vector<4x4x16xf32>
    %52 = arith.mulf %50, %51 : vector<4x4x16xf32>
    %53 = vector.shape_cast %4 : vector<1x16xf32> to vector<1x1x16xf32>
    %54 = vector.broadcast %53 : vector<1x1x16xf32> to vector<4x4x16xf32>
    %55 = arith.addf %52, %54 : vector<4x4x16xf32>
    %cst_38 = arith.constant dense<0xFF800000> : vector<4x4xf32>
    %56 = vector.multi_reduction <maximumf>, %55, %cst_38 [2] : vector<4x4x16xf32> to vector<4x4xf32>
    %57 = vector.shape_cast %56 : vector<4x4xf32> to vector<4x4x1xf32>
    %58 = vector.broadcast %57 : vector<4x4x1xf32> to vector<4x4x16xf32>
    %59 = arith.subf %55, %58 : vector<4x4x16xf32>
    %60 = math.exp %59 : vector<4x4x16xf32>
    %cst_39 = arith.constant dense<0.000000e+00> : vector<4x4xf32>
    %61 = vector.multi_reduction <add>, %60, %cst_39 [2] : vector<4x4x16xf32> to vector<4x4xf32>
    %62 = vector.shape_cast %61 : vector<4x4xf32> to vector<4x4x1xf32>
    %63 = tpu.reciprocal %62 {approx = true} : vector<4x4x1xf32> -> vector<4x4x1xf32>
    %64 = vector.broadcast %63 : vector<4x4x1xf32> to vector<4x4x16xf32>
    %65 = arith.mulf %60, %64 : vector<4x4x16xf32>
    %66 = arith.truncf %65 : vector<4x4x16xf32> to vector<4x4x16xbf16>
    "tpu.trace_start"() <{level = 10 : i32, message = "hqk,hkd->hqd"}> : () -> ()
    %cst_40 = arith.constant dense<0.000000e+00> : vector<4x4x8xf32>
    %67 = tpu.matmul %66, %49, %cst_40 {dimension_numbers = #tpu.dot_dimension_numbers<[2], [1], [1], [2], [0, 0, 0, 1, 1, 2], [0], [0]>} : vector<4x4x16xbf16>, vector<4x16x8xbf16>, vector<4x4x8xf32> -> vector<4x4x8xf32>
    "tpu.trace_stop"() : () -> ()
    %68 = tpu.transpose %67, [1, 0, 2] : vector<4x4x8xf32> -> vector<4x4x8xf32>
    %69 = vector.shape_cast %68 : vector<4x4x8xf32> to vector<4x32xf32>
    %70 = arith.truncf %69 : vector<4x32xf32> to vector<4x32xbf16>
    %cst_41 = arith.constant dense<0.000000e+00> : vector<4x32xf32>
    %71 = tpu.matmul %70, %7, %cst_41 {dimension_numbers = #tpu.dot_dimension_numbers<[1], [0], [0], [1], [0, 0, 1, 1], [], []>} : vector<4x32xbf16>, vector<32x32xbf16>, vector<4x32xf32> -> vector<4x32xf32>
    %72 = vector.broadcast %8 : vector<1x32xf32> to vector<4x32xf32>
    %73 = arith.addf %71, %72 : vector<4x32xf32>
    %74 = arith.addf %1, %73 : vector<4x32xf32>
    %cst_42 = arith.constant dense<0.000000e+00> : vector<4xf32>
    %75 = vector.multi_reduction <add>, %74, %cst_42 [1] : vector<4x32xf32> to vector<4xf32>
    %76 = vector.shape_cast %75 : vector<4xf32> to vector<4x1xf32>
    %cst_43 = arith.constant 3.200000e+01 : f32
    %77 = vector.broadcast %cst_43 : f32 to vector<4x1xf32>
    %78 = arith.divf %76, %77 : vector<4x1xf32>
    %79 = vector.broadcast %78 : vector<4x1xf32> to vector<4x32xf32>
    %80 = arith.subf %74, %79 : vector<4x32xf32>
    %81 = arith.mulf %80, %80 : vector<4x32xf32>
    %cst_44 = arith.constant dense<0.000000e+00> : vector<4xf32>
    %82 = vector.multi_reduction <add>, %81, %cst_44 [1] : vector<4x32xf32> to vector<4xf32>
    %83 = vector.shape_cast %82 : vector<4xf32> to vector<4x1xf32>
    %cst_45 = arith.constant 3.200000e+01 : f32
    %84 = vector.broadcast %cst_45 : f32 to vector<4x1xf32>
    %85 = arith.divf %83, %84 : vector<4x1xf32>
    %86 = vector.broadcast %78 : vector<4x1xf32> to vector<4x32xf32>
    %87 = arith.subf %74, %86 : vector<4x32xf32>
    %cst_46 = arith.constant 9.99999997E-7 : f32
    %88 = vector.broadcast %cst_46 : f32 to vector<4x1xf32>
    %89 = arith.addf %85, %88 : vector<4x1xf32>
    %90 = math.rsqrt %89 : vector<4x1xf32>
    %91 = vector.broadcast %90 : vector<4x1xf32> to vector<4x32xf32>
    %92 = arith.mulf %87, %91 : vector<4x32xf32>
    %93 = vector.broadcast %15 : vector<1x32xf32> to vector<4x32xf32>
    %94 = arith.mulf %92, %93 : vector<4x32xf32>
    %95 = vector.broadcast %16 : vector<1x32xf32> to vector<4x32xf32>
    %96 = arith.addf %94, %95 : vector<4x32xf32>
    %97 = arith.truncf %96 : vector<4x32xf32> to vector<4x32xbf16>
    %cst_47 = arith.constant dense<0.000000e+00> : vector<4x64xf32>
    %98 = tpu.matmul %97, %9, %cst_47 {dimension_numbers = #tpu.dot_dimension_numbers<[1], [0], [0], [1], [0, 0, 1, 1], [], []>} : vector<4x32xbf16>, vector<32x64xbf16>, vector<4x64xf32> -> vector<4x64xf32>
    %99 = vector.broadcast %10 : vector<1x64xf32> to vector<4x64xf32>
    %100 = arith.addf %98, %99 : vector<4x64xf32>
    %cst_48 = arith.constant 0.000000e+00 : f32
    %101 = vector.broadcast %cst_48 : f32 to vector<4x64xf32>
    %102 = arith.maximumf %100, %101 : vector<4x64xf32>
    %103 = arith.truncf %102 : vector<4x64xf32> to vector<4x64xbf16>
    %cst_49 = arith.constant dense<0.000000e+00> : vector<4x32xf32>
    %104 = tpu.matmul %103, %11, %cst_49 {dimension_numbers = #tpu.dot_dimension_numbers<[1], [0], [0], [1], [0, 0, 1, 1], [], []>} : vector<4x64xbf16>, vector<64x32xbf16>, vector<4x32xf32> -> vector<4x32xf32>
    %105 = vector.broadcast %12 : vector<1x32xf32> to vector<4x32xf32>
    %106 = arith.addf %104, %105 : vector<4x32xf32>
    %107 = arith.addf %74, %106 : vector<4x32xf32>
    %108 = arith.truncf %107 : vector<4x32xf32> to vector<4x32xbf16>
    %c0_50 = arith.constant 0 : index
    %c0_51 = arith.constant 0 : index
    %109 = vector.load %arg17[%c0_50, %c0_51] : memref<4x32xbf16, #tpu.memory_space<vmem>>, vector<4x32xbf16>
    tpu.vector_store %arg17[%c0_50, %c0_51], %108 {strides = array<i32>} : memref<4x32xbf16, #tpu.memory_space<vmem>>, vector<4x32xbf16>,
    return
  }
  func.func @transform_0(%arg0: i32) -> (i32, i32) {
    %c0_i32 = arith.constant 0 : i32
    %c0_i32_0 = arith.constant 0 : i32
    return %arg0, %c0_i32 : i32, i32
  }
  func.func @transform_1(%arg0: i32) -> (i32, i32) {
    %c0_i32 = arith.constant 0 : i32
    %c0_i32_0 = arith.constant 0 : i32
    %c0_i32_1 = arith.constant 0 : i32
    return %c0_i32, %c0_i32_0 : i32, i32
  }
  func.func @transform_2(%arg0: i32) -> (i32, i32) {
    %c0_i32 = arith.constant 0 : i32
    %c0_i32_0 = arith.constant 0 : i32
    %c0_i32_1 = arith.constant 0 : i32
    return %c0_i32, %c0_i32_0 : i32, i32
  }
  func.func @transform_3(%arg0: i32) -> (i32, i32) {
    %c0_i32 = arith.constant 0 : i32
    %c0_i32_0 = arith.constant 0 : i32
    %c0_i32_1 = arith.constant 0 : i32
    return %c0_i32, %c0_i32_0 : i32, i32
  }
  func.func @transform_4(%arg0: i32) -> (i32, i32) {
    %c0_i32 = arith.constant 0 : i32
    %c0_i32_0 = arith.constant 0 : i32
    %c0_i32_1 = arith.constant 0 : i32
    return %c0_i32, %c0_i32_0 : i32, i32
  }
  func.func @transform_5(%arg0: i32) -> (i32, i32) {
    %c0_i32 = arith.constant 0 : i32
    %c0_i32_0 = arith.constant 0 : i32
    %c0_i32_1 = arith.constant 0 : i32
    return %c0_i32, %c0_i32_0 : i32, i32
  }
  func.func @transform_6(%arg0: i32) -> (i32, i32) {
    %c0_i32 = arith.constant 0 : i32
    %c0_i32_0 = arith.constant 0 : i32
    %c0_i32_1 = arith.constant 0 : i32
    return %c0_i32, %c0_i32_0 : i32, i32
  }
  func.func @transform_7(%arg0: i32) -> (i32, i32) {
    %c0_i32 = arith.constant 0 : i32
    %c0_i32_0 = arith.constant 0 : i32
    %c0_i32_1 = arith.constant 0 : i32
    return %c0_i32, %c0_i32_0 : i32, i32
  }
  func.func @transform_8(%arg0: i32) -> (i32, i32) {
    %c0_i32 = arith.constant 0 : i32
    %c0_i32_0 = arith.constant 0 : i32
    %c0_i32_1 = arith.constant 0 : i32
    return %c0_i32, %c0_i32_0 : i32, i32
  }
  func.func @transform_9(%arg0: i32) -> (i32, i32) {
    %c0_i32 = arith.constant 0 : i32
    %c0_i32_0 = arith.constant 0 : i32
    %c0_i32_1 = arith.constant 0 : i32
    return %c0_i32, %c0_i32_0 : i32, i32
  }
  func.func @transform_10(%arg0: i32) -> (i32, i32) {
    %c0_i32 = arith.constant 0 : i32
    %c0_i32_0 = arith.constant 0 : i32
    %c0_i32_1 = arith.constant 0 : i32
    return %c0_i32, %c0_i32_0 : i32, i32
  }
  func.func @transform_11(%arg0: i32) -> (i32, i32) {
    %c0_i32 = arith.constant 0 : i32
    %c0_i32_0 = arith.constant 0 : i32
    %c0_i32_1 = arith.constant 0 : i32
    return %c0_i32, %c0_i32_0 : i32, i32
  }
  func.func @transform_12(%arg0: i32) -> (i32, i32) {
    %c0_i32 = arith.constant 0 : i32
    %c0_i32_0 = arith.constant 0 : i32
    %c0_i32_1 = arith.constant 0 : i32
    return %c0_i32, %c0_i32_0 : i32, i32
  }
  func.func @transform_13(%arg0: i32) -> (i32, i32) {
    %c0_i32 = arith.constant 0 : i32
    %c0_i32_0 = arith.constant 0 : i32
    %c0_i32_1 = arith.constant 0 : i32
    return %c0_i32, %c0_i32_0 : i32, i32
  }
  func.func @transform_14(%arg0: i32) -> (i32, i32) {
    %c0_i32 = arith.constant 0 : i32
    %c0_i32_0 = arith.constant 0 : i32
    %c0_i32_1 = arith.constant 0 : i32
    return %c0_i32, %c0_i32_0 : i32, i32
  }
  func.func @transform_15(%arg0: i32) -> (i32, i32) {
    %c0_i32 = arith.constant 0 : i32
    %c0_i32_0 = arith.constant 0 : i32
    %c0_i32_1 = arith.constant 0 : i32
    return %c0_i32, %c0_i32_0 : i32, i32
  }
  func.func @transform_16(%arg0: i32) -> (i32, i32) {
    %c0_i32 = arith.constant 0 : i32
    %c0_i32_0 = arith.constant 0 : i32
    return %arg0, %c0_i32 : i32, i32
  }
}

module attributes {stable_mosaic.version = 11 : i64} {
  func.func @_linear_kernel(%arg0: i32, %arg1: memref<8x48xf32, #tpu.memory_space<vmem>>, %arg2: memref<48x32xbf16, #tpu.memory_space<vmem>>, %arg3: memref<1x32xf32, #tpu.memory_space<vmem>>, %arg4: memref<8x32xbf16, #tpu.memory_space<vmem>>) attributes {dimension_semantics = [#tpu.dimension_semantics<parallel>], iteration_bounds = array<i64: 2>, scalar_prefetch = 0 : i64, scratch_operands = 0 : i64, tpu.core_type = #tpu.core_type<tc>, window_params = [{transform_indices = @transform_0, window_bounds = array<i64: 8, 48>}, {pipeline_mode = #tpu.pipeline_mode<synchronous>, transform_indices = @transform_1, window_bounds = array<i64: 48, 32>}, {pipeline_mode = #tpu.pipeline_mode<synchronous>, transform_indices = @transform_2, window_bounds = array<i64: 1, 32>}, {transform_indices = @transform_3, window_bounds = array<i64: 8, 32>}]} {
    %c0 = arith.constant 0 : index
    %c0_0 = arith.constant 0 : index
    %0 = vector.load %arg1[%c0, %c0_0] : memref<8x48xf32, #tpu.memory_space<vmem>>, vector<8x48xf32>
    %1 = arith.truncf %0 : vector<8x48xf32> to vector<8x48xbf16>
    %c0_1 = arith.constant 0 : index
    %c0_2 = arith.constant 0 : index
    %2 = vector.load %arg2[%c0_1, %c0_2] : memref<48x32xbf16, #tpu.memory_space<vmem>>, vector<48x32xbf16>
    %cst = arith.constant dense<0.000000e+00> : vector<8x32xf32>
    %3 = tpu.matmul %1, %2, %cst {dimension_numbers = #tpu.dot_dimension_numbers<[1], [0], [0], [1], [0, 0, 1, 1], [], []>} : vector<8x48xbf16>, vector<48x32xbf16>, vector<8x32xf32> -> vector<8x32xf32>
    %c0_3 = arith.constant 0 : index
    %c0_4 = arith.constant 0 : index
    %4 = vector.load %arg3[%c0_3, %c0_4] : memref<1x32xf32, #tpu.memory_space<vmem>>, vector<1x32xf32>
    %5 = vector.broadcast %4 : vector<1x32xf32> to vector<8x32xf32>
    %6 = arith.addf %3, %5 : vector<8x32xf32>
    %7 = arith.truncf %6 : vector<8x32xf32> to vector<8x32xbf16>
    %c0_5 = arith.constant 0 : index
    %c0_6 = arith.constant 0 : index
    %8 = vector.load %arg4[%c0_5, %c0_6] : memref<8x32xbf16, #tpu.memory_space<vmem>>, vector<8x32xbf16>
    tpu.vector_store %arg4[%c0_5, %c0_6], %7 {strides = array<i32>} : memref<8x32xbf16, #tpu.memory_space<vmem>>, vector<8x32xbf16>,
    return
  }
  func.func @transform_0(%arg0: i32) -> (i32, i32) {
    %c0_i32 = arith.constant 0 : i32
    %c0_i32_0 = arith.constant 0 : i32
    return %arg0, %c0_i32 : i32, i32
  }
  func.func @transform_1(%arg0: i32) -> (i32, i32) {
    %c0_i32 = arith.constant 0 : i32
    %c0_i32_0 = arith.constant 0 : i32
    %c0_i32_1 = arith.constant 0 : i32
    return %c0_i32, %c0_i32_0 : i32, i32
  }
  func.func @transform_2(%arg0: i32) -> (i32, i32) {
    %c0_i32 = arith.constant 0 : i32
    %c0_i32_0 = arith.constant 0 : i32
    %c0_i32_1 = arith.constant 0 : i32
    return %c0_i32, %c0_i32_0 : i32, i32
  }
  func.func @transform_3(%arg0: i32) -> (i32, i32) {
    %c0_i32 = arith.constant 0 : i32
    %c0_i32_0 = arith.constant 0 : i32
    return %arg0, %c0_i32 : i32, i32
  }
}

module attributes {stable_mosaic.version = 11 : i64} {
  func.func @_know_kv_kernel(%arg0: i32, %arg1: memref<8x768xbf16, #tpu.memory_space<vmem>>, %arg2: memref<768x32xbf16, #tpu.memory_space<vmem>>, %arg3: memref<1x32xf32, #tpu.memory_space<vmem>>, %arg4: memref<32x32xbf16, #tpu.memory_space<vmem>>, %arg5: memref<1x32xf32, #tpu.memory_space<vmem>>, %arg6: memref<32x32xbf16, #tpu.memory_space<vmem>>, %arg7: memref<1x32xf32, #tpu.memory_space<vmem>>, %arg8: memref<8x32xbf16, #tpu.memory_space<vmem>>, %arg9: memref<8x32xbf16, #tpu.memory_space<vmem>>) attributes {dimension_semantics = [#tpu.dimension_semantics<parallel>], iteration_bounds = array<i64: 2>, scalar_prefetch = 0 : i64, scratch_operands = 0 : i64, tpu.core_type = #tpu.core_type<tc>, window_params = [{transform_indices = @transform_0, window_bounds = array<i64: 8, 768>}, {pipeline_mode = #tpu.pipeline_mode<synchronous>, transform_indices = @transform_1, window_bounds = array<i64: 768, 32>}, {pipeline_mode = #tpu.pipeline_mode<synchronous>, transform_indices = @transform_2, window_bounds = array<i64: 1, 32>}, {pipeline_mode = #tpu.pipeline_mode<synchronous>, transform_indices = @transform_3, window_bounds = array<i64: 32, 32>}, {pipeline_mode = #tpu.pipeline_mode<synchronous>, transform_indices = @transform_4, window_bounds = array<i64: 1, 32>}, {pipeline_mode = #tpu.pipeline_mode<synchronous>, transform_indices = @transform_5, window_bounds = array<i64: 32, 32>}, {pipeline_mode = #tpu.pipeline_mode<synchronous>, transform_indices = @transform_6, window_bounds = array<i64: 1, 32>}, {transform_indices = @transform_7, window_bounds = array<i64: 8, 32>}, {transform_indices = @transform_8, window_bounds = array<i64: 8, 32>}]} {
    %c0 = arith.constant 0 : index
    %c0_0 = arith.constant 0 : index
    %0 = vector.load %arg1[%c0, %c0_0] : memref<8x768xbf16, #tpu.memory_space<vmem>>, vector<8x768xbf16>
    %c0_1 = arith.constant 0 : index
    %c0_2 = arith.constant 0 : index
    %1 = vector.load %arg2[%c0_1, %c0_2] : memref<768x32xbf16, #tpu.memory_space<vmem>>, vector<768x32xbf16>
    %cst = arith.constant dense<0.000000e+00> : vector<8x32xf32>
    %2 = tpu.matmul %0, %1, %cst {dimension_numbers = #tpu.dot_dimension_numbers<[1], [0], [0], [1], [0, 0, 1, 1], [], []>} : vector<8x768xbf16>, vector<768x32xbf16>, vector<8x32xf32> -> vector<8x32xf32>
    %c0_3 = arith.constant 0 : index
    %c0_4 = arith.constant 0 : index
    %3 = vector.load %arg3[%c0_3, %c0_4] : memref<1x32xf32, #tpu.memory_space<vmem>>, vector<1x32xf32>
    %4 = vector.broadcast %3 : vector<1x32xf32> to vector<8x32xf32>
    %5 = arith.addf %2, %4 : vector<8x32xf32>
    %6 = arith.truncf %5 : vector<8x32xf32> to vector<8x32xbf16>
    %c0_5 = arith.constant 0 : index
    %c0_6 = arith.constant 0 : index
    %7 = vector.load %arg4[%c0_5, %c0_6] : memref<32x32xbf16, #tpu.memory_space<vmem>>, vector<32x32xbf16>
    %cst_7 = arith.constant dense<0.000000e+00> : vector<8x32xf32>
    %8 = tpu.matmul %6, %7, %cst_7 {dimension_numbers = #tpu.dot_dimension_numbers<[1], [0], [0], [1], [0, 0, 1, 1], [], []>} : vector<8x32xbf16>, vector<32x32xbf16>, vector<8x32xf32> -> vector<8x32xf32>
    %c0_8 = arith.constant 0 : index
    %c0_9 = arith.constant 0 : index
    %9 = vector.load %arg5[%c0_8, %c0_9] : memref<1x32xf32, #tpu.memory_space<vmem>>, vector<1x32xf32>
    %10 = vector.broadcast %9 : vector<1x32xf32> to vector<8x32xf32>
    %11 = arith.addf %8, %10 : vector<8x32xf32>
    %12 = arith.truncf %11 : vector<8x32xf32> to vector<8x32xbf16>
    %c0_10 = arith.constant 0 : index
    %c0_11 = arith.constant 0 : index
    %13 = vector.load %arg8[%c0_10, %c0_11] : memref<8x32xbf16, #tpu.memory_space<vmem>>, vector<8x32xbf16>
    tpu.vector_store %arg8[%c0_10, %c0_11], %12 {strides = array<i32>} : memref<8x32xbf16, #tpu.memory_space<vmem>>, vector<8x32xbf16>,
    %c0_12 = arith.constant 0 : index
    %c0_13 = arith.constant 0 : index
    %14 = vector.load %arg6[%c0_12, %c0_13] : memref<32x32xbf16, #tpu.memory_space<vmem>>, vector<32x32xbf16>
    %cst_14 = arith.constant dense<0.000000e+00> : vector<8x32xf32>
    %15 = tpu.matmul %6, %14, %cst_14 {dimension_numbers = #tpu.dot_dimension_numbers<[1], [0], [0], [1], [0, 0, 1, 1], [], []>} : vector<8x32xbf16>, vector<32x32xbf16>, vector<8x32xf32> -> vector<8x32xf32>
    %c0_15 = arith.constant 0 : index
    %c0_16 = arith.constant 0 : index
    %16 = vector.load %arg7[%c0_15, %c0_16] : memref<1x32xf32, #tpu.memory_space<vmem>>, vector<1x32xf32>
    %17 = vector.broadcast %16 : vector<1x32xf32> to vector<8x32xf32>
    %18 = arith.addf %15, %17 : vector<8x32xf32>
    %19 = arith.truncf %18 : vector<8x32xf32> to vector<8x32xbf16>
    %c0_17 = arith.constant 0 : index
    %c0_18 = arith.constant 0 : index
    %20 = vector.load %arg9[%c0_17, %c0_18] : memref<8x32xbf16, #tpu.memory_space<vmem>>, vector<8x32xbf16>
    tpu.vector_store %arg9[%c0_17, %c0_18], %19 {strides = array<i32>} : memref<8x32xbf16, #tpu.memory_space<vmem>>, vector<8x32xbf16>,
    return
  }
  func.func @transform_0(%arg0: i32) -> (i32, i32) {
    %c0_i32 = arith.constant 0 : i32
    %c0_i32_0 = arith.constant 0 : i32
    return %arg0, %c0_i32 : i32, i32
  }
  func.func @transform_1(%arg0: i32) -> (i32, i32) {
    %c0_i32 = arith.constant 0 : i32
    %c0_i32_0 = arith.constant 0 : i32
    %c0_i32_1 = arith.constant 0 : i32
    return %c0_i32, %c0_i32_0 : i32, i32
  }
  func.func @transform_2(%arg0: i32) -> (i32, i32) {
    %c0_i32 = arith.constant 0 : i32
    %c0_i32_0 = arith.constant 0 : i32
    %c0_i32_1 = arith.constant 0 : i32
    return %c0_i32, %c0_i32_0 : i32, i32
  }
  func.func @transform_3(%arg0: i32) -> (i32, i32) {
    %c0_i32 = arith.constant 0 : i32
    %c0_i32_0 = arith.constant 0 : i32
    %c0_i32_1 = arith.constant 0 : i32
    return %c0_i32, %c0_i32_0 : i32, i32
  }
  func.func @transform_4(%arg0: i32) -> (i32, i32) {
    %c0_i32 = arith.constant 0 : i32
    %c0_i32_0 = arith.constant 0 : i32
    %c0_i32_1 = arith.constant 0 : i32
    return %c0_i32, %c0_i32_0 : i32, i32
  }
  func.func @transform_5(%arg0: i32) -> (i32, i32) {
    %c0_i32 = arith.constant 0 : i32
    %c0_i32_0 = arith.constant 0 : i32
    %c0_i32_1 = arith.constant 0 : i32
    return %c0_i32, %c0_i32_0 : i32, i32
  }
  func.func @transform_6(%arg0: i32) -> (i32, i32) {
    %c0_i32 = arith.constant 0 : i32
    %c0_i32_0 = arith.constant 0 : i32
    %c0_i32_1 = arith.constant 0 : i32
    return %c0_i32, %c0_i32_0 : i32, i32
  }
  func.func @transform_7(%arg0: i32) -> (i32, i32) {
    %c0_i32 = arith.constant 0 : i32
    %c0_i32_0 = arith.constant 0 : i32
    return %arg0, %c0_i32 : i32, i32
  }
  func.func @transform_8(%arg0: i32) -> (i32, i32) {
    %c0_i32 = arith.constant 0 : i32
    %c0_i32_0 = arith.constant 0 : i32
    return %arg0, %c0_i32 : i32, i32
  }
}

module attributes {stable_mosaic.version = 11 : i64} {
  func.func @_know_block_kernel(%arg0: i32, %arg1: memref<1x8x32xbf16, #tpu.memory_space<vmem>>, %arg2: memref<1x8x32xbf16, #tpu.memory_space<vmem>>, %arg3: memref<1x8x32xbf16, #tpu.memory_space<vmem>>, %arg4: memref<32x32xbf16, #tpu.memory_space<vmem>>, %arg5: memref<1x32xf32, #tpu.memory_space<vmem>>, %arg6: memref<32x32xbf16, #tpu.memory_space<vmem>>, %arg7: memref<1x32xf32, #tpu.memory_space<vmem>>, %arg8: memref<32x64xbf16, #tpu.memory_space<vmem>>, %arg9: memref<1x64xf32, #tpu.memory_space<vmem>>, %arg10: memref<64x32xbf16, #tpu.memory_space<vmem>>, %arg11: memref<1x32xf32, #tpu.memory_space<vmem>>, %arg12: memref<1x32xf32, #tpu.memory_space<vmem>>, %arg13: memref<1x32xf32, #tpu.memory_space<vmem>>, %arg14: memref<1x32xf32, #tpu.memory_space<vmem>>, %arg15: memref<1x32xf32, #tpu.memory_space<vmem>>, %arg16: memref<1x8x32xbf16, #tpu.memory_space<vmem>>) attributes {dimension_semantics = [#tpu.dimension_semantics<parallel>], iteration_bounds = array<i64: 2>, scalar_prefetch = 0 : i64, scratch_operands = 0 : i64, tpu.core_type = #tpu.core_type<tc>, window_params = [{transform_indices = @transform_0, window_bounds = array<i64: 1, 8, 32>}, {transform_indices = @transform_1, window_bounds = array<i64: 1, 8, 32>}, {transform_indices = @transform_2, window_bounds = array<i64: 1, 8, 32>}, {pipeline_mode = #tpu.pipeline_mode<synchronous>, transform_indices = @transform_3, window_bounds = array<i64: 32, 32>}, {pipeline_mode = #tpu.pipeline_mode<synchronous>, transform_indices = @transform_4, window_bounds = array<i64: 1, 32>}, {pipeline_mode = #tpu.pipeline_mode<synchronous>, transform_indices = @transform_5, window_bounds = array<i64: 32, 32>}, {pipeline_mode = #tpu.pipeline_mode<synchronous>, transform_indices = @transform_6, window_bounds = array<i64: 1, 32>}, {pipeline_mode = #tpu.pipeline_mode<synchronous>, transform_indices = @transform_7, window_bounds = array<i64: 32, 64>}, {pipeline_mode = #tpu.pipeline_mode<synchronous>, transform_indices = @transform_8, window_bounds = array<i64: 1, 64>}, {pipeline_mode = #tpu.pipeline_mode<synchronous>, transform_indices = @transform_9, window_bounds = array<i64: 64, 32>}, {pipeline_mode = #tpu.pipeline_mode<synchronous>, transform_indices = @transform_10, window_bounds = array<i64: 1, 32>}, {pipeline_mode = #tpu.pipeline_mode<synchronous>, transform_indices = @transform_11, window_bounds = array<i64: 1, 32>}, {pipeline_mode = #tpu.pipeline_mode<synchronous>, transform_indices = @transform_12, window_bounds = array<i64: 1, 32>}, {pipeline_mode = #tpu.pipeline_mode<synchronous>, transform_indices = @transform_13, window_bounds = array<i64: 1, 32>}, {pipeline_mode = #tpu.pipeline_mode<synchronous>, transform_indices = @transform_14, window_bounds = array<i64: 1, 32>}, {transform_indices = @transform_15, window_bounds = array<i64: 1, 8, 32>}]} {
    %c0 = arith.constant 0 : index
    %c0_0 = arith.constant 0 : index
    %c0_1 = arith.constant 0 : index
    %0 = vector.load %arg1[%c0, %c0_0, %c0_1] : memref<1x8x32xbf16, #tpu.memory_space<vmem>>, vector<1x8x32xbf16>
    %1 = vector.shape_cast %0 : vector<1x8x32xbf16> to vector<8x32xbf16>
    %2 = arith.extf %1 : vector<8x32xbf16> to vector<8x32xf32>
    %c0_2 = arith.constant 0 : index
    %c0_3 = arith.constant 0 : index
    %c0_4 = arith.constant 0 : index
    %3 = vector.load %arg2[%c0_2, %c0_3, %c0_4] : memref<1x8x32xbf16, #tpu.memory_space<vmem>>, vector<1x8x32xbf16>
    %4 = vector.shape_cast %3 : vector<1x8x32xbf16> to vector<8x32xbf16>
    %c0_5 = arith.constant 0 : index
    %c0_6 = arith.constant 0 : index
    %c0_7 = arith.constant 0 : index
    %5 = vector.load %arg3[%c0_5, %c0_6, %c0_7] : memref<1x8x32xbf16, #tpu.memory_space<vmem>>, vector<1x8x32xbf16>
    %6 = vector.shape_cast %5 : vector<1x8x32xbf16> to vector<8x32xbf16>
    %c0_8 = arith.constant 0 : index
    %c0_9 = arith.constant 0 : index
    %7 = vector.load %arg4[%c0_8, %c0_9] : memref<32x32xbf16, #tpu.memory_space<vmem>>, vector<32x32xbf16>
    %c0_10 = arith.constant 0 : index
    %c0_11 = arith.constant 0 : index
    %8 = vector.load %arg5[%c0_10, %c0_11] : memref<1x32xf32, #tpu.memory_space<vmem>>, vector<1x32xf32>
    %c0_12 = arith.constant 0 : index
    %c0_13 = arith.constant 0 : index
    %9 = vector.load %arg6[%c0_12, %c0_13] : memref<32x32xbf16, #tpu.memory_space<vmem>>, vector<32x32xbf16>
    %c0_14 = arith.constant 0 : index
    %c0_15 = arith.constant 0 : index
    %10 = vector.load %arg7[%c0_14, %c0_15] : memref<1x32xf32, #tpu.memory_space<vmem>>, vector<1x32xf32>
    %c0_16 = arith.constant 0 : index
    %c0_17 = arith.constant 0 : index
    %11 = vector.load %arg8[%c0_16, %c0_17] : memref<32x64xbf16, #tpu.memory_space<vmem>>, vector<32x64xbf16>
    %c0_18 = arith.constant 0 : index
    %c0_19 = arith.constant 0 : index
    %12 = vector.load %arg9[%c0_18, %c0_19] : memref<1x64xf32, #tpu.memory_space<vmem>>, vector<1x64xf32>
    %c0_20 = arith.constant 0 : index
    %c0_21 = arith.constant 0 : index
    %13 = vector.load %arg10[%c0_20, %c0_21] : memref<64x32xbf16, #tpu.memory_space<vmem>>, vector<64x32xbf16>
    %c0_22 = arith.constant 0 : index
    %c0_23 = arith.constant 0 : index
    %14 = vector.load %arg11[%c0_22, %c0_23] : memref<1x32xf32, #tpu.memory_space<vmem>>, vector<1x32xf32>
    %c0_24 = arith.constant 0 : index
    %c0_25 = arith.constant 0 : index
    %15 = vector.load %arg12[%c0_24, %c0_25] : memref<1x32xf32, #tpu.memory_space<vmem>>, vector<1x32xf32>
    %c0_26 = arith.constant 0 : index
    %c0_27 = arith.constant 0 : index
    %16 = vector.load %arg13[%c0_26, %c0_27] : memref<1x32xf32, #tpu.memory_space<vmem>>, vector<1x32xf32>
    %c0_28 = arith.constant 0 : index
    %c0_29 = arith.constant 0 : index
    %17 = vector.load %arg14[%c0_28, %c0_29] : memref<1x32xf32, #tpu.memory_space<vmem>>, vector<1x32xf32>
    %c0_30 = arith.constant 0 : index
    %c0_31 = arith.constant 0 : index
    %18 = vector.load %arg15[%c0_30, %c0_31] : memref<1x32xf32, #tpu.memory_space<vmem>>, vector<1x32xf32>
    %cst = arith.constant dense<0.000000e+00> : vector<8xf32>
    %19 = vector.multi_reduction <add>, %2, %cst [1] : vector<8x32xf32> to vector<8xf32>
    %20 = vector.shape_cast %19 : vector<8xf32> to vector<8x1xf32>
    %cst_32 = arith.constant 3.200000e+01 : f32
    %21 = vector.broadcast %cst_32 : f32 to vector<8x1xf32>
    %22 = arith.divf %20, %21 : vector<8x1xf32>
    %23 = vector.broadcast %22 : vector<8x1xf32> to vector<8x32xf32>
    %24 = arith.subf %2, %23 : vector<8x32xf32>
    %25 = arith.mulf %24, %24 : vector<8x32xf32>
    %cst_33 = arith.constant dense<0.000000e+00> : vector<8xf32>
    %26 = vector.multi_reduction <add>, %25, %cst_33 [1] : vector<8x32xf32> to vector<8xf32>
    %27 = vector.shape_cast %26 : vector<8xf32> to vector<8x1xf32>
    %cst_34 = arith.constant 3.200000e+01 : f32
    %28 = vector.broadcast %cst_34 : f32 to vector<8x1xf32>
    %29 = arith.divf %27, %28 : vector<8x1xf32>
    %30 = vector.broadcast %22 : vector<8x1xf32> to vector<8x32xf32>
    %31 = arith.subf %2, %30 : vector<8x32xf32>
    %cst_35 = arith.constant 9.99999997E-7 : f32
    %32 = vector.broadcast %cst_35 : f32 to vector<8x1xf32>
    %33 = arith.addf %29, %32 : vector<8x1xf32>
    %34 = math.rsqrt %33 : vector<8x1xf32>
    %35 = vector.broadcast %34 : vector<8x1xf32> to vector<8x32xf32>
    %36 = arith.mulf %31, %35 : vector<8x32xf32>
    %37 = vector.broadcast %15 : vector<1x32xf32> to vector<8x32xf32>
    %38 = arith.mulf %36, %37 : vector<8x32xf32>
    %39 = vector.broadcast %16 : vector<1x32xf32> to vector<8x32xf32>
    %40 = arith.addf %38, %39 : vector<8x32xf32>
    %41 = arith.truncf %40 : vector<8x32xf32> to vector<8x32xbf16>
    %cst_36 = arith.constant dense<0.000000e+00> : vector<8x32xf32>
    %42 = tpu.matmul %41, %7, %cst_36 {dimension_numbers = #tpu.dot_dimension_numbers<[1], [0], [0], [1], [0, 0, 1, 1], [], []>} : vector<8x32xbf16>, vector<32x32xbf16>, vector<8x32xf32> -> vector<8x32xf32>
    %43 = vector.broadcast %8 : vector<1x32xf32> to vector<8x32xf32>
    %44 = arith.addf %42, %43 : vector<8x32xf32>
    %45 = vector.shape_cast %44 : vector<8x32xf32> to vector<8x4x8xf32>
    %46 = tpu.transpose %45, [1, 0, 2] : vector<8x4x8xf32> -> vector<4x8x8xf32>
    %47 = arith.truncf %46 : vector<4x8x8xf32> to vector<4x8x8xbf16>
    %48 = vector.shape_cast %4 : vector<8x32xbf16> to vector<8x4x8xbf16>
    %49 = tpu.transpose %48, [1, 0, 2] : vector<8x4x8xbf16> -> vector<4x8x8xbf16>
    %50 = vector.shape_cast %6 : vector<8x32xbf16> to vector<8x4x8xbf16>
    %51 = tpu.transpose %50, [1, 0, 2] : vector<8x4x8xbf16> -> vector<4x8x8xbf16>
    "tpu.trace_start"() <{level = 10 : i32, message = "hqd,hkd->hqk"}> : () -> ()
    %cst_37 = arith.constant dense<0.000000e+00> : vector<4x8x8xf32>
    %52 = tpu.matmul %47, %49, %cst_37 {dimension_numbers = #tpu.dot_dimension_numbers<[2], [2], [1], [1], [0, 0, 0, 1, 1, 1], [0], [0]>} : vector<4x8x8xbf16>, vector<4x8x8xbf16>, vector<4x8x8xf32> -> vector<4x8x8xf32>
    "tpu.trace_stop"() : () -> ()
    %cst_38 = arith.constant 0.353553385 : f32
    %53 = vector.broadcast %cst_38 : f32 to vector<4x8x8xf32>
    %54 = arith.mulf %52, %53 : vector<4x8x8xf32>
    %cst_39 = arith.constant dense<0xFF800000> : vector<4x8xf32>
    %55 = vector.multi_reduction <maximumf>, %54, %cst_39 [2] : vector<4x8x8xf32> to vector<4x8xf32>
    %56 = vector.shape_cast %55 : vector<4x8xf32> to vector<4x8x1xf32>
    %57 = vector.broadcast %56 : vector<4x8x1xf32> to vector<4x8x8xf32>
    %58 = arith.subf %54, %57 : vector<4x8x8xf32>
    %59 = math.exp %58 : vector<4x8x8xf32>
    %cst_40 = arith.constant dense<0.000000e+00> : vector<4x8xf32>
    %60 = vector.multi_reduction <add>, %59, %cst_40 [2] : vector<4x8x8xf32> to vector<4x8xf32>
    %61 = vector.shape_cast %60 : vector<4x8xf32> to vector<4x8x1xf32>
    %62 = tpu.reciprocal %61 {approx = true} : vector<4x8x1xf32> -> vector<4x8x1xf32>
    %63 = vector.broadcast %62 : vector<4x8x1xf32> to vector<4x8x8xf32>
    %64 = arith.mulf %59, %63 : vector<4x8x8xf32>
    %65 = arith.truncf %64 : vector<4x8x8xf32> to vector<4x8x8xbf16>
    "tpu.trace_start"() <{level = 10 : i32, message = "hqk,hkd->hqd"}> : () -> ()
    %cst_41 = arith.constant dense<0.000000e+00> : vector<4x8x8xf32>
    %66 = tpu.matmul %65, %51, %cst_41 {dimension_numbers = #tpu.dot_dimension_numbers<[2], [1], [1], [2], [0, 0, 0, 1, 1, 2], [0], [0]>} : vector<4x8x8xbf16>, vector<4x8x8xbf16>, vector<4x8x8xf32> -> vector<4x8x8xf32>
    "tpu.trace_stop"() : () -> ()
    %67 = tpu.transpose %66, [1, 0, 2] : vector<4x8x8xf32> -> vector<8x4x8xf32>
    %68 = vector.shape_cast %67 : vector<8x4x8xf32> to vector<8x32xf32>
    %69 = arith.truncf %68 : vector<8x32xf32> to vector<8x32xbf16>
    %cst_42 = arith.constant dense<0.000000e+00> : vector<8x32xf32>
    %70 = tpu.matmul %69, %9, %cst_42 {dimension_numbers = #tpu.dot_dimension_numbers<[1], [0], [0], [1], [0, 0, 1, 1], [], []>} : vector<8x32xbf16>, vector<32x32xbf16>, vector<8x32xf32> -> vector<8x32xf32>
    %71 = vector.broadcast %10 : vector<1x32xf32> to vector<8x32xf32>
    %72 = arith.addf %70, %71 : vector<8x32xf32>
    %73 = arith.addf %2, %72 : vector<8x32xf32>
    %cst_43 = arith.constant dense<0.000000e+00> : vector<8xf32>
    %74 = vector.multi_reduction <add>, %73, %cst_43 [1] : vector<8x32xf32> to vector<8xf32>
    %75 = vector.shape_cast %74 : vector<8xf32> to vector<8x1xf32>
    %cst_44 = arith.constant 3.200000e+01 : f32
    %76 = vector.broadcast %cst_44 : f32 to vector<8x1xf32>
    %77 = arith.divf %75, %76 : vector<8x1xf32>
    %78 = vector.broadcast %77 : vector<8x1xf32> to vector<8x32xf32>
    %79 = arith.subf %73, %78 : vector<8x32xf32>
    %80 = arith.mulf %79, %79 : vector<8x32xf32>
    %cst_45 = arith.constant dense<0.000000e+00> : vector<8xf32>
    %81 = vector.multi_reduction <add>, %80, %cst_45 [1] : vector<8x32xf32> to vector<8xf32>
    %82 = vector.shape_cast %81 : vector<8xf32> to vector<8x1xf32>
    %cst_46 = arith.constant 3.200000e+01 : f32
    %83 = vector.broadcast %cst_46 : f32 to vector<8x1xf32>
    %84 = arith.divf %82, %83 : vector<8x1xf32>
    %85 = vector.broadcast %77 : vector<8x1xf32> to vector<8x32xf32>
    %86 = arith.subf %73, %85 : vector<8x32xf32>
    %cst_47 = arith.constant 9.99999997E-7 : f32
    %87 = vector.broadcast %cst_47 : f32 to vector<8x1xf32>
    %88 = arith.addf %84, %87 : vector<8x1xf32>
    %89 = math.rsqrt %88 : vector<8x1xf32>
    %90 = vector.broadcast %89 : vector<8x1xf32> to vector<8x32xf32>
    %91 = arith.mulf %86, %90 : vector<8x32xf32>
    %92 = vector.broadcast %17 : vector<1x32xf32> to vector<8x32xf32>
    %93 = arith.mulf %91, %92 : vector<8x32xf32>
    %94 = vector.broadcast %18 : vector<1x32xf32> to vector<8x32xf32>
    %95 = arith.addf %93, %94 : vector<8x32xf32>
    %96 = arith.truncf %95 : vector<8x32xf32> to vector<8x32xbf16>
    %cst_48 = arith.constant dense<0.000000e+00> : vector<8x64xf32>
    %97 = tpu.matmul %96, %11, %cst_48 {dimension_numbers = #tpu.dot_dimension_numbers<[1], [0], [0], [1], [0, 0, 1, 1], [], []>} : vector<8x32xbf16>, vector<32x64xbf16>, vector<8x64xf32> -> vector<8x64xf32>
    %98 = vector.broadcast %12 : vector<1x64xf32> to vector<8x64xf32>
    %99 = arith.addf %97, %98 : vector<8x64xf32>
    %cst_49 = arith.constant 0.000000e+00 : f32
    %100 = vector.broadcast %cst_49 : f32 to vector<8x64xf32>
    %101 = arith.maximumf %99, %100 : vector<8x64xf32>
    %102 = arith.truncf %101 : vector<8x64xf32> to vector<8x64xbf16>
    %cst_50 = arith.constant dense<0.000000e+00> : vector<8x32xf32>
    %103 = tpu.matmul %102, %13, %cst_50 {dimension_numbers = #tpu.dot_dimension_numbers<[1], [0], [0], [1], [0, 0, 1, 1], [], []>} : vector<8x64xbf16>, vector<64x32xbf16>, vector<8x32xf32> -> vector<8x32xf32>
    %104 = vector.broadcast %14 : vector<1x32xf32> to vector<8x32xf32>
    %105 = arith.addf %103, %104 : vector<8x32xf32>
    %106 = arith.addf %73, %105 : vector<8x32xf32>
    %107 = arith.truncf %106 : vector<8x32xf32> to vector<8x32xbf16>
    %c0_51 = arith.constant 0 : index
    %c0_52 = arith.constant 0 : index
    %c0_53 = arith.constant 0 : index
    %108 = vector.load %arg16[%c0_51, %c0_52, %c0_53] : memref<1x8x32xbf16, #tpu.memory_space<vmem>>, vector<1x8x32xbf16>
    %109 = vector.shape_cast %108 : vector<1x8x32xbf16> to vector<8x32xbf16>
    %110 = vector.shape_cast %107 : vector<8x32xbf16> to vector<1x8x32xbf16>
    tpu.vector_store %arg16[%c0_51, %c0_52, %c0_53], %110 {strides = array<i32>} : memref<1x8x32xbf16, #tpu.memory_space<vmem>>, vector<1x8x32xbf16>,
    return
  }
  func.func @transform_0(%arg0: i32) -> (i32, i32, i32) {
    %c0_i32 = arith.constant 0 : i32
    %c0_i32_0 = arith.constant 0 : i32
    %c0_i32_1 = arith.constant 0 : i32
    return %arg0, %c0_i32, %c0_i32_0 : i32, i32, i32
  }
  func.func @transform_1(%arg0: i32) -> (i32, i32, i32) {
    %c0_i32 = arith.constant 0 : i32
    %c0_i32_0 = arith.constant 0 : i32
    %c0_i32_1 = arith.constant 0 : i32
    return %arg0, %c0_i32, %c0_i32_0 : i32, i32, i32
  }
  func.func @transform_2(%arg0: i32) -> (i32, i32, i32) {
    %c0_i32 = arith.constant 0 : i32
    %c0_i32_0 = arith.constant 0 : i32
    %c0_i32_1 = arith.constant 0 : i32
    return %arg0, %c0_i32, %c0_i32_0 : i32, i32, i32
  }
  func.func @transform_3(%arg0: i32) -> (i32, i32) {
    %c0_i32 = arith.constant 0 : i32
    %c0_i32_0 = arith.constant 0 : i32
    %c0_i32_1 = arith.constant 0 : i32
    return %c0_i32, %c0_i32_0 : i32, i32
  }
  func.func @transform_4(%arg0: i32) -> (i32, i32) {
    %c0_i32 = arith.constant 0 : i32
    %c0_i32_0 = arith.constant 0 : i32
    %c0_i32_1 = arith.constant 0 : i32
    return %c0_i32, %c0_i32_0 : i32, i32
  }
  func.func @transform_5(%arg0: i32) -> (i32, i32) {
    %c0_i32 = arith.constant 0 : i32
    %c0_i32_0 = arith.constant 0 : i32
    %c0_i32_1 = arith.constant 0 : i32
    return %c0_i32, %c0_i32_0 : i32, i32
  }
  func.func @transform_6(%arg0: i32) -> (i32, i32) {
    %c0_i32 = arith.constant 0 : i32
    %c0_i32_0 = arith.constant 0 : i32
    %c0_i32_1 = arith.constant 0 : i32
    return %c0_i32, %c0_i32_0 : i32, i32
  }
  func.func @transform_7(%arg0: i32) -> (i32, i32) {
    %c0_i32 = arith.constant 0 : i32
    %c0_i32_0 = arith.constant 0 : i32
    %c0_i32_1 = arith.constant 0 : i32
    return %c0_i32, %c0_i32_0 : i32, i32
  }
  func.func @transform_8(%arg0: i32) -> (i32, i32) {
    %c0_i32 = arith.constant 0 : i32
    %c0_i32_0 = arith.constant 0 : i32
    %c0_i32_1 = arith.constant 0 : i32
    return %c0_i32, %c0_i32_0 : i32, i32
  }
  func.func @transform_9(%arg0: i32) -> (i32, i32) {
    %c0_i32 = arith.constant 0 : i32
    %c0_i32_0 = arith.constant 0 : i32
    %c0_i32_1 = arith.constant 0 : i32
    return %c0_i32, %c0_i32_0 : i32, i32
  }
  func.func @transform_10(%arg0: i32) -> (i32, i32) {
    %c0_i32 = arith.constant 0 : i32
    %c0_i32_0 = arith.constant 0 : i32
    %c0_i32_1 = arith.constant 0 : i32
    return %c0_i32, %c0_i32_0 : i32, i32
  }
  func.func @transform_11(%arg0: i32) -> (i32, i32) {
    %c0_i32 = arith.constant 0 : i32
    %c0_i32_0 = arith.constant 0 : i32
    %c0_i32_1 = arith.constant 0 : i32
    return %c0_i32, %c0_i32_0 : i32, i32
  }
  func.func @transform_12(%arg0: i32) -> (i32, i32) {
    %c0_i32 = arith.constant 0 : i32
    %c0_i32_0 = arith.constant 0 : i32
    %c0_i32_1 = arith.constant 0 : i32
    return %c0_i32, %c0_i32_0 : i32, i32
  }
  func.func @transform_13(%arg0: i32) -> (i32, i32) {
    %c0_i32 = arith.constant 0 : i32
    %c0_i32_0 = arith.constant 0 : i32
    %c0_i32_1 = arith.constant 0 : i32
    return %c0_i32, %c0_i32_0 : i32, i32
  }
  func.func @transform_14(%arg0: i32) -> (i32, i32) {
    %c0_i32 = arith.constant 0 : i32
    %c0_i32_0 = arith.constant 0 : i32
    %c0_i32_1 = arith.constant 0 : i32
    return %c0_i32, %c0_i32_0 : i32, i32
  }
  func.func @transform_15(%arg0: i32) -> (i32, i32, i32) {
    %c0_i32 = arith.constant 0 : i32
    %c0_i32_0 = arith.constant 0 : i32
    %c0_i32_1 = arith.constant 0 : i32
    return %arg0, %c0_i32, %c0_i32_0 : i32, i32, i32
  }
}

</mosaic_0001>

<bundles_post_ra>
// kernel: kgmodel_v1_forward.6
= control target key start
LH: loop header
LB: loop body
LE: loop exit
PB: predicated region body
PF: predicated region fallthrough
CT: control target
= control target key end

     0   :  { %vm45_vm0 = vcmask 392192   ;;  %vm63_vm1 = vcmask 254976   ;;  %s124_s1 = inlined_call_operand.vmem [shape: bf16[48,32], index: 1, kind: input, shape index: {}]   ;;  %s125_s2 = inlined_call_operand.vmem [shape: f32[1,32], index: 2, kind: input, shape index: {}]   ;;  %s126_s0 = inlined_call_operand.vmem [shape: f32[4,48], index: 0, kind: input, shape index: {}]   ;;  %s127_s3 = inlined_call_operand.vmem [shape: bf16[4,32], index: 3, kind: output, shape index: {}]  }
   0x1   :  { %v84_v0 = vld [vmem:[%s124_s1 + $0x10] sm:$0xff]  ;;  %v83_v1 = vld [vmem:[%s124_s1 + $0x8] sm:$0xff]  ;;  %v82_v2 = vld [vmem:[%s124_s1] sm:$0xff] }
   0x2   :  { %54 = vmatpush.bf16.msra.mxu0 %v84_v0  ;;  %v15_v3 = vld [vmem:[%s126_s0] sm:$0xf] }
   0x3   :  { %v16_v4 = vpack.c.bf16 %v15_v3, %v15_v3  ;;  %v85_v5 = vld [vmem:[%s125_s2] ss:$0 sm:$0xff] }
   0x6   :  { %55 = vmatpush.bf16.msra.mxu0 %v83_v1 }
   0xa   :  { %56 = vmatpush.bf16.msra.mxu0 %v82_v2 }
   0xd   :  { %81 = vmatmul.msk.bf16.vlgmr.msra.gmra.mxu0 %vm45_vm0, %v16_v4 }
  0x8a   :  { %v58_v6 = vpop.f32.mrf.mxu0 }
  0x8b   :  { %v59_v7 = vadd.f32 %v85_v5, %v58_v6 }
  0x8d   :  { %v62_v8 = vpack.c.bf16 %v59_v7, %v59_v7 }
  0x8f   :  { %64 = vst.msk [vmem:[%s127_s3] sm:$0x3] %vm63_vm1, %v62_v8 }
  0x92   :  { %v60_v9 = vpop.f32.mrf.mxu0 }

// kernel: kgmodel_v1_forward.8
= control target key start
LH: loop header
LB: loop body
LE: loop exit
PB: predicated region body
PF: predicated region fallthrough
CT: control target
= control target key end

     0   :  { %s996_s0 = inlined_call_operand.hbm [shape: f32[16,400], index: 0, kind: input, shape index: {}]   ;;  %s997_s1 = inlined_call_operand.hbm [shape: f32[16,400], index: 1, kind: input, shape index: {}]   ;;  %s998_s2 = inlined_call_operand.hbm [shape: bf16[400,32], index: 2, kind: input, shape index: {}]   ;;  %s999_s3 = inlined_call_operand.vmem [shape: f32[1,32], index: 3, kind: input, shape index: {}]   ;;  %s1000_s4 = inlined_call_operand.vmem [shape: bf16[1,400], index: 4, kind: input, shape index: {}]   ;;  %s1001_s5 = inlined_call_operand.<no memory space> [shape: f32[1,1], index: 5, kind: input, shape index: {}]   ;;  %s1002_s6 = inlined_call_operand.hbm [shape: bf16[32,32], index: 6, kind: input, shape index: {}]   ;;  %s1003_s7 = inlined_call_operand.vmem [shape: f32[1,32], index: 7, kind: input, shape index: {}]   ;;  %s1004_s8 = inlined_call_operand.hbm [shape: bf16[32,32], index: 8, kind: input, shape index: {}]   ;;  %s1005_s9 = inlined_call_operand.vmem [shape: f32[1,32], index: 9, kind: input, shape index: {}]   ;;  %s1006_s10 = inlined_call_operand.vmem [shape: bf16[16,32], index: 10, kind: output, shape index: {0}]   ;;  %s1007_s11 = inlined_call_operand.vmem [shape: bf16[16,32], index: 11, kind: output, shape index: {1}]   ;;  %s1008_s12 = inlined_call_operand.vmem [shape: f32[1,16], index: 12, kind: output, shape index: {2}]  }
   0x1   :  { %v18_v0 = vstv %s1001_s5 }
   0x2   :  { %19 = vst [vmem:[#allocation2] sm:$0x1] %v18_v0 }
   0x3   :  { %20 = vsyncpa [#allocation4], 0 }
   0x4   :  { %21 = vsyncpa [#allocation6], 0 }
   0x5   :  { %22 = vsyncpa [#allocation9], 0  ;;  %s40_s25 = sshll.u32 %s997_s1, 4  ;;  %s869_s26 = smov [#allocation5]   ;;  %s41_s25 = int_to_ptr.hbm [resolvable:$true] %s40_s25 }
   0x6   :  { %s42_s27 = sshll.u32 %s869_s26, 4  ;;  %s870_s28 = smov 512   ;;  %s43_s27 = int_to_ptr.vmem [resolvable:$true] %s42_s27 }
   0x7   :  { %s871_s29 = smov 32   ;;  %s72_s14 = sshll.u32 %s1002_s6, 4  ;;  %s73_s14 = int_to_ptr.hbm [resolvable:$true] %s72_s14 }
   0x8   :  { %48 = dma.hbm_to_vmem [thread:$0]  %s41_s25, 1024, %s43_s27, [#allocation6], %s870_s28, %s870_s28, %s871_s29  }
   0x9   :  { %s872_s5 = smov [#allocation8]   ;;  %s27_s18 = sshll.u32 %s996_s0, 4  ;;  %s28_s18 = int_to_ptr.hbm [resolvable:$true] %s27_s18 }
   0xa   :  { %s74_s15 = sshll.u32 %s872_s5, 4  ;;  %s873_s1 = smov 64   ;;  %s75_s15 = int_to_ptr.vmem [resolvable:$true] %s74_s15 }
   0xb   :  { %s874_s19 = smov 4   ;;  %s53_s22 = sshll.u32 %s998_s2, 4  ;;  %s54_s22 = int_to_ptr.hbm [resolvable:$true] %s53_s22 }
   0xc   :  { %80 = dma.hbm_to_vmem [thread:$0]  %s73_s14, 256, %s75_s15, [#allocation9], %s873_s1, %s873_s1, %s874_s19  }
   0xd   :  { %s875_s23 = smov [#allocation3]   ;;  %s876_s6 = smov [#allocation7]  }
   0xe   :  { %s29_s24 = sshll.u32 %s875_s23, 4  ;;  %s55_s25 = sshll.u32 %s876_s6, 4  ;;  %s30_s24 = int_to_ptr.vmem [resolvable:$true] %s29_s24  ;;  %s56_s25 = int_to_ptr.vmem [resolvable:$true] %s55_s25 }
   0xf   :  { %35 = dma.hbm_to_vmem [thread:$0]  %s28_s18, 1024, %s30_s24, [#allocation4], %s870_s28, %s870_s28, %s871_s29  }
  0x10   :  { %s87_s0 = sshll.u32 %s1004_s8, 4  ;;  %s877_s30 = smov [#allocation10]   ;;  %s88_s0 = int_to_ptr.hbm [resolvable:$true] %s87_s0 }
  0x11   :  { %61 = dma.hbm_to_vmem [thread:$0]  %s54_s22, 3200, %s56_s25, [#allocation6], %s873_s1, %s873_s1, %s874_s19  }
  0x12   :  { %s89_s13 = sshll.u32 %s877_s30, 4  ;;  %s90_s13 = int_to_ptr.vmem [resolvable:$true] %s89_s13 }
  0x13   :  { %95 = dma.hbm_to_vmem [thread:$0]  %s88_s0, 256, %s90_s13, [#allocation9], %s873_s1, %s873_s1, %s874_s19  }
  0x14   :  { %863 = dma.done.wait [#allocation4], 1024  }
  0x15   :  { %864 = vsyncadd [#allocation4], 4294966272 }
  0x16   :  { %865 = dma.done.wait [#allocation6], 4224  }
  0x17   :  { %866 = vsyncadd [#allocation6], 4294963072 }
  0x18   :  { %867 = dma.done.wait [#allocation9], 512  }
  0x19   :  { %868 = vsyncadd [#allocation9], 4294966784  ;;  %v707_v1 = vld [vmem:[#allocation7 + $0x38] sm:$0xff]  ;;  %v706_v4 = vld [vmem:[#allocation7 + $0x30] sm:$0xff]  ;;  %vm335_vm0 = vcmask 130048   ;;  %vm416_vm1 = vcmask 261120  }
  0x1a   :  { %v715_v2 = vld [vmem:[#allocation7 + $0x78] sm:$0xff]  ;;  %339 = vmatpush.bf16.msra.mxu0 %v707_v1  ;;  %v714_v5 = vld [vmem:[#allocation7 + $0x70] sm:$0xff]  ;;  %v705_v7 = vld [vmem:[#allocation7 + $0x28] sm:$0xff]  ;;  %vm436_vm2 = vcmask 257024   ;;  %vm563_vm3 = vcmask 122880  }
  0x1b   :  { %v723_v3 = vld [vmem:[#allocation7 + $0xb8] sm:$0xff]  ;;  %353 = vmatpush.bf16.msra.mxu1 %v715_v2  ;;  %v722_v6 = vld [vmem:[#allocation7 + $0xb0] sm:$0xff]  ;;  %v713_v8 = vld [vmem:[#allocation7 + $0x68] sm:$0xff] }
  0x1c   :  { %367 = vmatpush.bf16.msra.mxu2 %v723_v3  ;;  %v724_v9 = vld [vmem:[#allocation7 + $0xc0] sm:$0xff]  ;;  %v721_v10 = vld [vmem:[#allocation7 + $0xa8] sm:$0xff]  ;;  %v122_v11 = vld [vmem:[#allocation3 + $0x18] sm:$0xff] }
  0x1d   :  { %v126_v12 = vld [vmem:[#allocation3 + $0x38] sm:$0xff]  ;;  %388 = vmatpush.bf16.msra.mxu3 %v724_v9  ;;  %v704_v14 = vld [vmem:[#allocation7 + $0x20] sm:$0xff]  ;;  %v702_v20 = vld [vmem:[#allocation7 + $0x10] sm:$0xff] }
  0x1e   :  { %340 = vmatpush.bf16.msra.mxu0 %v706_v4  ;;  %v130_v13 = vpack.c.bf16 %v126_v12, %v122_v11  ;;  %v712_v15 = vld [vmem:[#allocation7 + $0x60] sm:$0xff]  ;;  %v703_v17 = vld [vmem:[#allocation7 + $0x18] sm:$0xff]  ;;  %v710_v21 = vld [vmem:[#allocation7 + $0x50] sm:$0xff] }
  0x1f   :  { %354 = vmatpush.bf16.msra.mxu1 %v714_v5  ;;  %v720_v16 = vld [vmem:[#allocation7 + $0xa0] sm:$0xff]  ;;  %v711_v18 = vld [vmem:[#allocation7 + $0x58] sm:$0xff]  ;;  %v718_v22 = vld [vmem:[#allocation7 + $0x90] sm:$0xff] }
  0x20   :  { %368 = vmatpush.bf16.msra.mxu2 %v722_v6  ;;  %680 = vmatmul.msk.bf16.vlgmr.msra.gmra.mxu3 %vm335_vm0, %v130_v13  ;;  %v719_v19 = vld [vmem:[#allocation7 + $0x98] sm:$0xff]  ;;  %v701_v23 = vld [vmem:[#allocation7 + $0x8] sm:$0xff]  ;;  %v700_v26 = vld [vmem:[#allocation7] sm:$0xff] }
  0x21   :  { %v709_v24 = vld [vmem:[#allocation7 + $0x48] sm:$0xff]  ;;  %v708_v27 = vld [vmem:[#allocation7 + $0x40] sm:$0xff]  ;;  %v121_v33 = vld [vmem:[#allocation3 + $0x10] sm:$0xff] }
  0x22   :  { %341 = vmatpush.bf16.msra.mxu0 %v705_v7  ;;  %v717_v25 = vld [vmem:[#allocation7 + $0x88] sm:$0xff]  ;;  %v119_v28 = vld [vmem:[#allocation3] sm:$0xff]  ;;  %v125_v34 = vld [vmem:[#allocation3 + $0x30] sm:$0xff] }
  0x23   :  { %355 = vmatpush.bf16.msra.mxu1 %v713_v8  ;;  %v123_v29 = vld [vmem:[#allocation3 + $0x20] sm:$0xff]  ;;  %v120_v30 = vld [vmem:[#allocation3 + $0x8] sm:$0xff]  ;;  %v129_v37 = vpack.c.bf16 %v125_v34, %v121_v33  ;;  %v726_v38 = vld [vmem:[#allocation8 + $0x8] sm:$0xff] }
  0x24   :  { %369 = vmatpush.bf16.msra.mxu2 %v721_v10  ;;  %v124_v31 = vld [vmem:[#allocation3 + $0x28] sm:$0xff]  ;;  %v716_v32 = vld [vmem:[#allocation7 + $0x80] sm:$0xff]  ;;  %v127_v35 = vpack.c.bf16 %v123_v29, %v119_v28  ;;  %426 = vmatpush.bf16.msrb.mxu3 %v726_v38  ;;  %v727_v41 = vld [vmem:[#allocation10] sm:$0xff] }
  0x25   :  { %v128_v36 = vpack.c.bf16 %v124_v31, %v120_v30  ;;  %v725_v39 = vld [vmem:[#allocation8] sm:$0xff]  ;;  %v728_v40 = vld [vmem:[#allocation10 + $0x8] sm:$0xff]  ;;  %v740_v43 = vld [vmem:[%s999_s3] ss:$0 sm:$0xff] }
  0x26   :  { %342 = vmatpush.bf16.msra.mxu0 %v704_v14  ;;  %v480_v45 = vld [vmem:[#allocation5 + $0x10] sm:$0xff]  ;;  %v478_v50 = vld [vmem:[#allocation5] sm:$0xff]  ;;  %v479_v54 = vld [vmem:[#allocation5 + $0x8] sm:$0xff]  ;;  %v878_v14 = vmov 0  }
  0x27   :  { %356 = vmatpush.bf16.msra.mxu1 %v712_v15  ;;  %v484_v46 = vld [vmem:[#allocation5 + $0x30] sm:$0xff]  ;;  %v482_v53 = vld [vmem:[#allocation5 + $0x20] sm:$0xff]  ;;  %v483_v55 = vld [vmem:[#allocation5 + $0x28] sm:$0xff]  ;;  %739 = vset.pattern.permute.xlu0 %v878_v14 }
  0x28   :  { %370 = vmatpush.bf16.msra.mxu2 %v720_v16  ;;  %427 = vmatpush.bf16.msrb.mxu3 %v725_v39  ;;  %v488_v47 = vpack.c.bf16 %v484_v46, %v480_v45  ;;  %v477_v48 = vld [vmem:[%s1000_s4] sm:$0xf]  ;;  %v486_v57 = vpack.c.bf16 %v482_v53, %v478_v50  ;;  %v487_v58 = vpack.c.bf16 %v483_v55, %v479_v54  ;;  %v490_v13 = vld [vmem:[#allocation2] sm:$0x1] }
  0x29   :  { %498 = vst [vmem:[#allocation1] ss:$9 sm:$0xff] %v477_v48  ;;  %v481_v62 = vld [vmem:[#allocation5 + $0x18] sm:$0xff]  ;;  %493 = vperm.xlu0 %739, %v490_v13   ;;  %v742_v29 = vld [vmem:[%s1005_s9] ss:$0 sm:$0xff] }
  0x2a   :  { %343 = vmatpush.bf16.msra.mxu0 %v703_v17  ;;  %v485_v63 = vld [vmem:[#allocation5 + $0x38] sm:$0xff] }
  0x2b   :  { %357 = vmatpush.bf16.msra.mxu1 %v711_v18  ;;  %v489_v7 = vpack.c.bf16 %v485_v63, %v481_v62 }
  0x2c   :  { %371 = vmatpush.bf16.msra.mxu2 %v719_v19  ;;  %465 = vmatpush.bf16.msra.mxu3 %v728_v40  ;;  %v741_v19 = vld [vmem:[%s1003_s7] ss:$0 sm:$0xff] }
  0x2d   :  { %v509_v12 = vsel %vm335_vm0, %v489_v7, 0 }
  0x2e   :  { %344 = vmatpush.bf16.msra.mxu0 %v702_v20 }
  0x2f   :  { %358 = vmatpush.bf16.msra.mxu1 %v710_v21 }
  0x30   :  { %372 = vmatpush.bf16.msra.mxu2 %v718_v22  ;;  %466 = vmatpush.bf16.msra.mxu3 %v727_v41  ;;  %v501_v0 = vld [vmem:[#allocation1 + $0x12] sm:$0xff]  ;;  %v499_v3 = vld [vmem:[#allocation1] sm:$0xff]  ;;  %v500_v4 = vld [vmem:[#allocation1 + $0x9] sm:$0xff] }
  0x31   :  { %v502_v15 = vld [vmem:[#allocation1 + $0x1b] sm:$0xff] }
  0x32   :  { %345 = vmatpush.bf16.msra.mxu0 %v701_v23 }
  0x33   :  { %359 = vmatpush.bf16.msra.mxu1 %v709_v24 }
  0x34   :  { %373 = vmatpush.bf16.msra.mxu2 %v717_v25 }
  0x36   :  { %346 = vmatpush.bf16.msra.mxu0 %v700_v26 }
  0x37   :  { %360 = vmatpush.bf16.msra.mxu1 %v708_v27 }
  0x38   :  { %374 = vmatpush.bf16.msra.mxu2 %v716_v32 }
  0x39   :  { %347 = vmatmul.bf16.vlgmr.msra.gmra.mxu0 %v127_v35 }
  0x3a   :  { %361 = vmatmul.bf16.vlgmr.msra.gmra.mxu1 %v128_v36  ;;  %518 = vmatpush.bf16.xpose.msrb.mxu0 %v486_v57 }
  0x3b   :  { %375 = vmatmul.bf16.vlgmr.msra.gmra.mxu2 %v129_v37  ;;  %531 = vmatpush.bf16.xpose.msrb.mxu1 %v487_v58 }
  0x3c   :  { %544 = vmatpush.bf16.xpose.msrb.mxu2 %v488_v47 }
  0x49   :  { %519 = vmatmul.bf16.vlgmr.msrb.gmra.mxu0 %v499_v3 }
  0x4a   :  { %532 = vmatmul.bf16.vlgmr.msrb.gmra.mxu1 %v500_v4 }
  0x4b   :  { %545 = vmatmul.bf16.vlgmr.msrb.gmra.mxu2 %v501_v0 }
  0x9b   :  { %v494_v30 = vpop.permute.xlu0 %493 }
  0x9c   :  { %v496_v33 = vperm.slane %v494_v30, 0 }
  0xa3   :  { %v390_v51 = vpop.f32.mrf.mxu3 }
  0xab   :  { %v392_v8 = vpop.f32.mrf.mxu3 }
  0xb6   :  { %v348_v42 = vpop.f32.mrf.mxu0 }
  0xb7   :  { %v362_v44 = vpop.f32.mrf.mxu1  ;;  %v349_v49 = vadd.f32 %v740_v43, %v348_v42 }
  0xb9   :  { %v363_v59 = vadd.f32 %v362_v44, %v349_v49 }
  0xbe   :  { %v376_v52 = vpop.f32.mrf.mxu2  ;;  %v350_v56 = vpop.f32.mrf.mxu0 }
  0xbf   :  { %v351_v60 = vadd.f32 %v740_v43, %v350_v56  ;;  %v364_v61 = vpop.f32.mrf.mxu1  ;;  %v377_v1 = vadd.f32 %v376_v52, %v363_v59 }
  0xc1   :  { %v365_v2 = vadd.f32 %v364_v61, %v351_v60  ;;  %v391_v9 = vadd.f32 %v390_v51, %v377_v1 }
  0xc6   :  { %v378_v5 = vpop.f32.mrf.mxu2  ;;  %v520_v16 = vpop.f32.mrf.mxu0 }
  0xc7   :  { %v379_v6 = vadd.f32 %v378_v5, %v365_v2  ;;  %v533_v17 = vpop.f32.mrf.mxu1  ;;  %v521_v35 = vadd.f32 %v520_v16, %v496_v33 }
  0xc9   :  { %v393_v10 = vadd.f32 %v392_v8, %v379_v6  ;;  %v534_v38 = vadd.f32 %v533_v17, %v521_v35 }
  0xcb   :  { %v395_v11 = vpack.c.bf16 %v393_v10, %v391_v9 }
  0xcd   :  { %689 = vmatmul.msk.bf16.vlgmr.msrb.gmra.mxu3 %vm416_vm1, %v395_v11 }
  0xce   :  { %557 = vmatpush.bf16.xpose.msrb.mxu3 %v509_v12  ;;  %v546_v18 = vpop.f32.mrf.mxu2  ;;  %v522_v20 = vpop.f32.mrf.mxu0 }
  0xcf   :  { %v535_v22 = vpop.f32.mrf.mxu1  ;;  %v547_v40 = vadd.f32 %v546_v18, %v534_v38 }
  0xd6   :  { %v548_v24 = vpop.f32.mrf.mxu2 }
  0xdd   :  { %698 = vmatmul.msk.bf16.vlgmr.msra.gmra.mxu3 %vm416_vm1, %v395_v11 }
  0xed   :  { %699 = vmatmul.msk.bf16.vlgmr.msrb.gmra.mxu3 %vm335_vm0, %v502_v15 }
 0x150   :  { %v429_v21 = vpop.f32.mrf.mxu3 }
 0x151   :  { %v430_v23 = vadd.f32 %v741_v19, %v429_v21 }
 0x153   :  { %v434_v25 = vpack.c.bf16 %v430_v23, %v430_v23 }
 0x155   :  { %437 = vst.msk [vmem:[%s1006_s10] sm:$0xf] %vm436_vm2, %v434_v25 }
 0x158   :  { %v431_v26 = vpop.f32.mrf.mxu3 }
 0x159   :  { %v432_v27 = vadd.f32 %v741_v19, %v431_v26 }
 0x15b   :  { %v435_v28 = vpack.c.bf16 %v432_v27, %v432_v27 }
 0x15d   :  { %438 = vst.msk [vmem:[%s1006_s10 + $0x4] sm:$0xf] %vm436_vm2, %v435_v28 }
 0x160   :  { %v468_v31 = vpop.f32.mrf.mxu3 }
 0x161   :  { %v469_v32 = vadd.f32 %v742_v29, %v468_v31 }
 0x163   :  { %v473_v34 = vpack.c.bf16 %v469_v32, %v469_v32 }
 0x165   :  { %475 = vst.msk [vmem:[%s1007_s11] sm:$0xf] %vm436_vm2, %v473_v34 }
 0x168   :  { %v470_v36 = vpop.f32.mrf.mxu3 }
 0x169   :  { %v471_v37 = vadd.f32 %v742_v29, %v470_v36 }
 0x16b   :  { %v474_v39 = vpack.c.bf16 %v471_v37, %v471_v37 }
 0x16d   :  { %476 = vst.msk [vmem:[%s1007_s11 + $0x4] sm:$0xf] %vm436_vm2, %v474_v39 }
 0x170   :  { %v559_v41 = vpop.f32.mrf.mxu3 }
 0x171   :  { %v560_v42 = vadd.f32 %v559_v41, %v547_v40 }
 0x173   :  { %564 = vst.msk [vmem:[%s1008_s12] sm:$0x1] %vm563_vm3, %v560_v42 }
 0x178   :  { %v561_v43 = vpop.f32.mrf.mxu3 }
 0x179   :  { %577 = vsyncpa [#allocation4], 1 }
 0x17a   :  { %578 = vsyncpa [#allocation6], 1 }
 0x17b   :  { %579 = vsyncpa [#allocation9], 1 }

// kernel: kgmodel_v1_forward.9
= control target key start
LH: loop header
LB: loop body
LE: loop exit
PB: predicated region body
PF: predicated region fallthrough
CT: control target
= control target key end

     0   :  { %s1857_s0 = inlined_call_operand.vmem [shape: bf16[4,32], index: 0, kind: input, shape index: {}]   ;;  %s1858_s1 = inlined_call_operand.vmem [shape: bf16[16,32], index: 1, kind: input, shape index: {}]   ;;  %s1859_s2 = inlined_call_operand.vmem [shape: bf16[16,32], index: 2, kind: input, shape index: {}]   ;;  %s1860_s3 = inlined_call_operand.vmem [shape: f32[1,16], index: 3, kind: input, shape index: {}]   ;;  %s1861_s4 = inlined_call_operand.hbm [shape: bf16[32,32], index: 4, kind: input, shape index: {}]   ;;  %s1862_s5 = inlined_call_operand.vmem [shape: f32[1,32], index: 5, kind: input, shape index: {}]   ;;  %s1863_s6 = inlined_call_operand.hbm [shape: bf16[32,32], index: 6, kind: input, shape index: {}]   ;;  %s1864_s7 = inlined_call_operand.vmem [shape: f32[1,32], index: 7, kind: input, shape index: {}]   ;;  %s1865_s8 = inlined_call_operand.hbm [shape: bf16[32,64], index: 8, kind: input, shape index: {}]   ;;  %s1866_s9 = inlined_call_operand.vmem [shape: f32[1,64], index: 9, kind: input, shape index: {}]   ;;  %s1867_s10 = inlined_call_operand.hbm [shape: bf16[64,32], index: 10, kind: input, shape index: {}]   ;;  %s1868_s11 = inlined_call_operand.vmem [shape: f32[1,32], index: 11, kind: input, shape index: {}]   ;;  %s1869_s12 = inlined_call_operand.vmem [shape: f32[1,32], index: 12, kind: input, shape index: {}, may-alias: {12,14}]   ;;  %s1870_s13 = inlined_call_operand.vmem [shape: f32[1,32], index: 13, kind: input, shape index: {}, may-alias: {13,15}]   ;;  %s1871_s14 = inlined_call_operand.vmem [shape: f32[1,32], index: 14, kind: input, shape index: {}, may-alias: {12,14}]   ;;  %s1872_s15 = inlined_call_operand.vmem [shape: f32[1,32], index: 15, kind: input, shape index: {}, may-alias: {13,15}]   ;;  %s1873_s16 = inlined_call_operand.vmem [shape: bf16[4,32], index: 16, kind: output, shape index: {}]  }
   0x1   :  { %1874 = sst [smem:[#allocation12_spill]] %s1857_s0 }
   0x2   :  { %21 = vsyncpa [#allocation3], 0 }
   0x3   :  { %22 = vsyncpa [#allocation5], 0 }
   0x4   :  { %23 = vsyncpa [#allocation8], 0  ;;  %s51_s23 = sshll.u32 %s1863_s6, 4  ;;  %s1441_s24 = smov [#allocation4]   ;;  %s52_s23 = int_to_ptr.hbm [resolvable:$true] %s51_s23 }
   0x5   :  { %s53_s25 = sshll.u32 %s1441_s24, 4  ;;  %s36_s28 = sshll.u32 %s1861_s4, 4  ;;  %s54_s25 = int_to_ptr.vmem [resolvable:$true] %s53_s25  ;;  %s37_s28 = int_to_ptr.hbm [resolvable:$true] %s36_s28 }
   0x6   :  { %s1442_s29 = smov 64   ;;  %s1443_s30 = smov 4  }
   0x7   :  { %59 = dma.hbm_to_vmem [thread:$0]  %s52_s23, 256, %s54_s25, [#allocation5], %s1442_s29, %s1442_s29, %s1443_s30  }
   0x8   :  { %s1444_s0 = smov [#allocation2]   ;;  %s66_s20 = sshll.u32 %s1865_s8, 4  ;;  %s67_s20 = int_to_ptr.hbm [resolvable:$true] %s66_s20 }
   0x9   :  { %s38_s17 = sshll.u32 %s1444_s0, 4  ;;  %s81_s22 = sshll.u32 %s1867_s10, 4  ;;  %s39_s17 = int_to_ptr.vmem [resolvable:$true] %s38_s17  ;;  %s82_s22 = int_to_ptr.hbm [resolvable:$true] %s81_s22 }
   0xa   :  { %44 = dma.hbm_to_vmem [thread:$0]  %s37_s28, 256, %s39_s17, [#allocation3], %s1442_s29, %s1442_s29, %s1443_s30  }
   0xb   :  { %s1445_s24 = smov [#allocation6]   ;;  %s1446_s4 = smov [#allocation7]  }
   0xc   :  { %s68_s26 = sshll.u32 %s1445_s24, 4  ;;  %s83_s23 = sshll.u32 %s1446_s4, 4  ;;  %s69_s26 = int_to_ptr.vmem [resolvable:$true] %s68_s26  ;;  %s84_s23 = int_to_ptr.vmem [resolvable:$true] %s83_s23 }
   0xd   :  { %74 = dma.hbm_to_vmem [thread:$0]  %s67_s20, 256, %s69_s26, [#allocation5], %s1442_s29, %s1442_s29, %s1443_s30  }
   0xe   :  { %89 = dma.hbm_to_vmem [thread:$0]  %s82_s22, 512, %s84_s23, [#allocation8], %s1442_s29, %s1442_s29, %s1443_s30  }
   0xf   :  { %1435 = dma.done.wait [#allocation3], 256  }
  0x10   :  { %1436 = vsyncadd [#allocation3], 4294967040 }
  0x11   :  { %1437 = dma.done.wait [#allocation5], 512  }
  0x12   :  { %1438 = vsyncadd [#allocation5], 4294966784 }
  0x13   :  { %1439 = dma.done.wait [#allocation8], 512  }
  0x14   :  { %1440 = vsyncadd [#allocation8], 4294966784  ;;  %vm152_vm0 = vcmask 257024   ;;  %s1875_s27 = sld [smem:[#allocation12_spill]]  ;;  %v1447_v3 = vmov 32.0   ;;  %v1284_v15 = vld [vmem:[#allocation2 + $0x8] sm:$0xff] }
  0x15   :  { %1317 = vrcp.f32 %v1447_v3  ;;  %216 = vmatpush.bf16.msra.mxu0 %v1284_v15  ;;  %v1283_v16 = vld [vmem:[#allocation2] sm:$0xff]  ;;  %s1448_s29 = smov 120   ;;  %s1449_s30 = smov 104   ;;  %vm206_vm5 = vcmask 261120   ;;  %v1451_v42 = vmov 1983009808  }
  0x16   :  { %v119_v17 = vld [vmem:[%s1858_s1] sm:$0xf]  ;;  %s1450_s0 = smov 112   ;;  %v120_v21 = vld [vmem:[%s1858_s1 + $0x4] sm:$0xf]  ;;  %v237_v43 = vunpack.c.l.s4 %v1451_v42  ;;  %vm234_vm6 = vcmask 1047556  }
  0x17   :  { %295 = vrot.lane.b32.xlu1 %v119_v17, %s1448_s29  ;;  %299 = vrot.lane.b32.xlu2 %v119_v17, %s1450_s0  ;;  %v1308_v28 = vld [vmem:[%s1869_s12] ss:$0 sm:$0xff]  ;;  %v310_v44 = vshrl.u32 %v119_v17, 16  ;;  %v322_v46 = vshrl.u32 %v120_v21, 16  ;;  %vm781_vm7 = vcmask 64512   ;;  %vm878_vm8 = vcmask 125952  }
  0x18   :  { %v1309_v31 = vld [vmem:[%s1870_s13] ss:$0 sm:$0xff]  ;;  %v1596_v52 = vunpack.c.0.s8 %v237_v43  ;;  %vm931_vm9 = vcmask 130048   ;;  %s1454_s4 = smov 24   ;;  %s1455_s23 = smov 8   ;;  %vm1077_vm10 = vcmask 195584  }
  0x19   :  { %217 = vmatpush.bf16.msra.mxu0 %v1283_v16  ;;  %v1310_v35 = vld [vmem:[%s1862_s5] ss:$0 sm:$0xff]  ;;  %vm1203_vm14 = vcmask 523264   ;;  %vm1222_vm15 = vcmask 254976  }
  0x1a   :  { %v117_v0 = vld [vmem:[%s1875_s27] sm:$0x3] }
  0x1b   :  { %v1556_v1 = vunpack.c.l.bf16 %v117_v0  ;;  %v1318_v4 = vpop.eup %1317 }
  0x1c   :  { %v157_v5 = vmul.f32 32.0, %v1318_v4  ;;  %vm161_vm1 = vweird.f32 %v1318_v4 }
  0x1d   :  { %v153_v2 = vsel %vm152_vm0, %v1556_v1, 0.0 }
  0x1e   :  { %154 = vadd.xlane.f32.xlu0 %v153_v2  ;;  %v158_v6 = vsub.f32 1.0, %v157_v5  ;;  %v1452_v5 = vmov 1934713408  }
  0x1f   :  { %297 = vrot.lane.b32.xlu1 %v120_v21, %s1448_s29  ;;  %301 = vrot.lane.b32.xlu2 %v120_v21, %s1450_s0 }
  0x20   :  { %v159_v7 = vmul.f32 %v1318_v4, %v158_v6  ;;  %v251_v6 = vunpack.c.l.s4 %v1452_v5 }
  0x22   :  { %v160_v8 = vadd.f32 %v1318_v4, %v159_v7  ;;  %v1606_v16 = vunpack.c.0.s8 %v251_v6 }
  0x24   :  { %v1560_v9 = vsel %vm161_vm1, %v1318_v4, %v160_v8 }
  0x27   :  { %305 = vrot.lane.b32.xlu1 %v120_v21, %s1449_s30 }
  0x71   :  { %v300_v40 = vpop.permute.xlu2 %299 }
  0x72   :  { %v316_v54 = vshrl.u32 %v300_v40, 16 }
  0x79   :  { %v302_v49 = vpop.permute.xlu2 %301 }
  0x7a   :  { %v328_v58 = vshrl.u32 %v302_v49, 16 }
  0x89   :  { %v296_v38 = vpop.permute.xlu1 %295 }
  0x8a   :  { %v311_v45 = vshrl.u32 %v296_v38, 16  ;;  %v309_v51 = vpack.i.b16 %v296_v38, %v119_v17 }
  0x8c   :  { %v312_v53 = vpack.i.b16 %v311_v45, %v310_v44  ;;  %v335_v60 = vperm.slane %v309_v51, %v1596_v52 }
  0x8e   :  { %v362_v61 = vperm.slane %v312_v53, %v1596_v52  ;;  %v344_v7 = vrot.slane %v335_v60, 4 }
  0x90   :  { %v370_v8 = vrot.slane %v362_v61, 4 }
  0x91   :  { %v155_v10 = vpop.xlane.xlu0 %154  ;;  %v298_v41 = vpop.permute.xlu1 %297 }
  0x92   :  { %v163_v11 = vmul.f32 %v1560_v9, %v155_v10  ;;  %v323_v47 = vshrl.u32 %v298_v41, 16  ;;  %v321_v56 = vpack.i.b16 %v298_v41, %v120_v21 }
  0x94   :  { %v164_v12 = vsub.f32 %v1556_v1, %v163_v11  ;;  %v324_v57 = vpack.i.b16 %v323_v47, %v322_v46  ;;  %v388_v0 = vperm.slane %v321_v56, %v1596_v52 }
  0x96   :  { %v165_v13 = vmul.f32 %v164_v12, %v164_v12  ;;  %v414_v2 = vperm.slane %v324_v57, %v1596_v52 }
  0x98   :  { %v166_v14 = vsel %vm152_vm0, %v165_v13, 0.0  ;;  %v422_v13 = vrot.slane %v414_v2, 4 }
  0x99   :  { %167 = vadd.xlane.f32.xlu0 %v166_v14  ;;  %v306_v50 = vpop.permute.xlu1 %305 }
  0x9a   :  { %v329_v59 = vshrl.u32 %v306_v50, 16  ;;  %v327_v3 = vpack.i.b16 %v306_v50, %v302_v49 }
  0x9c   :  { %v330_v4 = vpack.i.b16 %v329_v59, %v328_v58  ;;  %v393_v14 = vperm.slane %v327_v3, %v1596_v52 }
  0x9e   :  { %v419_v15 = vperm.slane %v330_v4, %v1596_v52  ;;  %v394_v21 = vrot.slane %v393_v14, 4 }
  0xad   :  { %303 = vrot.lane.b32.xlu0 %v119_v17, %s1449_s30 }
 0x10c   :  { %v168_v18 = vpop.xlane.xlu0 %167 }
 0x10d   :  { %v169_v19 = vmul.f32 %v168_v18, %v1560_v9 }
 0x10f   :  { %v170_v20 = vadd.f32 1e-06, %v169_v19 }
 0x111   :  { %1319 = vrsqrt.f32 %v170_v20  ;;  %vm177_vm3 = vweird.f32 %v170_v20 }
 0x117   :  { %v1320_v22 = vpop.eup %1319 }
 0x118   :  { %v172_v23 = vmul.f32 %v1320_v22, %v170_v20  ;;  %vm178_vm2 = vweird.f32 %v1320_v22 }
 0x119   :  { %vm179_vm4 = vmor %vm177_vm3, %vm178_vm2 }
 0x11a   :  { %v173_v24 = vmul.f32 %v1320_v22, %v172_v23  ;;  %v420_v23 = vrot.slane %v419_v15, 4 }
 0x11c   :  { %v174_v25 = vmul.f32 0.5, %v173_v24  ;;  %v423_v24 = vsel %vm234_vm6, %v419_v15, %v422_v13 }
 0x11e   :  { %v175_v26 = vsub.f32 1.5, %v174_v25 }
 0x11f   :  { %v304_v48 = vpop.permute.xlu0 %303 }
 0x120   :  { %v176_v27 = vmul.f32 %v1320_v22, %v175_v26  ;;  %v317_v55 = vshrl.u32 %v304_v48, 16  ;;  %v315_v62 = vpack.i.b16 %v304_v48, %v300_v40 }
 0x122   :  { %v180_v29 = vsel %vm179_vm4, %v1320_v22, %v176_v27  ;;  %v318_v63 = vpack.i.b16 %v317_v55, %v316_v54  ;;  %v340_v10 = vperm.slane %v315_v62, %v1596_v52 }
 0x123   :  { %v181_v30 = vmul.f32 %v180_v29, %v164_v12  ;;  %v396_v12 = vrot.slane %v388_v0, 4 }
 0x124   :  { %v367_v11 = vperm.slane %v318_v63, %v1596_v52  ;;  %v341_v17 = vrot.slane %v340_v10, 4  ;;  %v345_v18 = vsel %vm234_vm6, %v340_v10, %v344_v7 }
 0x125   :  { %v185_v32 = vmul.f32 %v1308_v28, %v181_v30  ;;  %v397_v22 = vsel %vm234_vm6, %v393_v14, %v396_v12  ;;  %v353_v25 = vperm.slane %v345_v18, %v1606_v16  ;;  %v431_v28 = vperm.slane %v423_v24, %v1606_v16 }
 0x126   :  { %v368_v19 = vrot.slane %v367_v11, 4  ;;  %v371_v20 = vsel %vm234_vm6, %v367_v11, %v370_v8  ;;  %v405_v27 = vperm.slane %v397_v22, %v1606_v16  ;;  %v343_v29 = vsel %vm234_vm6, %v341_v17, %v335_v60 }
 0x127   :  { %v189_v33 = vadd.f32 %v1309_v31, %v185_v32  ;;  %v379_v26 = vperm.slane %v371_v20, %v1606_v16  ;;  %v395_v31 = vsel %vm234_vm6, %v394_v21, %v388_v0  ;;  %v421_v32 = vsel %vm234_vm6, %v420_v23, %v414_v2 }
 0x128   :  { %v369_v30 = vsel %vm234_vm6, %v368_v19, %v362_v61  ;;  %v401_v38 = vperm.slane %v395_v31, %v1606_v16  ;;  %v427_v40 = vperm.slane %v421_v32, %v1606_v16  ;;  %v434_v41 = vrot.slane %v431_v28, 4 }
 0x129   :  { %v190_v34 = vpack.c.bf16 %v189_v33, %v189_v33  ;;  %v349_v33 = vperm.slane %v343_v29, %v1606_v16 }
 0x12a   :  { %v406_v46 = vrot.slane %v401_v38, 4  ;;  %v432_v48 = vrot.slane %v427_v40, 4  ;;  %v435_v49 = vsel %vm234_vm6, 0, %v434_v41  ;;  %v493_v7 = vsel %vm234_vm6, %v434_v41, %v427_v40 }
 0x12b   :  { %1239 = vmatmul.msk.bf16.vlgmr.msra.gmra.mxu0 %vm206_vm5, %v190_v34  ;;  %v356_v34 = vrot.slane %v353_v25, 4  ;;  %v354_v42 = vrot.slane %v349_v33, 4  ;;  %v498_v51 = vrot.slane %v435_v49, 4  ;;  %v497_v15 = vperm.slane %v493_v7, %v1596_v52  ;;  %v1667_v7 = vld [vmem:[%s1859_s2 + $0x4] sm:$0xf] }
 0x12c   :  { %v407_v55 = vsel %vm234_vm6, 0, %v406_v46  ;;  %v433_v56 = vsel %vm234_vm6, 0, %v432_v48  ;;  %540 = vrot.lane.b32.xlu0 %v1667_v7, %s1448_s29 }
 0x12d   :  { %v357_v43 = vsel %vm234_vm6, 0, %v356_v34  ;;  %v355_v57 = vsel %vm234_vm6, 0, %v354_v42  ;;  %v436_v60 = vsel %vm234_vm6, %v356_v34, %v349_v33  ;;  %v499_v0 = vsel %vm234_vm6, %v498_v51, %v433_v56 }
 0x12e   :  { %v441_v53 = vrot.slane %v357_v43, 4  ;;  %v503_v5 = vperm.slane %v499_v0, %v1596_v52  ;;  %v440_v8 = vperm.slane %v436_v60, %v1596_v52 }
 0x130   :  { %v442_v61 = vsel %vm234_vm6, %v441_v53, %v355_v57  ;;  %v504_v17 = vrot.slane %v503_v5, 4 }
 0x131   :  { %v446_v2 = vperm.slane %v442_v61, %v1596_v52 }
 0x132   :  { %v505_v23 = vsel %vm234_vm6, %v504_v17, %v497_v15 }
 0x133   :  { %v447_v10 = vrot.slane %v446_v2, 4  ;;  %v509_v25 = vperm.slane %v505_v23, %v1606_v16 }
 0x135   :  { %v448_v18 = vsel %vm234_vm6, %v447_v10, %v440_v8  ;;  %v528_v32 = vshrl.u32 %v509_v25, 16  ;;  %v510_v41 = vrot.slane %v509_v25, 4  ;;  %v1672_v8 = vld [vmem:[%s1859_s2] sm:$0xf] }
 0x136   :  { %v452_v20 = vperm.slane %v448_v18, %v1606_v16 }
 0x137   :  { %v511_v48 = vsel %vm234_vm6, 0, %v510_v41 }
 0x138   :  { %v453_v29 = vrot.slane %v452_v20, 4  ;;  %v534_v56 = vshrl.u32 %v511_v48, 16 }
 0x1a8   :  { %v219_v36 = vpop.f32.mrf.mxu0 }
 0x1a9   :  { %v1588_v37 = vadd.f32 %v1310_v35, %v219_v36  ;;  %v375_v35 = vperm.slane %v369_v30, %v1606_v16  ;;  %v382_v36 = vrot.slane %v379_v26, 4 }
 0x1ab   :  { %230 = vrot.lane.b32.xlu1 %v1588_v37, %s1449_s30  ;;  %227 = vrot.lane.b32.xlu2 %v1588_v37, %s1450_s0  ;;  %v380_v44 = vrot.slane %v375_v35, 4  ;;  %v383_v45 = vsel %vm234_vm6, 0, %v382_v36  ;;  %v455_v6 = vsel %vm234_vm6, %v382_v36, %v375_v35  ;;  %v454_v35 = vsel %vm234_vm6, 0, %v453_v29 }
 0x1ac   :  { %v460_v54 = vrot.slane %v383_v45, 4  ;;  %v459_v11 = vperm.slane %v455_v6, %v1596_v52 }
 0x1ad   :  { %v381_v58 = vsel %vm234_vm6, 0, %v380_v44  ;;  %v521_v44 = vshrl.u32 %v454_v35, 16 }
 0x1ae   :  { %v461_v62 = vsel %vm234_vm6, %v460_v54, %v381_v58 }
 0x1af   :  { %v465_v3 = vperm.slane %v461_v62, %v1596_v52 }
 0x1b0   :  { %v221_v39 = vpop.f32.mrf.mxu0 }
 0x1b1   :  { %v408_v39 = vrot.slane %v405_v27, 4  ;;  %v466_v12 = vrot.slane %v465_v3, 4  ;;  %v515_v27 = vshrl.u32 %v452_v20, 16 }
 0x1b3   :  { %224 = vrot.lane.b32.xlu2 %v1588_v37, %s1448_s29  ;;  %v409_v47 = vsel %vm234_vm6, 0, %v408_v39  ;;  %v474_v59 = vsel %vm234_vm6, %v408_v39, %v401_v38  ;;  %v467_v19 = vsel %vm234_vm6, %v466_v12, %v459_v11  ;;  %538 = vrot.lane.b32.xlu1 %v1672_v8, %s1448_s29 }
 0x1b4   :  { %v479_v50 = vrot.slane %v409_v47, 4  ;;  %v478_v13 = vperm.slane %v474_v59, %v1596_v52  ;;  %v471_v21 = vperm.slane %v467_v19, %v1606_v16 }
 0x1b6   :  { %v480_v63 = vsel %vm234_vm6, %v479_v50, %v407_v55  ;;  %v514_v26 = vpack.i.b16 %v471_v21, %v452_v20  ;;  %v516_v28 = vshrl.u32 %v471_v21, 16  ;;  %v472_v36 = vrot.slane %v471_v21, 4 }
 0x1b7   :  { %v484_v4 = vperm.slane %v480_v63, %v1596_v52 }
 0x1b8   :  { %v778_v33 = vunpack.c.l.b16 %v514_v26  ;;  %v517_v34 = vpack.i.b16 %v516_v28, %v515_v27  ;;  %v473_v43 = vsel %vm234_vm6, 0, %v472_v36 }
 0x1b9   :  { %v485_v14 = vrot.slane %v484_v4, 4  ;;  %v520_v49 = vpack.i.b16 %v473_v43, %v454_v35  ;;  %v522_v50 = vshrl.u32 %v473_v43, 16 }
 0x1ba   :  { %v801_v42 = vunpack.c.l.b16 %v517_v34 }
 0x1bb   :  { %v486_v22 = vsel %vm234_vm6, %v485_v14, %v478_v13  ;;  %v823_v57 = vunpack.c.l.b16 %v520_v49  ;;  %v523_v59 = vpack.i.b16 %v522_v50, %v521_v44  ;;  %542 = vrot.lane.b32.xlu2 %v1672_v8, %s1450_s0 }
 0x1bc   :  { %v490_v24 = vperm.slane %v486_v22, %v1606_v16 }
 0x1bd   :  { %v845_v63 = vunpack.c.l.b16 %v523_v59 }
 0x1be   :  { %v526_v30 = vpack.i.b16 %v509_v25, %v490_v24  ;;  %v527_v31 = vshrl.u32 %v490_v24, 16  ;;  %v491_v40 = vrot.slane %v490_v24, 4 }
 0x1c0   :  { %v779_v38 = vunpack.c.l.b16 %v526_v30  ;;  %v529_v39 = vpack.i.b16 %v528_v32, %v527_v31  ;;  %v492_v47 = vsel %vm234_vm6, 0, %v491_v40 }
 0x1c1   :  { %v532_v51 = vpack.i.b16 %v511_v48, %v492_v47  ;;  %v533_v53 = vshrl.u32 %v492_v47, 16  ;;  %v1311_v47 = vld [vmem:[%s1860_s3] ss:$0 sm:$0xff]  ;;  %s1453_s3 = smov 16  }
 0x1c2   :  { %v780_v45 = vpack.c.b16 %v779_v38, %v778_v33  ;;  %v802_v46 = vunpack.c.l.b16 %v529_v39 }
 0x1c3   :  { %v824_v58 = vunpack.c.l.b16 %v532_v51  ;;  %v535_v61 = vpack.i.b16 %v534_v56, %v533_v53 }
 0x1c4   :  { %v786_v54 = vsel %vm781_vm7, %v780_v45, 0  ;;  %v803_v55 = vpack.c.b16 %v802_v46, %v801_v42 }
 0x1c5   :  { %795 = vmatpush.bf16.xpose.msra.mxu1 %v786_v54  ;;  %v825_v62 = vpack.c.b16 %v824_v58, %v823_v57  ;;  %v846_v0 = vunpack.c.l.b16 %v535_v61 }
 0x1c6   :  { %v808_v60 = vsel %vm781_vm7, %v803_v55, 0 }
 0x1c7   :  { %817 = vmatpush.bf16.xpose.msra.mxu2 %v808_v60  ;;  %v830_v2 = vsel %vm781_vm7, %v825_v62, 0  ;;  %v847_v3 = vpack.c.b16 %v846_v0, %v845_v63 }
 0x1c8   :  { %839 = vmatpush.bf16.xpose.msra.mxu3 %v830_v2 }
 0x1c9   :  { %v852_v4 = vsel %vm781_vm7, %v847_v3, 0 }
 0x1ca   :  { %861 = vmatpush.bf16.xpose.msrb.mxu0 %v852_v4 }
 0x205   :  { %v228_v5 = vpop.permute.xlu2 %227 }
 0x206   :  { %v233_v6 = vrot.slane %v228_v5, 4 }
 0x208   :  { %v235_v10 = vsel %vm234_vm6, %v233_v6, %v1588_v37  ;;  %v541_v6 = vpop.permute.xlu0 %540 }
 0x209   :  { %v239_v11 = vperm.slane %v235_v10, %v1596_v52 }
 0x20b   :  { %v248_v17 = vrot.slane %v239_v11, 4 }
 0x20d   :  { %v225_v14 = vpop.permute.xlu2 %224 }
 0x215   :  { %v1718_v10 = vpop.permute.xlu2 %542 }
 0x21d   :  { %v231_v12 = vpop.permute.xlu1 %230 }
 0x21e   :  { %v240_v13 = vrot.slane %v231_v12, 4 }
 0x220   :  { %v241_v15 = vsel %vm234_vm6, %v240_v13, %v225_v14 }
 0x221   :  { %v245_v18 = vperm.slane %v241_v15, %v1596_v52 }
 0x223   :  { %v246_v19 = vrot.slane %v245_v18, 4  ;;  %v249_v20 = vsel %vm234_vm6, %v245_v18, %v248_v17 }
 0x224   :  { %v257_v21 = vperm.slane %v249_v20, %v1606_v16 }
 0x225   :  { %v247_v37 = vsel %vm234_vm6, %v246_v19, %v239_v11  ;;  %v539_v11 = vpop.permute.xlu1 %538 }
 0x226   :  { %v253_v22 = vperm.slane %v247_v37, %v1606_v16  ;;  %v260_v23 = vrot.slane %v257_v21, 4 }
 0x228   :  { %v258_v24 = vrot.slane %v253_v22, 4  ;;  %v261_v25 = vsel %vm234_vm6, 0.0, %v260_v23  ;;  %v262_v26 = vsel %vm234_vm6, %v260_v23, %v253_v22  ;;  %v565_v23 = vshrl.u32 %v1667_v7, 16 }
 0x229   :  { %v267_v27 = vrot.slane %v261_v25, 4  ;;  %v266_v28 = vperm.slane %v262_v26, %v1596_v52 }
 0x22a   :  { %v259_v29 = vsel %vm234_vm6, 0.0, %v258_v24  ;;  %v566_v24 = vshrl.u32 %v541_v6, 16 }
 0x22b   :  { %v268_v30 = vsel %vm234_vm6, %v267_v27, %v259_v29  ;;  %v275_v31 = vrot.slane %v266_v28, 4 }
 0x22c   :  { %v272_v32 = vperm.slane %v268_v30, %v1596_v52  ;;  %v567_v30 = vpack.i.b16 %v566_v24, %v565_v23 }
 0x22e   :  { %v276_v33 = vsel %vm234_vm6, %v272_v32, %v275_v31  ;;  %v273_v34 = vrot.slane %v272_v32, 4 }
 0x22f   :  { %v284_v35 = vperm.slane %v276_v33, %v1606_v16 }
 0x230   :  { %v274_v36 = vsel %vm234_vm6, %v273_v34, %v266_v28  ;;  %v564_v28 = vpack.i.b16 %v541_v6, %v1667_v7 }
 0x231   :  { %v287_v38 = vrot.slane %v284_v35, 4  ;;  %v291_v39 = vpack.c.bf16 %v284_v35, %v284_v35  ;;  %v280_v40 = vperm.slane %v274_v36, %v1606_v16  ;;  %v553_v35 = vshrl.u32 %v1672_v8, 16 }
 0x232   :  { %v630_v33 = vperm.slane %v564_v28, %v1596_v52  ;;  %v554_v36 = vshrl.u32 %v539_v11, 16 }
 0x233   :  { %1242 = vmatmul.msk.bf16.vlgmr.msra.gmra.mxu3 %vm781_vm7, %v291_v39  ;;  %v289_v41 = vpack.c.bf16 %v280_v40, %v280_v40  ;;  %v288_v42 = vsel %vm234_vm6, 0.0, %v287_v38  ;;  %v285_v43 = vrot.slane %v280_v40, 4  ;;  %v656_v38 = vperm.slane %v567_v30, %v1596_v52 }
 0x234   :  { %v292_v44 = vpack.c.bf16 %v288_v42, %v288_v42 }
 0x235   :  { %1240 = vmatmul.msk.bf16.vlgmr.msra.gmra.mxu1 %vm781_vm7, %v289_v41  ;;  %v286_v45 = vsel %vm234_vm6, 0.0, %v285_v43 }
 0x236   :  { %1243 = vmatmul.msk.bf16.vlgmr.msrb.gmra.mxu0 %vm781_vm7, %v292_v44  ;;  %v290_v46 = vpack.c.bf16 %v286_v45, %v286_v45  ;;  %v552_v44 = vpack.i.b16 %v539_v11, %v1672_v8  ;;  %v638_v45 = vrot.slane %v630_v33, 4 }
 0x238   :  { %1241 = vmatmul.msk.bf16.vlgmr.msra.gmra.mxu2 %vm781_vm7, %v290_v46 }
 0x2b2   :  { %v797_v48 = vpop.f32.mrf.mxu1 }
 0x2b3   :  { %v867_v49 = vmul.f32 0.35355338, %v797_v48  ;;  %v863_v50 = vpop.f32.mrf.mxu0  ;;  %v555_v48 = vpack.i.b16 %v554_v36, %v553_v35 }
 0x2b4   :  { %v870_v51 = vmul.f32 0.35355338, %v863_v50 }
 0x2b5   :  { %v874_v53 = vadd.f32 %v1311_v47, %v867_v49  ;;  %v664_v49 = vrot.slane %v656_v38, 4 }
 0x2b6   :  { %v841_v54 = vpop.f32.mrf.mxu3  ;;  %v877_v55 = vadd.f32 %v1311_v47, %v870_v51 }
 0x2b7   :  { %v869_v56 = vmul.f32 0.35355338, %v841_v54  ;;  %v879_v57 = vsel %vm878_vm8, %v874_v53, -inf }
 0x2b8   :  { %880 = vmax.xlane.f32.xlu0 %v879_v57  ;;  %v888_v58 = vsel %vm878_vm8, %v877_v55, -inf }
 0x2b9   :  { %889 = vmax.xlane.f32.xlu2 %v888_v58  ;;  %v876_v59 = vadd.f32 %v1311_v47, %v869_v56 }
 0x2ba   :  { %v799_v60 = vpop.f32.mrf.mxu1 }
 0x2bb   :  { %v819_v61 = vpop.f32.mrf.mxu2  ;;  %v865_v62 = vpop.f32.mrf.mxu0  ;;  %v885_v63 = vsel %vm878_vm8, %v876_v59, -inf }
 0x2bc   :  { %v868_v0 = vmul.f32 0.35355338, %v819_v61  ;;  %886 = vmax.xlane.f32.xlu1 %v885_v63  ;;  %v559_v62 = vshrl.u32 %v1718_v10, 16  ;;  %v604_v63 = vperm.slane %v555_v48, %v1596_v52 }
 0x2be   :  { %v843_v2 = vpop.f32.mrf.mxu3  ;;  %v875_v3 = vadd.f32 %v1311_v47, %v868_v0  ;;  %v612_v24 = vrot.slane %v604_v63, 4 }
 0x2c0   :  { %v882_v4 = vsel %vm878_vm8, %v875_v3, -inf }
 0x2c1   :  { %883 = vmax.xlane.f32.xlu2 %v882_v4 }
 0x2c3   :  { %v821_v5 = vpop.f32.mrf.mxu2 }
 0x2cc   :  { %544 = vrot.lane.b32.xlu0 %v1667_v7, %s1450_s0 }
 0x2d5   :  { %546 = vrot.lane.b32.xlu1 %v1672_v8, %s1449_s30  ;;  %v578_v8 = vperm.slane %v552_v44, %v1596_v52 }
 0x2d7   :  { %v586_v11 = vrot.slane %v578_v8, 4 }
 0x2d9   :  { %548 = vrot.lane.b32.xlu2 %v1667_v7, %s1449_s30 }
 0x32b   :  { %v881_v12 = vpop.xlane.xlu0 %880 }
 0x32c   :  { %v891_v13 = vsub.f32 %v874_v53, %v881_v12  ;;  %v890_v14 = vpop.xlane.xlu2 %889 }
 0x32d   :  { %v894_v19 = vsub.f32 %v877_v55, %v890_v14 }
 0x32e   :  { %v895_v15 = vmul.f32 1.442695, %v891_v13 }
 0x32f   :  { %v887_v17 = vpop.xlane.xlu1 %886  ;;  %v901_v25 = vmul.f32 1.442695, %v894_v19 }
 0x330   :  { %1321 = vpow2.f32 %v895_v15  ;;  %v893_v18 = vsub.f32 %v876_v59, %v887_v17 }
 0x332   :  { %v899_v20 = vmul.f32 1.442695, %v893_v18 }
 0x334   :  { %1323 = vpow2.f32 %v899_v20  ;;  %v884_v21 = vpop.xlane.xlu2 %883 }
 0x335   :  { %v892_v37 = vsub.f32 %v875_v3, %v884_v21 }
 0x336   :  { %v1720_v22 = vpop.eup %1321 }
 0x337   :  { %v897_v26 = vmul.f32 1.442695, %v892_v37  ;;  %v903_v27 = vsel %vm878_vm8, %v1720_v22, 0.0 }
 0x338   :  { %904 = vadd.xlane.f32.xlu2 %v903_v27 }
 0x339   :  { %1325 = vpow2.f32 %v897_v26 }
 0x33a   :  { %v1726_v29 = vpop.eup %1323  ;;  %1327 = vpow2.f32 %v901_v25 }
 0x33b   :  { %v909_v31 = vsel %vm878_vm8, %v1726_v29, 0.0 }
 0x33c   :  { %910 = vadd.xlane.f32.xlu0 %v909_v31  ;;  %v549_v32 = vpop.permute.xlu2 %548 }
 0x33d   :  { %v572_v34 = vshrl.u32 %v549_v32, 16 }
 0x33e   :  { %v545_v39 = vpop.permute.xlu0 %544 }
 0x33f   :  { %v1733_v7 = vpop.eup %1325  ;;  %v570_v40 = vpack.i.b16 %v549_v32, %v545_v39  ;;  %v571_v41 = vshrl.u32 %v545_v39, 16 }
 0x340   :  { %v1735_v42 = vpop.eup %1327  ;;  %v906_v43 = vsel %vm878_vm8, %v1733_v7, 0.0 }
 0x341   :  { %v573_v46 = vpack.i.b16 %v572_v34, %v571_v41  ;;  %v635_v47 = vperm.slane %v570_v40, %v1596_v52  ;;  %907 = vadd.xlane.f32.xlu1 %v906_v43  ;;  %v912_v54 = vsel %vm878_vm8, %v1735_v42, 0.0 }
 0x343   :  { %v636_v50 = vrot.slane %v635_v47, 4  ;;  %v639_v51 = vsel %vm234_vm6, %v635_v47, %v638_v45  ;;  %v661_v53 = vperm.slane %v573_v46, %v1596_v52 }
 0x344   :  { %v647_v55 = vperm.slane %v639_v51, %v1606_v16  ;;  %913 = vadd.xlane.f32.xlu0 %v912_v54 }
 0x345   :  { %v637_v56 = vsel %vm234_vm6, %v636_v50, %v630_v33  ;;  %v662_v57 = vrot.slane %v661_v53, 4  ;;  %v665_v58 = vsel %vm234_vm6, %v661_v53, %v664_v49 }
 0x346   :  { %v643_v59 = vperm.slane %v637_v56, %v1606_v16  ;;  %v650_v60 = vrot.slane %v647_v55, 4  ;;  %v673_v61 = vperm.slane %v665_v58, %v1606_v16 }
 0x347   :  { %v663_v0 = vsel %vm234_vm6, %v662_v57, %v656_v38  ;;  %v547_v2 = vpop.permute.xlu1 %546 }
 0x348   :  { %v648_v3 = vrot.slane %v643_v59, 4  ;;  %v651_v4 = vsel %vm234_vm6, 0, %v650_v60  ;;  %v669_v5 = vperm.slane %v663_v0, %v1606_v16  ;;  %v676_v6 = vrot.slane %v673_v61, 4 }
 0x349   :  { %v721_v12 = vrot.slane %v651_v4, 4  ;;  %v558_v13 = vpack.i.b16 %v547_v2, %v1718_v10  ;;  %v560_v14 = vshrl.u32 %v547_v2, 16  ;;  %v716_v19 = vsel %vm234_vm6, %v650_v60, %v643_v59 }
 0x34a   :  { %v649_v15 = vsel %vm234_vm6, 0, %v648_v3  ;;  %v674_v17 = vrot.slane %v669_v5, 4  ;;  %v677_v18 = vsel %vm234_vm6, 0, %v676_v6  ;;  %v720_v30 = vperm.slane %v716_v19, %v1596_v52 }
 0x34b   :  { %v740_v20 = vrot.slane %v677_v18, 4  ;;  %v561_v21 = vpack.i.b16 %v560_v14, %v559_v62  ;;  %v583_v37 = vperm.slane %v558_v13, %v1596_v52  ;;  %v722_v23 = vsel %vm234_vm6, %v721_v12, %v649_v15 }
 0x34c   :  { %v675_v25 = vsel %vm234_vm6, 0, %v674_v17  ;;  %v726_v26 = vperm.slane %v722_v23, %v1596_v52  ;;  %v735_v33 = vsel %vm234_vm6, %v676_v6, %v669_v5 }
 0x34d   :  { %v584_v10 = vrot.slane %v583_v37, 4  ;;  %v587_v27 = vsel %vm234_vm6, %v583_v37, %v586_v11  ;;  %v609_v28 = vperm.slane %v561_v21, %v1596_v52  ;;  %v741_v34 = vsel %vm234_vm6, %v740_v20, %v675_v25 }
 0x34e   :  { %v595_v31 = vperm.slane %v587_v27, %v1606_v16  ;;  %v727_v32 = vrot.slane %v726_v26, 4  ;;  %v745_v39 = vperm.slane %v741_v34, %v1596_v52  ;;  %v739_v46 = vperm.slane %v735_v33, %v1596_v52 }
 0x34f   :  { %v585_v35 = vsel %vm234_vm6, %v584_v10, %v578_v8  ;;  %v610_v36 = vrot.slane %v609_v28, 4  ;;  %v613_v38 = vsel %vm234_vm6, %v609_v28, %v612_v24 }
 0x350   :  { %v591_v40 = vperm.slane %v585_v35, %v1606_v16  ;;  %v598_v41 = vrot.slane %v595_v31, 4  ;;  %v621_v43 = vperm.slane %v613_v38, %v1606_v16  ;;  %v728_v45 = vsel %vm234_vm6, %v727_v32, %v720_v30 }
 0x351   :  { %v611_v44 = vsel %vm234_vm6, %v610_v36, %v604_v63  ;;  %v746_v47 = vrot.slane %v745_v39, 4  ;;  %v732_v57 = vperm.slane %v728_v45, %v1606_v16 }
 0x352   :  { %v596_v48 = vrot.slane %v591_v40, 4  ;;  %v599_v49 = vsel %vm234_vm6, 0, %v598_v41  ;;  %v617_v50 = vperm.slane %v611_v44, %v1606_v16  ;;  %v624_v51 = vrot.slane %v621_v43, 4 }
 0x353   :  { %v683_v53 = vrot.slane %v599_v49, 4  ;;  %v747_v54 = vsel %vm234_vm6, %v746_v47, %v739_v46  ;;  %v678_v58 = vsel %vm234_vm6, %v598_v41, %v591_v40  ;;  %v733_v11 = vrot.slane %v732_v57, 4 }
 0x354   :  { %v597_v55 = vsel %vm234_vm6, 0, %v596_v48  ;;  %v622_v8 = vrot.slane %v617_v50, 4  ;;  %v625_v56 = vsel %vm234_vm6, 0, %v624_v51  ;;  %v751_v61 = vperm.slane %v747_v54, %v1606_v16 }
 0x355   :  { %v702_v59 = vrot.slane %v625_v56, 4  ;;  %v684_v60 = vsel %vm234_vm6, %v683_v53, %v597_v55  ;;  %v697_v0 = vsel %vm234_vm6, %v624_v51, %v617_v50  ;;  %v682_v4 = vperm.slane %v678_v58, %v1596_v52 }
 0x356   :  { %v623_v62 = vsel %vm234_vm6, 0, %v622_v8  ;;  %v688_v63 = vperm.slane %v684_v60, %v1596_v52  ;;  %v752_v3 = vrot.slane %v751_v61, 4  ;;  %v701_v13 = vperm.slane %v697_v0, %v1596_v52 }
 0x357   :  { %v703_v2 = vsel %vm234_vm6, %v702_v59, %v623_v62  ;;  %v770_v15 = vshrl.u32 %v751_v61, 16  ;;  %v769_v20 = vshrl.u32 %v732_v57, 16  ;;  %v768_v37 = vpack.i.b16 %v751_v61, %v732_v57 }
 0x358   :  { %v689_v5 = vrot.slane %v688_v63, 4  ;;  %v707_v6 = vperm.slane %v703_v2, %v1596_v52  ;;  %v753_v18 = vsel %vm234_vm6, 0, %v752_v3  ;;  %v734_v24 = vsel %vm234_vm6, 0, %v733_v11 }
 0x359   :  { %v771_v26 = vpack.i.b16 %v770_v15, %v769_v20  ;;  %v776_v10 = vshrl.u32 %v753_v18, 16  ;;  %v774_v32 = vpack.i.b16 %v753_v18, %v734_v24  ;;  %v775_v33 = vshrl.u32 %v734_v24, 16 }
 0x35a   :  { %v690_v12 = vsel %vm234_vm6, %v689_v5, %v682_v4  ;;  %v708_v14 = vrot.slane %v707_v6, 4  ;;  %v928_v35 = vunpack.c.l.b16 %v768_v37 }
 0x35b   :  { %v694_v17 = vperm.slane %v690_v12, %v1606_v16  ;;  %v777_v43 = vpack.i.b16 %v776_v10, %v775_v33  ;;  %v949_v46 = vunpack.c.l.b16 %v771_v26  ;;  %v969_v49 = vunpack.c.l.b16 %v774_v32 }
 0x35c   :  { %v709_v19 = vsel %vm234_vm6, %v708_v14, %v701_v13 }
 0x35d   :  { %v713_v21 = vperm.slane %v709_v19, %v1606_v16  ;;  %v695_v23 = vrot.slane %v694_v17, 4  ;;  %v757_v25 = vshrl.u32 %v694_v17, 16  ;;  %v989_v54 = vunpack.c.l.b16 %v777_v43 }
 0x35f   :  { %v756_v27 = vpack.i.b16 %v713_v21, %v694_v17  ;;  %v758_v28 = vshrl.u32 %v713_v21, 16  ;;  %v696_v30 = vsel %vm234_vm6, 0, %v695_v23  ;;  %v714_v31 = vrot.slane %v713_v21, 4 }
 0x360   :  { %v763_v40 = vshrl.u32 %v696_v30, 16 }
 0x361   :  { %v927_v34 = vunpack.c.l.b16 %v756_v27  ;;  %v759_v36 = vpack.i.b16 %v758_v28, %v757_v25  ;;  %v715_v38 = vsel %vm234_vm6, 0, %v714_v31 }
 0x362   :  { %v762_v39 = vpack.i.b16 %v715_v38, %v696_v30  ;;  %v764_v41 = vshrl.u32 %v715_v38, 16 }
 0x363   :  { %v929_v44 = vpack.c.b16 %v928_v35, %v927_v34  ;;  %v948_v45 = vunpack.c.l.b16 %v759_v36 }
 0x364   :  { %v765_v47 = vpack.i.b16 %v764_v41, %v763_v40  ;;  %v968_v48 = vunpack.c.l.b16 %v762_v39 }
 0x365   :  { %942 = vmatpush.bf16.msrb.mxu1 %v929_v44  ;;  %v950_v50 = vpack.c.b16 %v949_v46, %v948_v45 }
 0x366   :  { %v970_v51 = vpack.c.b16 %v969_v49, %v968_v48  ;;  %v988_v53 = vunpack.c.l.b16 %v765_v47 }
 0x367   :  { %962 = vmatpush.bf16.msrb.mxu2 %v950_v50  ;;  %v1285_v50 = vld [vmem:[#allocation4] sm:$0xff] }
 0x368   :  { %982 = vmatpush.bf16.msrb.mxu3 %v970_v51  ;;  %v990_v55 = vpack.c.b16 %v989_v54, %v988_v53 }
 0x36a   :  { %1002 = vmatpush.bf16.msra.mxu0 %v990_v55 }
 0x3ab   :  { %v905_v8 = vpop.xlane.xlu2 %904 }
 0x3ac   :  { %1329 = vrcp.f32 %v905_v8 }
 0x3af   :  { %v911_v56 = vpop.xlane.xlu0 %910 }
 0x3b0   :  { %1331 = vrcp.f32 %v911_v56 }
 0x3b2   :  { %v1330_v57 = vpop.eup %1329 }
 0x3b3   :  { %v919_v58 = vmul.f32 %v1330_v57, %v1720_v22  ;;  %v1312_v57 = vld [vmem:[%s1864_s7] ss:$0 sm:$0xff] }
 0x3b4   :  { %v908_v59 = vpop.xlane.xlu1 %907 }
 0x3b5   :  { %1333 = vrcp.f32 %v908_v59  ;;  %v923_v60 = vpack.c.bf16 %v919_v58, %v919_v58 }
 0x3b6   :  { %v1332_v61 = vpop.eup %1331 }
 0x3b7   :  { %v921_v62 = vmul.f32 %v1332_v61, %v1726_v29  ;;  %1244 = vmatmul.msk.bf16.vlgmr.msrb.gmra.mxu1 %vm931_vm9, %v923_v60  ;;  %v914_v63 = vpop.xlane.xlu0 %913 }
 0x3b8   :  { %1335 = vrcp.f32 %v914_v63 }
 0x3b9   :  { %v925_v0 = vpack.c.bf16 %v921_v62, %v921_v62 }
 0x3bb   :  { %v1334_v2 = vpop.eup %1333  ;;  %1246 = vmatmul.msk.bf16.vlgmr.msrb.gmra.mxu3 %vm931_vm9, %v925_v0 }
 0x3bc   :  { %v920_v3 = vmul.f32 %v1334_v2, %v1733_v7 }
 0x3be   :  { %v1336_v4 = vpop.eup %1335  ;;  %v924_v5 = vpack.c.bf16 %v920_v3, %v920_v3 }
 0x3bf   :  { %v922_v22 = vmul.f32 %v1336_v4, %v1735_v42 }
 0x3c0   :  { %1245 = vmatmul.msk.bf16.vlgmr.msrb.gmra.mxu2 %vm931_vm9, %v924_v5  ;;  %v1288_v5 = vld [vmem:[#allocation6 + $0x8] sm:$0xff] }
 0x3c1   :  { %v926_v6 = vpack.c.bf16 %v922_v22, %v922_v22  ;;  %1167 = vmatpush.bf16.msra.mxu2 %v1288_v5  ;;  %v1287_v22 = vld [vmem:[#allocation6] sm:$0xff] }
 0x3c3   :  { %1247 = vmatmul.msk.bf16.vlgmr.msra.gmra.mxu0 %vm931_vm9, %v926_v6  ;;  %v1292_v6 = vld [vmem:[#allocation7 + $0x18] sm:$0xff] }
 0x3c4   :  { %1211 = vmatpush.bf16.msra.mxu3 %v1292_v6 }
 0x3c5   :  { %1168 = vmatpush.bf16.msra.mxu2 %v1287_v22 }
 0x434   :  { %v944_v29 = vpop.f32.mrf.mxu1 }
 0x43c   :  { %v946_v11 = vpop.f32.mrf.mxu1 }
 0x43d   :  { %v1291_v11 = vld [vmem:[#allocation7 + $0x10] sm:$0xff] }
 0x43e   :  { %v984_v12 = vpop.f32.mrf.mxu3  ;;  %1212 = vmatpush.bf16.msra.mxu3 %v1291_v11 }
 0x43f   :  { %v1008_v13 = vrot.slane %v984_v12, 4 }
 0x440   :  { %v1004_v14 = vpop.f32.mrf.mxu0 }
 0x441   :  { %v1009_v15 = vsel %vm234_vm6, %v1008_v13, %v944_v29  ;;  %v1014_v17 = vrot.slane %v1004_v14, 4  ;;  %v1290_v13 = vld [vmem:[#allocation7 + $0x8] sm:$0xff] }
 0x442   :  { %v1013_v18 = vperm.slane %v1009_v15, %v1596_v52  ;;  %1213 = vmatpush.bf16.msra.mxu3 %v1290_v13 }
 0x443   :  { %v964_v7 = vpop.f32.mrf.mxu2 }
 0x444   :  { %v1022_v19 = vrot.slane %v1013_v18, 4  ;;  %v1015_v20 = vsel %vm234_vm6, %v1014_v17, %v964_v7 }
 0x445   :  { %v1019_v42 = vperm.slane %v1015_v20, %v1596_v52  ;;  %v1313_v20 = vld [vmem:[%s1871_s14] ss:$0 sm:$0xff] }
 0x446   :  { %v986_v21 = vpop.f32.mrf.mxu3 }
 0x447   :  { %v1020_v37 = vrot.slane %v1019_v42, 4  ;;  %v1023_v23 = vsel %vm234_vm6, %v1019_v42, %v1022_v19  ;;  %v1314_v21 = vld [vmem:[%s1872_s15] ss:$0 sm:$0xff] }
 0x448   :  { %v1031_v24 = vperm.slane %v1023_v23, %v1606_v16  ;;  %v1006_v25 = vpop.f32.mrf.mxu0 }
 0x449   :  { %v1021_v26 = vsel %vm234_vm6, %v1020_v37, %v1013_v18  ;;  %v1289_v25 = vld [vmem:[#allocation7] sm:$0xff] }
 0x44a   :  { %v1027_v10 = vperm.slane %v1021_v26, %v1606_v16  ;;  %v1034_v27 = vrot.slane %v1031_v24, 4  ;;  %1214 = vmatpush.bf16.msra.mxu3 %v1289_v25  ;;  %v1315_v26 = vld [vmem:[%s1866_s9] ss:$0 sm:$0xff] }
 0x44b   :  { %v966_v28 = vpop.f32.mrf.mxu2 }
 0x44c   :  { %v1032_v30 = vrot.slane %v1027_v10, 4  ;;  %v1035_v31 = vsel %vm234_vm6, 0.0, %v1034_v27  ;;  %v1036_v32 = vsel %vm234_vm6, %v1034_v27, %v1027_v10 }
 0x44d   :  { %v1041_v33 = vrot.slane %v1035_v31, 4  ;;  %v1040_v34 = vperm.slane %v1036_v32, %v1596_v52  ;;  %v1316_v32 = vld [vmem:[%s1868_s11] ss:$0 sm:$0xff] }
 0x44e   :  { %v1033_v35 = vsel %vm234_vm6, 0.0, %v1032_v30 }
 0x44f   :  { %v1042_v36 = vsel %vm234_vm6, %v1041_v33, %v1033_v35  ;;  %v1049_v38 = vrot.slane %v1040_v34, 4 }
 0x450   :  { %v1046_v39 = vperm.slane %v1042_v36, %v1596_v52  ;;  %v1286_v52 = vld [vmem:[#allocation4 + $0x8] sm:$0xff] }
 0x451   :  { %1104 = vmatpush.bf16.msra.mxu1 %v1286_v52 }
 0x452   :  { %v1050_v40 = vsel %vm234_vm6, %v1046_v39, %v1049_v38  ;;  %v1047_v41 = vrot.slane %v1046_v39, 4 }
 0x453   :  { %v1058_v43 = vperm.slane %v1050_v40, %v1606_v16 }
 0x454   :  { %v1048_v44 = vsel %vm234_vm6, %v1047_v41, %v1040_v34 }
 0x455   :  { %1068 = vrot.lane.b32.xlu2 %v1058_v43, %s1453_s3  ;;  %v1061_v45 = vrot.slane %v1058_v43, 4  ;;  %v1054_v46 = vperm.slane %v1048_v44, %v1606_v16  ;;  %1105 = vmatpush.bf16.msra.mxu1 %v1285_v50 }
 0x457   :  { %v1062_v47 = vsel %vm234_vm6, 0.0, %v1061_v45  ;;  %v1059_v48 = vrot.slane %v1054_v46, 4 }
 0x458   :  { %1072 = vrot.lane.b32.xlu0 %v1062_v47, %s1454_s4 }
 0x459   :  { %v1060_v49 = vsel %vm234_vm6, 0.0, %v1059_v48 }
 0x45a   :  { %1064 = vrot.lane.b32.xlu1 %v1060_v49, %s1455_s23 }
 0x4af   :  { %v1069_v53 = vpop.permute.xlu2 %1068 }
 0x4ca   :  { %v1073_v55 = vpop.permute.xlu0 %1072 }
 0x4cc   :  { %v1065_v51 = vpop.permute.xlu1 %1064 }
 0x4cd   :  { %v1075_v54 = vsel %vm781_vm7, %v1054_v46, %v1065_v51 }
 0x4ce   :  { %v1076_v16 = vsel %vm931_vm9, %v1075_v54, %v1069_v53 }
 0x4cf   :  { %v1078_v8 = vsel %vm1077_vm10, %v1076_v16, %v1073_v55 }
 0x4d0   :  { %v1079_v56 = vpack.c.bf16 %v1078_v8, %v1078_v8 }
 0x4d2   :  { %1256 = vmatmul.msk.bf16.vlgmr.msra.gmra.mxu1 %vm206_vm5, %v1079_v56 }
 0x54f   :  { %v1107_v58 = vpop.f32.mrf.mxu1 }
 0x550   :  { %v1108_v59 = vadd.f32 %v1312_v57, %v1107_v58 }
 0x552   :  { %v1111_v60 = vadd.f32 %v1108_v59, %v1556_v1 }
 0x554   :  { %v1112_v61 = vsel %vm152_vm0, %v1111_v60, 0.0 }
 0x555   :  { %1113 = vadd.xlane.f32.xlu1 %v1112_v61 }
 0x557   :  { %v1109_v62 = vpop.f32.mrf.mxu1 }
 0x5c8   :  { %v1114_v63 = vpop.xlane.xlu1 %1113 }
 0x5c9   :  { %v1115_v0 = vmul.f32 %v1114_v63, %v1560_v9 }
 0x5cb   :  { %v1116_v2 = vsub.f32 %v1111_v60, %v1115_v0 }
 0x5cd   :  { %v1117_v3 = vmul.f32 %v1116_v2, %v1116_v2 }
 0x5cf   :  { %v1118_v4 = vsel %vm152_vm0, %v1117_v3, 0.0 }
 0x5d0   :  { %1119 = vadd.xlane.f32.xlu0 %v1118_v4 }
 0x643   :  { %v1120_v29 = vpop.xlane.xlu0 %1119 }
 0x644   :  { %v1121_v1 = vmul.f32 %v1120_v29, %v1560_v9 }
 0x646   :  { %v1122_v12 = vadd.f32 1e-06, %v1121_v1 }
 0x648   :  { %1337 = vrsqrt.f32 %v1122_v12  ;;  %vm1129_vm12 = vweird.f32 %v1122_v12 }
 0x64e   :  { %v1338_v14 = vpop.eup %1337 }
 0x64f   :  { %v1124_v15 = vmul.f32 %v1338_v14, %v1122_v12  ;;  %vm1130_vm11 = vweird.f32 %v1338_v14 }
 0x650   :  { %vm1131_vm13 = vmor %vm1129_vm12, %vm1130_vm11 }
 0x651   :  { %v1125_v17 = vmul.f32 %v1338_v14, %v1124_v15 }
 0x653   :  { %v1126_v18 = vmul.f32 0.5, %v1125_v17 }
 0x655   :  { %v1127_v7 = vsub.f32 1.5, %v1126_v18 }
 0x657   :  { %v1128_v19 = vmul.f32 %v1338_v14, %v1127_v7 }
 0x659   :  { %v1132_v9 = vsel %vm1131_vm13, %v1338_v14, %v1128_v19 }
 0x65a   :  { %v1133_v42 = vmul.f32 %v1132_v9, %v1116_v2 }
 0x65c   :  { %v1137_v37 = vmul.f32 %v1313_v20, %v1133_v42 }
 0x65e   :  { %v1141_v23 = vadd.f32 %v1314_v21, %v1137_v37 }
 0x660   :  { %v1142_v24 = vpack.c.bf16 %v1141_v23, %v1141_v23 }
 0x662   :  { %1265 = vmatmul.msk.bf16.vlgmr.msra.gmra.mxu2 %vm206_vm5, %v1142_v24 }
 0x6e5   :  { %v1170_v10 = vpop.f32.mrf.mxu2 }
 0x6e6   :  { %v1171_v27 = vadd.f32 %v1315_v26, %v1170_v10 }
 0x6e8   :  { %v1174_v28 = vmax.f32 %v1171_v27, 0.0 }
 0x6ea   :  { %v1175_v30 = vpack.c.bf16 %v1174_v28, %v1174_v28 }
 0x6ec   :  { %1282 = vmatmul.msk.bf16.vlgmr.msra.gmra.mxu3 %vm1203_vm14, %v1175_v30 }
 0x6ed   :  { %v1172_v31 = vpop.f32.mrf.mxu2 }
 0x76f   :  { %v1216_v33 = vpop.f32.mrf.mxu3 }
 0x770   :  { %v1217_v34 = vadd.f32 %v1316_v32, %v1216_v33 }
 0x772   :  { %v1220_v35 = vadd.f32 %v1217_v34, %v1111_v60 }
 0x774   :  { %v1221_v36 = vpack.c.bf16 %v1220_v35, %v1220_v35 }
 0x776   :  { %1223 = vst.msk [vmem:[%s1873_s16] sm:$0x3] %vm1222_vm15, %v1221_v36 }
 0x777   :  { %v1218_v38 = vpop.f32.mrf.mxu3 }
 0x778   :  { %1228 = vsyncpa [#allocation3], 1 }
 0x779   :  { %1229 = vsyncpa [#allocation5], 1 }
 0x77a   :  { %1230 = vsyncpa [#allocation8], 1 }

// kernel: kgmodel_v1_forward.7
= control target key start
LH: loop header
LB: loop body
LE: loop exit
PB: predicated region body
PF: predicated region fallthrough
CT: control target
= control target key end

     0   :  { %s332_s12 = smov 0   ;;  %s361_s0 = inlined_call_operand.vmem [shape: f32[16,48], index: 0, kind: input, shape index: {}]   ;;  %s362_s1 = inlined_call_operand.vmem [shape: bf16[48,32], index: 1, kind: input, shape index: {}]   ;;  %s363_s2 = inlined_call_operand.vmem [shape: f32[1,32], index: 2, kind: input, shape index: {}]   ;;  %s364_s3 = inlined_call_operand.vmem [shape: bf16[16,32], index: 3, kind: output, shape index: {}]  }
   0x1 LB: > { %s270_s13 = sadd.s32 4294967295, %s310_s12   ;;  %p274_p0 = scmp.ge.s32.totalorder %s310_s12, 1  ;;  %s310_s12 = sphi %s332_s12, %s13_s12  }
   0x2   : > { %p136_p1 = scmp.lt.s32.totalorder %s310_s12, 3 }
   0x4   : > { %p137_p2 = pnand %p274_p0, %p136_p1 }
   0x5   : > { %p158_p3 = scmp.lt.s32.totalorder (!%p137_p2), %s270_s13, 1 }
   0x6   : > { %140 = sbr.rel (%p137_p2) target bundleno = 157 (0x9d), region = 32 }
   0xb   : > { %v294_v0 = vld [vmem:[%s362_s1 + $0x10] sm:$0xff]  ;;  %v293_v1 = vld [vmem:[%s362_s1 + $0x8] sm:$0xff]  ;;  %s366_s13 = smov (!%p158_p3, %s270_s13), 1  ;;  %v292_v2 = vld [vmem:[%s362_s1] sm:$0xff]  ;;  %vm197_vm0 = vcmask 392192   ;;  %vm215_vm1 = vcmask 257024  }
   0xc   : > { %206 = vmatpush.bf16.msra.mxu0 %v294_v0  ;;  %s275_s18 = sshll.u32 %s366_s13, 3  ;;  %v303_v5 = vld [vmem:[%s363_s2] ss:$0 sm:$0xff]  ;;  %s276_s26 = sshll.u32 %s366_s13, 2 }
   0xd   : > { %s161_s21 = scalar_lea.vmem %s361_s0, %s275_s18  ;;  %s165_s29 = scalar_lea.vmem %s364_s3, %s276_s26 }
   0xe   : > { %v167_v3 = vld [vmem:[%s161_s21] sm:$0xff] }
   0xf   : > { %v168_v4 = vpack.c.bf16 %v167_v3, %v167_v3 }
  0x10   : > { %207 = vmatpush.bf16.msra.mxu0 %v293_v1 }
  0x14   : > { %208 = vmatpush.bf16.msra.mxu0 %v292_v2 }
  0x17   : > { %289 = vmatmul.msk.bf16.vlgmr.msra.gmra.mxu0 %vm197_vm0, %v168_v4 }
  0x94   : > { %v210_v6 = vpop.f32.mrf.mxu0 }
  0x95   : > { %v211_v7 = vadd.f32 %v303_v5, %v210_v6 }
  0x97   : > { %v214_v8 = vpack.c.bf16 %v211_v7, %v211_v7 }
  0x99   : > { %216 = vst.msk [vmem:[%s165_s29] sm:$0xf] %vm215_vm1, %v214_v8 }
  0x9c   : > { %v212_v9 = vpop.f32.mrf.mxu0 }
  0x9d PF: > { %s13_s12 = sadd.s32 1, %s310_s12  }
  0x9e   : > { %p10_p4 = scmp.ge.s32.totalorder %s13_s12, 4  }
  0xa0   :  { %12 = sbr.rel (!%p10_p4) target bundleno = 1 (0x1), region = 62 }

// kernel: kgmodel_v1_forward.10
= control target key start
LH: loop header
LB: loop body
LE: loop exit
PB: predicated region body
PF: predicated region fallthrough
CT: control target
= control target key end

     0   :  { %s1303_s27 = smov 0   ;;  %s1501_s0 = inlined_call_operand.vmem [shape: bf16[16,768], index: 0, kind: input, shape index: {}]   ;;  %s1502_s1 = inlined_call_operand.vmem [shape: bf16[768,32], index: 1, kind: input, shape index: {}]   ;;  %s1503_s2 = inlined_call_operand.vmem [shape: f32[1,32], index: 2, kind: input, shape index: {}]   ;;  %s1504_s3 = inlined_call_operand.vmem [shape: bf16[32,32], index: 3, kind: input, shape index: {}]   ;;  %s1505_s4 = inlined_call_operand.vmem [shape: f32[1,32], index: 4, kind: input, shape index: {}]   ;;  %s1506_s5 = inlined_call_operand.vmem [shape: bf16[32,32], index: 5, kind: input, shape index: {}]   ;;  %s1507_s6 = inlined_call_operand.vmem [shape: f32[1,32], index: 6, kind: input, shape index: {}]   ;;  %s1508_s7 = inlined_call_operand.vmem [shape: bf16[16,32], index: 7, kind: output, shape index: {0}]   ;;  %s1509_s8 = inlined_call_operand.vmem [shape: bf16[16,32], index: 8, kind: output, shape index: {1}]  }
   0x1 LB: > { %s966_s28 = sadd.s32 4294967295, %s1256_s27   ;;  %p970_p0 = scmp.ge.s32.totalorder %s1256_s27, 1  ;;  %s1256_s27 = sphi %s1303_s27, %s19_s27  }
   0x2   : > { %p265_p1 = scmp.lt.s32.totalorder %s1256_s27, 3 }
   0x4   : > { %p266_p2 = pnand %p970_p0, %p265_p1 }
   0x5   : > { %p302_p3 = scmp.lt.s32.totalorder (!%p266_p2), %s966_s28, 1 }
   0x6   : > { %269 = sbr.rel (%p266_p2) target bundleno = 347 (0x15b), region = 48 }
   0xb   : > { %v1193_v0 = vld [vmem:[%s1502_s1 + $0x38] sm:$0xff]  ;;  %v1192_v2 = vld [vmem:[%s1502_s1 + $0x30] sm:$0xff]  ;;  %v1191_v8 = vld [vmem:[%s1502_s1 + $0x28] sm:$0xff]  ;;  %s1511_s28 = smov (!%p302_p3, %s966_s28), 1  ;;  %vm827_vm0 = vcmask 261120   ;;  %vm845_vm1 = vcmask 257024  }
   0xc   : > { %v1201_v1 = vld [vmem:[%s1502_s1 + $0x78] sm:$0xff]  ;;  %728 = vmatpush.bf16.msra.mxu0 %v1193_v0  ;;  %v1200_v3 = vld [vmem:[%s1502_s1 + $0x70] sm:$0xff]  ;;  %v1199_v9 = vld [vmem:[%s1502_s1 + $0x68] sm:$0xff]  ;;  %s1238_s23 = smul.u32 24, %s1511_s28 }
   0xd   : > { %741 = vmatpush.bf16.msra.mxu1 %v1201_v1  ;;  %v1209_v4 = vld [vmem:[%s1502_s1 + $0xb8] sm:$0xff]  ;;  %v1208_v6 = vld [vmem:[%s1502_s1 + $0xb0] sm:$0xff]  ;;  %v1207_v10 = vld [vmem:[%s1502_s1 + $0xa8] sm:$0xff] }
   0xe   : > { %v1217_v5 = vld [vmem:[%s1502_s1 + $0xf8] sm:$0xff]  ;;  %754 = vmatpush.bf16.msra.mxu2 %v1209_v4  ;;  %v1216_v7 = vld [vmem:[%s1502_s1 + $0xf0] sm:$0xff]  ;;  %v1215_v11 = vld [vmem:[%s1502_s1 + $0xe8] sm:$0xff]  ;;  %s1387_s14 = scalar_lea.vmem %s1501_s0, %s1238_s23  ;;  %s972_s23 = sshll.u32 %s1511_s28, 2 }
   0xf   : > { %767 = vmatpush.bf16.msra.mxu3 %v1217_v5  ;;  %v1190_v12 = vld [vmem:[%s1502_s1 + $0x20] sm:$0xff]  ;;  %v1189_v16 = vld [vmem:[%s1502_s1 + $0x18] sm:$0xff]  ;;  %v1188_v20 = vld [vmem:[%s1502_s1 + $0x10] sm:$0xff]  ;;  %s310_s26 = scalar_lea.vmem %s1508_s7, %s972_s23  ;;  %s314_s9 = scalar_lea.vmem %s1509_s8, %s972_s23 }
  0x10   : > { %729 = vmatpush.bf16.msra.mxu0 %v1192_v2  ;;  %v1198_v13 = vld [vmem:[%s1502_s1 + $0x60] sm:$0xff]  ;;  %v1197_v17 = vld [vmem:[%s1502_s1 + $0x58] sm:$0xff]  ;;  %v1196_v21 = vld [vmem:[%s1502_s1 + $0x50] sm:$0xff] }
  0x11   : > { %742 = vmatpush.bf16.msra.mxu1 %v1200_v3  ;;  %v1206_v14 = vld [vmem:[%s1502_s1 + $0xa0] sm:$0xff]  ;;  %v1205_v18 = vld [vmem:[%s1502_s1 + $0x98] sm:$0xff]  ;;  %v1204_v22 = vld [vmem:[%s1502_s1 + $0x90] sm:$0xff] }
  0x12   : > { %755 = vmatpush.bf16.msra.mxu2 %v1208_v6  ;;  %v1214_v15 = vld [vmem:[%s1502_s1 + $0xe0] sm:$0xff]  ;;  %v1213_v19 = vld [vmem:[%s1502_s1 + $0xd8] sm:$0xff]  ;;  %v1212_v23 = vld [vmem:[%s1502_s1 + $0xd0] sm:$0xff] }
  0x13   : > { %768 = vmatpush.bf16.msra.mxu3 %v1216_v7  ;;  %v1187_v24 = vld [vmem:[%s1502_s1 + $0x8] sm:$0xff]  ;;  %v316_v26 = vld [vmem:[%s1387_s14] sm:$0xff]  ;;  %v1225_v34 = vld [vmem:[%s1502_s1 + $0x138] sm:$0xff] }
  0x14   : > { %730 = vmatpush.bf16.msra.mxu0 %v1191_v8  ;;  %v1195_v25 = vld [vmem:[%s1502_s1 + $0x48] sm:$0xff]  ;;  %v422_v28 = vunpack.c.l.b16 %v316_v26  ;;  %v423_v30 = vunpack.c.h.b16 %v316_v26  ;;  %v1186_v32 = vld [vmem:[%s1502_s1] sm:$0xff]  ;;  %v1233_v35 = vld [vmem:[%s1502_s1 + $0x178] sm:$0xff] }
  0x15   : > { %743 = vmatpush.bf16.msra.mxu1 %v1199_v9  ;;  %v1203_v27 = vld [vmem:[%s1502_s1 + $0x88] sm:$0xff]  ;;  %v1194_v33 = vld [vmem:[%s1502_s1 + $0x40] sm:$0xff]  ;;  %v1224_v42 = vld [vmem:[%s1502_s1 + $0x130] sm:$0xff] }
  0x16   : > { %756 = vmatpush.bf16.msra.mxu2 %v1207_v10  ;;  %v1211_v29 = vld [vmem:[%s1502_s1 + $0xc8] sm:$0xff]  ;;  %v1202_v36 = vld [vmem:[%s1502_s1 + $0x80] sm:$0xff]  ;;  %v428_v38 = vpack.c.b16 %v422_v28, %v422_v28  ;;  %v429_v39 = vpack.c.b16 %v423_v30, %v423_v30  ;;  %v1232_v43 = vld [vmem:[%s1502_s1 + $0x170] sm:$0xff] }
  0x17   : > { %769 = vmatpush.bf16.msra.mxu3 %v1215_v11  ;;  %v317_v31 = vld [vmem:[%s1387_s14 + $0x8] sm:$0xff]  ;;  %v1210_v41 = vld [vmem:[%s1502_s1 + $0xc0] sm:$0xff]  ;;  %v1221_v50 = vld [vmem:[%s1502_s1 + $0x118] sm:$0xff] }
  0x18   : > { %731 = vmatpush.bf16.msra.mxu0 %v1190_v12  ;;  %v424_v37 = vunpack.c.l.b16 %v317_v31  ;;  %v425_v40 = vunpack.c.h.b16 %v317_v31  ;;  %v1223_v46 = vld [vmem:[%s1502_s1 + $0x128] sm:$0xff]  ;;  %v1222_v48 = vld [vmem:[%s1502_s1 + $0x120] sm:$0xff]  ;;  %v1229_v51 = vld [vmem:[%s1502_s1 + $0x158] sm:$0xff] }
  0x19   : > { %744 = vmatpush.bf16.msra.mxu1 %v1198_v13  ;;  %v1231_v47 = vld [vmem:[%s1502_s1 + $0x168] sm:$0xff]  ;;  %v1230_v49 = vld [vmem:[%s1502_s1 + $0x160] sm:$0xff]  ;;  %v1220_v52 = vld [vmem:[%s1502_s1 + $0x110] sm:$0xff] }
  0x1a   : > { %757 = vmatpush.bf16.msra.mxu2 %v1206_v14  ;;  %v430_v44 = vpack.c.b16 %v424_v37, %v424_v37  ;;  %v431_v45 = vpack.c.b16 %v425_v40, %v425_v40  ;;  %v1228_v53 = vld [vmem:[%s1502_s1 + $0x150] sm:$0xff]  ;;  %v1219_v54 = vld [vmem:[%s1502_s1 + $0x108] sm:$0xff]  ;;  %v1218_v59 = vld [vmem:[%s1502_s1 + $0x100] sm:$0xff] }
  0x1b   : > { %770 = vmatpush.bf16.msra.mxu3 %v1214_v15  ;;  %v1227_v55 = vld [vmem:[%s1502_s1 + $0x148] sm:$0xff]  ;;  %v318_v56 = vld [vmem:[%s1387_s14 + $0x10] sm:$0xff]  ;;  %v1226_v60 = vld [vmem:[%s1502_s1 + $0x140] sm:$0xff] }
  0x1c   : > { %732 = vmatpush.bf16.msra.mxu0 %v1189_v16  ;;  %v426_v57 = vunpack.c.l.b16 %v318_v56  ;;  %v427_v58 = vunpack.c.h.b16 %v318_v56  ;;  %v1235_v63 = vld [vmem:[%s1504_s3 + $0x8] sm:$0xff]  ;;  %v1234_v1 = vld [vmem:[%s1504_s3] sm:$0xff] }
  0x1d   : > { %745 = vmatpush.bf16.msra.mxu1 %v1197_v17  ;;  %v1237_v0 = vld [vmem:[%s1506_s5 + $0x8] sm:$0xff]  ;;  %v1236_v2 = vld [vmem:[%s1506_s5] sm:$0xff] }
  0x1e   : > { %758 = vmatpush.bf16.msra.mxu2 %v1205_v18  ;;  %v432_v61 = vpack.c.b16 %v426_v57, %v426_v57  ;;  %v433_v62 = vpack.c.b16 %v427_v58, %v427_v58  ;;  %v1247_v9 = vld [vmem:[%s1503_s2] ss:$0 sm:$0xff] }
  0x1f   : > { %771 = vmatpush.bf16.msra.mxu3 %v1213_v19 }
  0x20   : > { %733 = vmatpush.bf16.msra.mxu0 %v1188_v20 }
  0x21   : > { %746 = vmatpush.bf16.msra.mxu1 %v1196_v21 }
  0x22   : > { %759 = vmatpush.bf16.msra.mxu2 %v1204_v22 }
  0x23   : > { %772 = vmatpush.bf16.msra.mxu3 %v1212_v23  ;;  %v1248_v23 = vld [vmem:[%s1505_s4] ss:$0 sm:$0xff] }
  0x24   : > { %734 = vmatpush.bf16.msra.mxu0 %v1187_v24  ;;  %v1249_v24 = vld [vmem:[%s1507_s6] ss:$0 sm:$0xff] }
  0x25   : > { %747 = vmatpush.bf16.msra.mxu1 %v1195_v25 }
  0x26   : > { %760 = vmatpush.bf16.msra.mxu2 %v1203_v27 }
  0x27   : > { %773 = vmatpush.bf16.msra.mxu3 %v1211_v29 }
  0x28   : > { %735 = vmatpush.bf16.msra.mxu0 %v1186_v32 }
  0x29   : > { %748 = vmatpush.bf16.msra.mxu1 %v1194_v33 }
  0x2a   : > { %761 = vmatpush.bf16.msra.mxu2 %v1202_v36 }
  0x2b   : > { %736 = vmatmul.bf16.vlgmr.msra.gmra.mxu0 %v428_v38  ;;  %774 = vmatpush.bf16.msra.mxu3 %v1210_v41 }
  0x2c   : > { %780 = vmatpush.bf16.msrb.mxu0 %v1225_v34  ;;  %749 = vmatmul.bf16.vlgmr.msra.gmra.mxu1 %v429_v39 }
  0x2d   : > { %793 = vmatpush.bf16.msrb.mxu1 %v1233_v35  ;;  %762 = vmatmul.bf16.vlgmr.msra.gmra.mxu2 %v430_v44 }
  0x2e   : > { %775 = vmatmul.bf16.vlgmr.msra.gmra.mxu3 %v431_v45  ;;  %837 = vmatpush.bf16.msrb.mxu2 %v1235_v63 }
  0x2f   : > { %873 = vmatpush.bf16.msrb.mxu3 %v1237_v0 }
  0x30   : > { %781 = vmatpush.bf16.msrb.mxu0 %v1224_v42 }
  0x31   : > { %794 = vmatpush.bf16.msrb.mxu1 %v1232_v43 }
  0x32   : > { %838 = vmatpush.bf16.msrb.mxu2 %v1234_v1 }
  0x33   : > { %874 = vmatpush.bf16.msrb.mxu3 %v1236_v2 }
  0x34   : > { %782 = vmatpush.bf16.msrb.mxu0 %v1223_v46 }
  0x35   : > { %795 = vmatpush.bf16.msrb.mxu1 %v1231_v47 }
  0x38   : > { %783 = vmatpush.bf16.msrb.mxu0 %v1222_v48 }
  0x39   : > { %796 = vmatpush.bf16.msrb.mxu1 %v1230_v49 }
  0x3c   : > { %784 = vmatpush.bf16.msrb.mxu0 %v1221_v50 }
  0x3d   : > { %797 = vmatpush.bf16.msrb.mxu1 %v1229_v51 }
  0x40   : > { %785 = vmatpush.bf16.msrb.mxu0 %v1220_v52 }
  0x41   : > { %798 = vmatpush.bf16.msrb.mxu1 %v1228_v53 }
  0x44   : > { %786 = vmatpush.bf16.msrb.mxu0 %v1219_v54 }
  0x45   : > { %799 = vmatpush.bf16.msrb.mxu1 %v1227_v55 }
  0x48   : > { %787 = vmatpush.bf16.msrb.mxu0 %v1218_v59 }
  0x49   : > { %800 = vmatpush.bf16.msrb.mxu1 %v1226_v60 }
  0x4b   : > { %788 = vmatmul.bf16.vlgmr.msrb.gmra.mxu0 %v432_v61 }
  0x4c   : > { %801 = vmatmul.bf16.vlgmr.msrb.gmra.mxu1 %v433_v62 }
  0xa8   : > { %v737_v3 = vpop.f32.mrf.mxu0 }
  0xa9   : > { %v750_v4 = vpop.f32.mrf.mxu1  ;;  %v738_v10 = vadd.f32 %v1247_v9, %v737_v3 }
  0xab   : > { %v751_v13 = vadd.f32 %v750_v4, %v738_v10 }
  0xb0   : > { %v739_v5 = vpop.f32.mrf.mxu0  ;;  %v763_v7 = vpop.f32.mrf.mxu2 }
  0xb1   : > { %v752_v6 = vpop.f32.mrf.mxu1  ;;  %v776_v8 = vpop.f32.mrf.mxu3  ;;  %v764_v14 = vadd.f32 %v763_v7, %v751_v13 }
  0xb3   : > { %v777_v15 = vadd.f32 %v776_v8, %v764_v14 }
  0xb8   : > { %v765_v11 = vpop.f32.mrf.mxu2 }
  0xb9   : > { %v778_v12 = vpop.f32.mrf.mxu3 }
  0xc8   : > { %v789_v16 = vpop.f32.mrf.mxu0 }
  0xc9   : > { %v802_v17 = vpop.f32.mrf.mxu1  ;;  %v790_v18 = vadd.f32 %v789_v16, %v777_v15 }
  0xcb   : > { %v803_v19 = vadd.f32 %v802_v17, %v790_v18 }
  0xcd   : > { %v806_v20 = vpack.c.bf16 %v803_v19, %v803_v19 }
  0xcf   : > { %1174 = vmatmul.msk.bf16.vlgmr.msrb.gmra.mxu2 %vm827_vm0, %v806_v20  ;;  %1183 = vmatmul.msk.bf16.vlgmr.msrb.gmra.mxu3 %vm827_vm0, %v806_v20 }
  0xd0   : > { %v791_v21 = vpop.f32.mrf.mxu0 }
  0xd1   : > { %v804_v22 = vpop.f32.mrf.mxu1 }
 0x152   : > { %v840_v25 = vpop.f32.mrf.mxu2  ;;  %v876_v26 = vpop.f32.mrf.mxu3 }
 0x153   : > { %v841_v27 = vadd.f32 %v1248_v23, %v840_v25  ;;  %v877_v28 = vadd.f32 %v1249_v24, %v876_v26 }
 0x155   : > { %v844_v29 = vpack.c.bf16 %v841_v27, %v841_v27  ;;  %v880_v30 = vpack.c.bf16 %v877_v28, %v877_v28 }
 0x157   : > { %846 = vst.msk [vmem:[%s310_s26] sm:$0xf] %vm845_vm1, %v844_v29 }
 0x158   : > { %881 = vst.msk [vmem:[%s314_s9] sm:$0xf] %vm845_vm1, %v880_v30 }
 0x15a   : > { %v842_v31 = vpop.f32.mrf.mxu2  ;;  %v878_v32 = vpop.f32.mrf.mxu3 }
 0x15b PF: > { %s19_s27 = sadd.s32 1, %s1256_s27  }
 0x15c   : > { %p16_p4 = scmp.ge.s32.totalorder %s19_s27, 4  }
 0x15e   :  { %18 = sbr.rel (!%p16_p4) target bundleno = 1 (0x1), region = 90 }

// kernel: kgmodel_v1_forward.11
= control target key start
LH: loop header
LB: loop body
LE: loop exit
PB: predicated region body
PF: predicated region fallthrough
CT: control target
= control target key end

     0   :  { %s1767_s18 = smov 0   ;;  %s2069_s0 = inlined_call_operand.vmem [shape: bf16[2,8,32], index: 0, kind: input, shape index: {}]   ;;  %s2070_s1 = inlined_call_operand.vmem [shape: bf16[2,8,32], index: 1, kind: input, shape index: {}]   ;;  %s2071_s2 = inlined_call_operand.vmem [shape: bf16[2,8,32], index: 2, kind: input, shape index: {}]   ;;  %s2072_s3 = inlined_call_operand.vmem [shape: bf16[32,32], index: 3, kind: input, shape index: {}]   ;;  %s2073_s4 = inlined_call_operand.vmem [shape: f32[1,32], index: 4, kind: input, shape index: {}]   ;;  %s2074_s5 = inlined_call_operand.vmem [shape: bf16[32,32], index: 5, kind: input, shape index: {}]   ;;  %s2075_s6 = inlined_call_operand.vmem [shape: f32[1,32], index: 6, kind: input, shape index: {}]   ;;  %s2076_s7 = inlined_call_operand.vmem [shape: bf16[32,64], index: 7, kind: input, shape index: {}]   ;;  %s2077_s8 = inlined_call_operand.vmem [shape: f32[1,64], index: 8, kind: input, shape index: {}]   ;;  %s2078_s9 = inlined_call_operand.vmem [shape: bf16[64,32], index: 9, kind: input, shape index: {}]   ;;  %s2079_s10 = inlined_call_operand.vmem [shape: f32[1,32], index: 10, kind: input, shape index: {}]   ;;  %s2080_s11 = inlined_call_operand.vmem [shape: f32[1,32], index: 11, kind: input, shape index: {}, may-alias: {11,13}]   ;;  %s2081_s12 = inlined_call_operand.vmem [shape: f32[1,32], index: 12, kind: input, shape index: {}, may-alias: {12,14}]   ;;  %s2082_s13 = inlined_call_operand.vmem [shape: f32[1,32], index: 13, kind: input, shape index: {}, may-alias: {11,13}]   ;;  %s2083_s14 = inlined_call_operand.vmem [shape: f32[1,32], index: 14, kind: input, shape index: {}, may-alias: {12,14}]   ;;  %s2084_s15 = inlined_call_operand.vmem [shape: bf16[2,8,32], index: 15, kind: output, shape index: {}]  }
   0x1 LB: > { %s1550_s19 = sadd.s32 4294967295, %s1676_s18   ;;  %p1554_p0 = scmp.ge.s32.totalorder %s1676_s18, 1  ;;  %s1676_s18 = sphi %s1767_s18, %s25_s18  }
   0x2   : > { %p454_p1 = scmp.lt.s32.totalorder %s1676_s18, 3 }
   0x4   : > { %p455_p2 = pnand %p1554_p0, %p454_p1 }
   0x5   : > { %p508_p3 = scmp.lt.s32.totalorder (!%p455_p2), %s1550_s19, 1  ;;  %s1679_s16 = smov (!%p455_p2), 120  }
   0x6   : > { %458 = sbr.rel (%p455_p2) target bundleno = 1904 (0x770), region = 80  ;;  %s1680_s17 = smov (!%p455_p2), 104  }
   0xb   : > { %s2086_s19 = smov (!%p508_p3, %s1550_s19), 1  ;;  %vm557_vm0 = vcmask 261120   ;;  %v1678_v3 = vmov 32.0   ;;  %v1614_v15 = vld [vmem:[%s2072_s3 + $0x8] sm:$0xff]  ;;  %v1613_v16 = vld [vmem:[%s2072_s3] sm:$0xff]  ;;  %vm638_vm5 = vcmask 1047556  }
   0xc   : > { %s1775_s20 = sshll.u32 %s2086_s19, 2  ;;  %1648 = vrcp.f32 %v1678_v3  ;;  %620 = vmatpush.bf16.msra.mxu0 %v1614_v15  ;;  %s1681_s19 = smov 112   ;;  %v1640_v27 = vld [vmem:[%s2080_s11] ss:$0 sm:$0xff]  ;;  %v1682_v39 = vmov 1983009808  }
   0xd   : > { %s511_s23 = scalar_lea.vmem %s2069_s0, %s1775_s20  ;;  %s515_s30 = scalar_lea.vmem %s2070_s1, %s1775_s20  ;;  %v1641_v30 = vld [vmem:[%s2081_s12] ss:$0 sm:$0xff]  ;;  %v643_v40 = vunpack.c.l.s4 %v1682_v39  ;;  %v1683_v54 = vmov 1934713408   ;;  %vm995_vm6 = vcmask 64512   ;;  %vm1127_vm7 = vcmask 1043456  }
   0xe   : > { %v525_v0 = vld [vmem:[%s511_s23] sm:$0xf]  ;;  %v667_v55 = vunpack.c.l.s4 %v1683_v54  ;;  %s519_s29 = scalar_lea.vmem %s2071_s2, %s1775_s20  ;;  %vm1324_vm8 = vcmask 130048   ;;  %vm1326_vm9 = vcmask 195584   ;;  %vm1452_vm13 = vcmask 523264   ;;  %s523_s22 = scalar_lea.vmem %s2084_s15, %s1775_s20 }
   0xf   : > { %v1781_v1 = vunpack.c.l.bf16 %v525_v0  ;;  %v527_v17 = vld [vmem:[%s515_s30] sm:$0xf]  ;;  %v1822_v44 = vunpack.c.0.s8 %v643_v40  ;;  %s1684_s30 = smov 16   ;;  %vm1471_vm14 = vcmask 257024  }
  0x10   : > { %621 = vmatpush.bf16.msra.mxu0 %v1613_v16  ;;  %753 = vrot.lane.b32.xlu1 %v527_v17, %s1679_s16  ;;  %v1642_v34 = vld [vmem:[%s2073_s4] ss:$0 sm:$0xff]  ;;  %v762_v41 = vshrl.u32 %v527_v17, 16  ;;  %v1828_v60 = vunpack.c.0.s8 %v667_v55 }
  0x11   : > { %v558_v2 = vsel %vm557_vm0, %v1781_v1, 0.0  ;;  %757 = vrot.lane.b32.xlu2 %v527_v17, %s1680_s17 }
  0x12   : > { %559 = vadd.xlane.f32.xlu0 %v558_v2  ;;  %v1649_v4 = vpop.eup %1648 }
  0x13   : > { %v562_v5 = vmul.f32 32.0, %v1649_v4  ;;  %vm566_vm1 = vweird.f32 %v1649_v4 }
  0x15   : > { %v563_v6 = vsub.f32 1.0, %v562_v5 }
  0x17   : > { %v564_v7 = vmul.f32 %v1649_v4, %v563_v6 }
  0x18   : > { %755 = vrot.lane.b32.xlu1 %v527_v17, %s1681_s19 }
  0x19   : > { %v565_v8 = vadd.f32 %v1649_v4, %v564_v7 }
  0x1b   : > { %v1785_v9 = vsel %vm566_vm1, %v1649_v4, %v565_v8 }
  0x6b   : > { %v758_v46 = vpop.permute.xlu2 %757 }
  0x6c   : > { %v769_v48 = vshrl.u32 %v758_v46, 16 }
  0x82   : > { %v754_v38 = vpop.permute.xlu1 %753 }
  0x83   : > { %v763_v42 = vshrl.u32 %v754_v38, 16  ;;  %v761_v45 = vpack.i.b16 %v754_v38, %v527_v17 }
  0x85   : > { %v560_v10 = vpop.xlane.xlu0 %559  ;;  %v764_v47 = vpack.i.b16 %v763_v42, %v762_v41  ;;  %v775_v50 = vperm.slane %v761_v45, %v1822_v44 }
  0x86   : > { %v568_v11 = vmul.f32 %v1785_v9, %v560_v10 }
  0x87   : > { %v802_v52 = vperm.slane %v764_v47, %v1822_v44  ;;  %v784_v56 = vrot.slane %v775_v50, 4 }
  0x88   : > { %v569_v12 = vsub.f32 %v1781_v1, %v568_v11 }
  0x89   : > { %v810_v58 = vrot.slane %v802_v52, 4 }
  0x8a   : > { %v570_v13 = vmul.f32 %v569_v12, %v569_v12  ;;  %v756_v43 = vpop.permute.xlu1 %755 }
  0x8b   : > { %v768_v49 = vshrl.u32 %v756_v43, 16  ;;  %v767_v51 = vpack.i.b16 %v758_v46, %v756_v43 }
  0x8c   : > { %v571_v14 = vsel %vm557_vm0, %v570_v13, 0.0 }
  0x8d   : > { %572 = vadd.xlane.f32.xlu0 %v571_v14  ;;  %v770_v53 = vpack.i.b16 %v769_v48, %v768_v49  ;;  %v780_v57 = vperm.slane %v767_v51, %v1822_v44 }
  0x8f   : > { %v807_v59 = vperm.slane %v770_v53, %v1822_v44  ;;  %v781_v61 = vrot.slane %v780_v57, 4  ;;  %v785_v62 = vsel %vm638_vm5, %v780_v57, %v784_v56 }
  0x90   : > { %v793_v0 = vperm.slane %v785_v62, %v1828_v60 }
  0x91   : > { %v811_v63 = vsel %vm638_vm5, %v807_v59, %v810_v58  ;;  %v808_v2 = vrot.slane %v807_v59, 4  ;;  %v783_v3 = vsel %vm638_vm5, %v781_v61, %v775_v50 }
  0x92   : > { %v819_v4 = vperm.slane %v811_v63, %v1828_v60  ;;  %v789_v5 = vperm.slane %v783_v3, %v1828_v60  ;;  %v796_v6 = vrot.slane %v793_v0, 4 }
  0x93   : > { %v809_v7 = vsel %vm638_vm5, %v808_v2, %v802_v52 }
  0x94   : > { %v822_v8 = vrot.slane %v819_v4, 4  ;;  %v815_v10 = vperm.slane %v809_v7, %v1828_v60  ;;  %v794_v11 = vrot.slane %v789_v5, 4 }
  0x96   : > { %v823_v13 = vsel %vm638_vm5, 0, %v822_v8  ;;  %v820_v14 = vrot.slane %v815_v10, 4  ;;  %v795_v16 = vsel %vm638_vm5, 0, %v794_v11 }
  0x97   : > { %v848_v17 = vrot.slane %v823_v13, 4 }
 0x100   : > { %v573_v18 = vpop.xlane.xlu0 %572 }
 0x101   : > { %v574_v19 = vmul.f32 %v573_v18, %v1785_v9  ;;  %v821_v18 = vsel %vm638_vm5, 0, %v820_v14 }
 0x103   : > { %v575_v20 = vadd.f32 1e-06, %v574_v19  ;;  %v824_v19 = vsel %vm638_vm5, %v796_v6, %v789_v5 }
 0x105   : > { %1650 = vrsqrt.f32 %v575_v20  ;;  %vm582_vm3 = vweird.f32 %v575_v20 }
 0x10b   : > { %v1651_v21 = vpop.eup %1650 }
 0x10c   : > { %v577_v22 = vmul.f32 %v1651_v21, %v575_v20  ;;  %vm583_vm2 = vweird.f32 %v1651_v21 }
 0x10d   : > { %vm584_vm4 = vmor %vm582_vm3, %vm583_vm2 }
 0x10e   : > { %v578_v23 = vmul.f32 %v1651_v21, %v577_v22  ;;  %v828_v22 = vperm.slane %v824_v19, %v1822_v44 }
 0x110   : > { %v579_v24 = vmul.f32 0.5, %v578_v23 }
 0x112   : > { %v580_v25 = vsub.f32 1.5, %v579_v24  ;;  %v849_v24 = vsel %vm638_vm5, %v848_v17, %v821_v18 }
 0x114   : > { %v581_v26 = vmul.f32 %v1651_v21, %v580_v25 }
 0x116   : > { %v585_v28 = vsel %vm584_vm4, %v1651_v21, %v581_v26  ;;  %v843_v21 = vsel %vm638_vm5, %v822_v8, %v815_v10  ;;  %v853_v26 = vperm.slane %v849_v24, %v1822_v44 }
 0x117   : > { %v586_v29 = vmul.f32 %v585_v28, %v569_v12  ;;  %v797_v12 = vsel %vm638_vm5, 0, %v796_v6  ;;  %v847_v25 = vperm.slane %v843_v21, %v1822_v44 }
 0x118   : > { %v829_v15 = vrot.slane %v797_v12, 4  ;;  %v854_v28 = vrot.slane %v853_v26, 4 }
 0x119   : > { %v590_v31 = vmul.f32 %v1640_v27, %v586_v29 }
 0x11a   : > { %v830_v20 = vsel %vm638_vm5, %v829_v15, %v795_v16 }
 0x11b   : > { %v594_v32 = vadd.f32 %v1641_v30, %v590_v31  ;;  %v834_v23 = vperm.slane %v830_v20, %v1822_v44  ;;  %v855_v31 = vsel %vm638_vm5, %v854_v28, %v847_v25 }
 0x11d   : > { %v595_v33 = vpack.c.bf16 %v594_v32, %v594_v32  ;;  %v835_v27 = vrot.slane %v834_v23, 4  ;;  %v859_v32 = vperm.slane %v855_v31, %v1828_v60 }
 0x11f   : > { %1567 = vmatmul.msk.bf16.vlgmr.msra.gmra.mxu0 %vm557_vm0, %v595_v33  ;;  %v836_v29 = vsel %vm638_vm5, %v835_v27, %v828_v22  ;;  %v860_v38 = vrot.slane %v859_v32, 4 }
 0x120   : > { %v840_v30 = vperm.slane %v836_v29, %v1828_v60 }
 0x121   : > { %v861_v42 = vsel %vm638_vm5, 0, %v860_v38 }
 0x122   : > { %v865_v33 = vshrl.u32 %v840_v30, 16  ;;  %v872_v46 = vshrl.u32 %v861_v42, 16 }
 0x19c   : > { %v623_v35 = vpop.f32.mrf.mxu0 }
 0x19d   : > { %v1814_v36 = vadd.f32 %v1642_v34, %v623_v35  ;;  %v841_v34 = vrot.slane %v840_v30, 4  ;;  %v864_v35 = vpack.i.b16 %v859_v32, %v840_v30 }
 0x19f   : > { %634 = vrot.lane.b32.xlu1 %v1814_v36, %s1680_s17  ;;  %631 = vrot.lane.b32.xlu0 %v1814_v36, %s1681_s19  ;;  %v842_v39 = vsel %vm638_vm5, 0, %v841_v34  ;;  %v1000_v40 = vsel %vm995_vm6, %v864_v35, 0  ;;  %v640_v53 = vrot.slane %v1814_v36, 4 }
 0x1a0   : > { %628 = vrot.lane.b32.xlu2 %v1814_v36, %s1679_s16  ;;  %v871_v43 = vshrl.u32 %v842_v39, 16  ;;  %1009 = vmatpush.bf16.xpose.msra.mxu1 %v1000_v40  ;;  %v870_v45 = vpack.i.b16 %v861_v42, %v842_v39 }
 0x1a2   : > { %v1038_v48 = vsel %vm995_vm6, %v870_v45, 0  ;;  %v873_v49 = vpack.i.b16 %v872_v46, %v871_v43 }
 0x1a3   : > { %1047 = vmatpush.bf16.xpose.msra.mxu3 %v1038_v48 }
 0x1a4   : > { %v625_v37 = vpop.f32.mrf.mxu0  ;;  %v1057_v50 = vsel %vm995_vm6, %v873_v49, 0 }
 0x1a5   : > { %v866_v37 = vshrl.u32 %v859_v32, 16  ;;  %1066 = vmatpush.bf16.xpose.msrb.mxu0 %v1057_v50 }
 0x1a7   : > { %v867_v41 = vpack.i.b16 %v866_v37, %v865_v33 }
 0x1a9   : > { %v1019_v47 = vsel %vm995_vm6, %v867_v41, 0 }
 0x1aa   : > { %1028 = vmatpush.bf16.xpose.msra.mxu2 %v1019_v47 }
 0x1fa   : > { %v629_v51 = vpop.permute.xlu2 %628 }
 0x1fb   : > { %v652_v52 = vrot.slane %v629_v51, 4 }
 0x211   : > { %v635_v54 = vpop.permute.xlu1 %634  ;;  %v632_v55 = vpop.permute.xlu0 %631 }
 0x212   : > { %v650_v56 = vrot.slane %v635_v54, 4  ;;  %v653_v57 = vsel %vm638_vm5, %v635_v54, %v652_v52  ;;  %v637_v58 = vrot.slane %v632_v55, 4  ;;  %v641_v59 = vsel %vm638_vm5, %v632_v55, %v640_v53 }
 0x213   : > { %v661_v61 = vperm.slane %v653_v57, %v1822_v44  ;;  %v649_v62 = vperm.slane %v641_v59, %v1822_v44 }
 0x214   : > { %v651_v63 = vsel %vm638_vm5, %v650_v56, %v629_v51  ;;  %v639_v0 = vsel %vm638_vm5, %v637_v58, %v1814_v36 }
 0x215   : > { %v657_v2 = vperm.slane %v651_v63, %v1822_v44  ;;  %v674_v3 = vrot.slane %v661_v61, 4  ;;  %v645_v4 = vperm.slane %v639_v0, %v1822_v44  ;;  %v676_v5 = vrot.slane %v649_v62, 4 }
 0x217   : > { %v662_v6 = vrot.slane %v657_v2, 4  ;;  %v664_v7 = vrot.slane %v645_v4, 4  ;;  %v675_v8 = vsel %vm638_vm5, %v674_v3, %v649_v62  ;;  %v677_v10 = vsel %vm638_vm5, %v661_v61, %v676_v5 }
 0x218   : > { %v681_v11 = vperm.slane %v675_v8, %v1828_v60  ;;  %v685_v12 = vperm.slane %v677_v10, %v1828_v60 }
 0x219   : > { %v663_v13 = vsel %vm638_vm5, %v662_v6, %v645_v4  ;;  %v665_v36 = vsel %vm638_vm5, %v657_v2, %v664_v7 }
 0x21a   : > { %v669_v14 = vperm.slane %v663_v13, %v1828_v60  ;;  %v673_v15 = vperm.slane %v665_v36, %v1828_v60  ;;  %v690_v16 = vrot.slane %v681_v11, 4  ;;  %v692_v17 = vrot.slane %v685_v12, 4 }
 0x21c   : > { %v686_v18 = vrot.slane %v669_v14, 4  ;;  %v688_v19 = vrot.slane %v673_v15, 4  ;;  %v693_v20 = vsel %vm638_vm5, 0.0, %v692_v17  ;;  %v705_v21 = vsel %vm638_vm5, %v692_v17, %v681_v11 }
 0x21d   : > { %v710_v22 = vrot.slane %v693_v20, 4  ;;  %v691_v24 = vsel %vm638_vm5, 0.0, %v690_v16  ;;  %v709_v25 = vperm.slane %v705_v21, %v1822_v44 }
 0x21e   : > { %v689_v23 = vsel %vm638_vm5, 0.0, %v688_v19  ;;  %v694_v26 = vsel %vm638_vm5, %v688_v19, %v669_v14  ;;  %v687_v30 = vsel %vm638_vm5, 0.0, %v686_v18  ;;  %v528_v14 = vld [vmem:[%s519_s29] sm:$0xf] }
 0x21f   : > { %v699_v27 = vrot.slane %v689_v23, 4  ;;  %v711_v28 = vsel %vm638_vm5, %v710_v22, %v691_v24  ;;  %v698_v29 = vperm.slane %v694_v26, %v1822_v44  ;;  %v730_v32 = vrot.slane %v709_v25, 4 }
 0x220   : > { %v715_v31 = vperm.slane %v711_v28, %v1822_v44 }
 0x221   : > { %v700_v33 = vsel %vm638_vm5, %v699_v27, %v687_v30  ;;  %v718_v34 = vrot.slane %v698_v29, 4 }
 0x222   : > { %v704_v35 = vperm.slane %v700_v33, %v1822_v44  ;;  %v731_v37 = vsel %vm638_vm5, %v715_v31, %v730_v32  ;;  %v728_v38 = vrot.slane %v715_v31, 4 }
 0x223   : > { %v739_v39 = vperm.slane %v731_v37, %v1828_v60 }
 0x224   : > { %v719_v40 = vsel %vm638_vm5, %v704_v35, %v718_v34  ;;  %v716_v41 = vrot.slane %v704_v35, 4  ;;  %v729_v42 = vsel %vm638_vm5, %v728_v38, %v709_v25  ;;  %v884_v34 = vshrl.u32 %v528_v14, 16 }
 0x225   : > { %v727_v43 = vperm.slane %v719_v40, %v1828_v60  ;;  %v744_v45 = vrot.slane %v739_v39, 4  ;;  %v735_v46 = vperm.slane %v729_v42, %v1828_v60 }
 0x226   : > { %v717_v47 = vsel %vm638_vm5, %v716_v41, %v698_v29 }
 0x227   : > { %v745_v48 = vsel %vm638_vm5, %v744_v45, %v727_v43  ;;  %v746_v49 = vrot.slane %v727_v43, 4  ;;  %v723_v50 = vperm.slane %v717_v47, %v1828_v60  ;;  %v740_v51 = vrot.slane %v735_v46, 4 }
 0x228   : > { %v750_v52 = vpack.c.bf16 %v745_v48, %v745_v48 }
 0x229   : > { %v741_v53 = vsel %vm638_vm5, %v740_v51, %v723_v50  ;;  %v747_v54 = vsel %vm638_vm5, %v739_v39, %v746_v49  ;;  %v742_v55 = vrot.slane %v723_v50, 4 }
 0x22a   : > { %1570 = vmatmul.msk.bf16.vlgmr.msra.gmra.mxu3 %vm995_vm6, %v750_v52  ;;  %v748_v56 = vpack.c.bf16 %v741_v53, %v741_v53  ;;  %v751_v57 = vpack.c.bf16 %v747_v54, %v747_v54 }
 0x22b   : > { %v743_v58 = vsel %vm638_vm5, %v735_v46, %v742_v55 }
 0x22c   : > { %1568 = vmatmul.msk.bf16.vlgmr.msra.gmra.mxu1 %vm995_vm6, %v748_v56  ;;  %1571 = vmatmul.msk.bf16.vlgmr.msrb.gmra.mxu0 %vm995_vm6, %v751_v57  ;;  %v749_v59 = vpack.c.bf16 %v743_v58, %v743_v58 }
 0x22e   : > { %1569 = vmatmul.msk.bf16.vlgmr.msra.gmra.mxu2 %vm995_vm6, %v749_v59 }
 0x2a9   : > { %v1011_v61 = vpop.f32.mrf.mxu1  ;;  %v1068_v62 = vpop.f32.mrf.mxu0 }
 0x2aa   : > { %v1072_v63 = vmul.f32 0.35355338, %v1011_v61  ;;  %v1075_v0 = vmul.f32 0.35355338, %v1068_v62 }
 0x2ac   : > { %v1085_v2 = vsel %vm995_vm6, %v1075_v0, -inf  ;;  %v1076_v3 = vsel %vm995_vm6, %v1072_v63, -inf }
 0x2ad   : > { %1086 = vmax.xlane.f32.xlu2 %v1085_v2  ;;  %v1049_v4 = vpop.f32.mrf.mxu3  ;;  %1077 = vmax.xlane.f32.xlu0 %v1076_v3 }
 0x2ae   : > { %v1074_v5 = vmul.f32 0.35355338, %v1049_v4 }
 0x2b0   : > { %v1082_v11 = vsel %vm995_vm6, %v1074_v5, -inf }
 0x2b1   : > { %v1013_v6 = vpop.f32.mrf.mxu1  ;;  %v1030_v7 = vpop.f32.mrf.mxu2 }
 0x2b2   : > { %v1073_v8 = vmul.f32 0.35355338, %v1030_v7  ;;  %v1070_v10 = vpop.f32.mrf.mxu0 }
 0x2b4   : > { %v1079_v12 = vsel %vm995_vm6, %v1073_v8, -inf }
 0x2b5   : > { %1083 = vmax.xlane.f32.xlu2 %v1082_v11  ;;  %v1051_v13 = vpop.f32.mrf.mxu3  ;;  %1080 = vmax.xlane.f32.xlu1 %v1079_v12 }
 0x2b9   : > { %v1032_v36 = vpop.f32.mrf.mxu2 }
 0x2c1   : > { %879 = vrot.lane.b32.xlu0 %v528_v14, %s1680_s17  ;;  %s1686_s17 = smov 8  }
 0x2cd   : > { %875 = vrot.lane.b32.xlu2 %v528_v14, %s1679_s16  ;;  %s1685_s16 = smov 24  }
 0x2ce   : > { %877 = vrot.lane.b32.xlu1 %v528_v14, %s1681_s19 }
 0x320   : > { %v1087_v15 = vpop.xlane.xlu2 %1086  ;;  %v1078_v16 = vpop.xlane.xlu0 %1077 }
 0x321   : > { %v1088_v17 = vsub.f32 %v1072_v63, %v1078_v16  ;;  %v1091_v23 = vsub.f32 %v1075_v0, %v1087_v15 }
 0x323   : > { %v1092_v18 = vmul.f32 1.442695, %v1088_v17  ;;  %v1098_v28 = vmul.f32 1.442695, %v1091_v23 }
 0x325   : > { %1652 = vpow2.f32 %v1092_v18 }
 0x328   : > { %v1084_v19 = vpop.xlane.xlu2 %1083  ;;  %v1081_v20 = vpop.xlane.xlu1 %1080 }
 0x329   : > { %v1090_v21 = vsub.f32 %v1074_v5, %v1084_v19  ;;  %v1089_v22 = vsub.f32 %v1073_v8, %v1081_v20 }
 0x32b   : > { %v1096_v24 = vmul.f32 1.442695, %v1090_v21  ;;  %v1094_v25 = vmul.f32 1.442695, %v1089_v22  ;;  %v1917_v26 = vpop.eup %1652 }
 0x32c   : > { %v1100_v27 = vsel %vm995_vm6, %v1917_v26, 0.0 }
 0x32d   : > { %1654 = vpow2.f32 %v1096_v24  ;;  %1101 = vadd.xlane.f32.xlu0 %v1100_v27 }
 0x32e   : > { %1656 = vpow2.f32 %v1094_v25 }
 0x32f   : > { %1658 = vpow2.f32 %v1098_v28 }
 0x330   : > { %v876_v32 = vpop.permute.xlu2 %875 }
 0x331   : > { %v885_v35 = vshrl.u32 %v876_v32, 16  ;;  %v883_v38 = vpack.i.b16 %v876_v32, %v528_v14 }
 0x333   : > { %v1921_v29 = vpop.eup %1654  ;;  %v886_v39 = vpack.i.b16 %v885_v35, %v884_v34  ;;  %v880_v41 = vpop.permute.xlu0 %879  ;;  %v897_v42 = vperm.slane %v883_v38, %v1822_v44 }
 0x334   : > { %v1923_v30 = vpop.eup %1656  ;;  %v1106_v31 = vsel %vm995_vm6, %v1921_v29, 0.0  ;;  %v891_v45 = vshrl.u32 %v880_v41, 16 }
 0x335   : > { %1107 = vadd.xlane.f32.xlu2 %v1106_v31  ;;  %v1103_v33 = vsel %vm995_vm6, %v1923_v30, 0.0  ;;  %v1929_v37 = vpop.eup %1658  ;;  %v923_v43 = vperm.slane %v886_v39, %v1822_v44  ;;  %v905_v47 = vrot.slane %v897_v42, 4 }
 0x336   : > { %1104 = vadd.xlane.f32.xlu1 %v1103_v33  ;;  %v1109_v40 = vsel %vm995_vm6, %v1929_v37, 0.0 }
 0x337   : > { %v931_v50 = vrot.slane %v923_v43, 4 }
 0x33d   : > { %1110 = vadd.xlane.f32.xlu2 %v1109_v40 }
 0x340   : > { %v878_v46 = vpop.permute.xlu1 %877 }
 0x341   : > { %v890_v48 = vshrl.u32 %v878_v46, 16  ;;  %v889_v49 = vpack.i.b16 %v880_v41, %v878_v46 }
 0x343   : > { %v892_v51 = vpack.i.b16 %v891_v45, %v890_v48  ;;  %v902_v52 = vperm.slane %v889_v49, %v1822_v44 }
 0x345   : > { %v903_v53 = vrot.slane %v902_v52, 4  ;;  %v906_v54 = vsel %vm638_vm5, %v902_v52, %v905_v47  ;;  %v928_v55 = vperm.slane %v892_v51, %v1822_v44 }
 0x346   : > { %v914_v56 = vperm.slane %v906_v54, %v1828_v60 }
 0x347   : > { %v904_v57 = vsel %vm638_vm5, %v903_v53, %v897_v42  ;;  %v929_v58 = vrot.slane %v928_v55, 4  ;;  %v932_v59 = vsel %vm638_vm5, %v928_v55, %v931_v50 }
 0x348   : > { %v910_v61 = vperm.slane %v904_v57, %v1828_v60  ;;  %v917_v62 = vrot.slane %v914_v56, 4  ;;  %v940_v63 = vperm.slane %v932_v59, %v1828_v60 }
 0x349   : > { %v930_v0 = vsel %vm638_vm5, %v929_v58, %v923_v43 }
 0x34a   : > { %v915_v2 = vrot.slane %v910_v61, 4  ;;  %v918_v3 = vsel %vm638_vm5, 0, %v917_v62  ;;  %v936_v4 = vperm.slane %v930_v0, %v1828_v60  ;;  %v943_v5 = vrot.slane %v940_v63, 4 }
 0x34b   : > { %v950_v6 = vrot.slane %v918_v3, 4  ;;  %v945_v7 = vsel %vm638_vm5, %v917_v62, %v910_v61 }
 0x34c   : > { %v916_v8 = vsel %vm638_vm5, 0, %v915_v2  ;;  %v941_v10 = vrot.slane %v936_v4, 4  ;;  %v944_v11 = vsel %vm638_vm5, 0, %v943_v5  ;;  %v964_v36 = vsel %vm638_vm5, %v943_v5, %v936_v4 }
 0x34d   : > { %v969_v12 = vrot.slane %v944_v11, 4  ;;  %v951_v13 = vsel %vm638_vm5, %v950_v6, %v916_v8  ;;  %v949_v15 = vperm.slane %v945_v7, %v1822_v44  ;;  %v968_v19 = vperm.slane %v964_v36, %v1822_v44 }
 0x34e   : > { %v942_v14 = vsel %vm638_vm5, 0, %v941_v10  ;;  %v955_v16 = vperm.slane %v951_v13, %v1822_v44 }
 0x34f   : > { %v970_v17 = vsel %vm638_vm5, %v969_v12, %v942_v14 }
 0x350   : > { %v956_v18 = vrot.slane %v955_v16, 4  ;;  %v974_v20 = vperm.slane %v970_v17, %v1822_v44 }
 0x352   : > { %v957_v21 = vsel %vm638_vm5, %v956_v18, %v949_v15  ;;  %v975_v22 = vrot.slane %v974_v20, 4 }
 0x353   : > { %v961_v23 = vperm.slane %v957_v21, %v1828_v60 }
 0x354   : > { %v976_v24 = vsel %vm638_vm5, %v975_v22, %v968_v19 }
 0x355   : > { %v980_v25 = vperm.slane %v976_v24, %v1828_v60  ;;  %v986_v27 = vshrl.u32 %v961_v23, 16  ;;  %v962_v28 = vrot.slane %v961_v23, 4 }
 0x357   : > { %v985_v31 = vpack.i.b16 %v980_v25, %v961_v23  ;;  %v987_v32 = vshrl.u32 %v980_v25, 16  ;;  %v963_v33 = vsel %vm638_vm5, 0, %v962_v28  ;;  %v981_v34 = vrot.slane %v980_v25, 4 }
 0x358   : > { %v992_v35 = vshrl.u32 %v963_v33, 16 }
 0x359   : > { %v1129_v38 = vsel %vm1127_vm7, %v985_v31, 0  ;;  %v988_v39 = vpack.i.b16 %v987_v32, %v986_v27  ;;  %v982_v40 = vsel %vm638_vm5, 0, %v981_v34 }
 0x35a   : > { %1138 = vmatpush.bf16.msrb.mxu1 %v1129_v38  ;;  %v991_v41 = vpack.i.b16 %v982_v40, %v963_v33  ;;  %v993_v42 = vshrl.u32 %v982_v40, 16 }
 0x35b   : > { %v1148_v43 = vsel %vm1127_vm7, %v988_v39, 0 }
 0x35c   : > { %1157 = vmatpush.bf16.msrb.mxu2 %v1148_v43  ;;  %v1167_v45 = vsel %vm1127_vm7, %v991_v41, 0  ;;  %v994_v46 = vpack.i.b16 %v993_v42, %v992_v35 }
 0x35d   : > { %1176 = vmatpush.bf16.msrb.mxu3 %v1167_v45 }
 0x35e   : > { %v1186_v47 = vsel %vm1127_vm7, %v994_v46, 0 }
 0x35f   : > { %1195 = vmatpush.bf16.msra.mxu0 %v1186_v47 }
 0x3a0   : > { %v1102_v48 = vpop.xlane.xlu0 %1101 }
 0x3a1   : > { %1660 = vrcp.f32 %v1102_v48 }
 0x3a7   : > { %v1661_v49 = vpop.eup %1660 }
 0x3a8   : > { %v1108_v50 = vpop.xlane.xlu2 %1107  ;;  %v1116_v51 = vmul.f32 %v1661_v49, %v1917_v26 }
 0x3a9   : > { %1662 = vrcp.f32 %v1108_v50  ;;  %v1105_v52 = vpop.xlane.xlu1 %1104 }
 0x3aa   : > { %1664 = vrcp.f32 %v1105_v52  ;;  %v1120_v53 = vpack.c.bf16 %v1116_v51, %v1116_v51 }
 0x3ac   : > { %1572 = vmatmul.msk.bf16.vlgmr.msrb.gmra.mxu1 %vm995_vm6, %v1120_v53 }
 0x3af   : > { %v1663_v54 = vpop.eup %1662 }
 0x3b0   : > { %v1665_v55 = vpop.eup %1664  ;;  %v1118_v56 = vmul.f32 %v1663_v54, %v1921_v29  ;;  %v1111_v57 = vpop.xlane.xlu2 %1110 }
 0x3b1   : > { %v1117_v58 = vmul.f32 %v1665_v55, %v1923_v30  ;;  %1666 = vrcp.f32 %v1111_v57 }
 0x3b2   : > { %v1122_v59 = vpack.c.bf16 %v1118_v56, %v1118_v56 }
 0x3b3   : > { %v1121_v61 = vpack.c.bf16 %v1117_v58, %v1117_v58 }
 0x3b4   : > { %1574 = vmatmul.msk.bf16.vlgmr.msrb.gmra.mxu3 %vm995_vm6, %v1122_v59 }
 0x3b5   : > { %1573 = vmatmul.msk.bf16.vlgmr.msrb.gmra.mxu2 %vm995_vm6, %v1121_v61 }
 0x3b7   : > { %v1667_v26 = vpop.eup %1666 }
 0x3b8   : > { %v1119_v62 = vmul.f32 %v1667_v26, %v1929_v37 }
 0x3ba   : > { %v1123_v63 = vpack.c.bf16 %v1119_v62, %v1119_v62 }
 0x3bc   : > { %1575 = vmatmul.msk.bf16.vlgmr.msra.gmra.mxu0 %vm995_vm6, %v1123_v63 }
 0x429   : > { %v1140_v0 = vpop.f32.mrf.mxu1 }
 0x42a   : > { %v1203_v3 = vrot.slane %v1140_v0, 4 }
 0x431   : > { %v1142_v2 = vpop.f32.mrf.mxu1 }
 0x437   : > { %v1178_v29 = vpop.f32.mrf.mxu3 }
 0x438   : > { %v1159_v4 = vpop.f32.mrf.mxu2  ;;  %v1201_v5 = vrot.slane %v1178_v29, 4  ;;  %v1204_v30 = vsel %vm638_vm5, %v1178_v29, %v1203_v3 }
 0x439   : > { %v1215_v6 = vrot.slane %v1159_v4, 4  ;;  %v1212_v7 = vperm.slane %v1204_v30, %v1822_v44  ;;  %v1197_v8 = vpop.f32.mrf.mxu0 }
 0x43a   : > { %v1202_v10 = vsel %vm638_vm5, %v1201_v5, %v1140_v0  ;;  %v1213_v11 = vrot.slane %v1197_v8, 4 }
 0x43b   : > { %v1208_v37 = vperm.slane %v1202_v10, %v1822_v44  ;;  %v1239_v12 = vrot.slane %v1212_v7, 4  ;;  %v1216_v13 = vsel %vm638_vm5, %v1197_v8, %v1215_v6  ;;  %v1615_v8 = vld [vmem:[%s2074_s5] sm:$0xff] }
 0x43c   : > { %v1214_v36 = vsel %vm638_vm5, %v1213_v11, %v1159_v4  ;;  %v1224_v14 = vperm.slane %v1216_v13, %v1822_v44 }
 0x43d   : > { %v1227_v15 = vrot.slane %v1208_v37, 4  ;;  %v1220_v16 = vperm.slane %v1214_v36, %v1822_v44 }
 0x43e   : > { %v1237_v17 = vrot.slane %v1224_v14, 4  ;;  %v1240_v18 = vsel %vm638_vm5, %v1224_v14, %v1239_v12 }
 0x43f   : > { %v1225_v19 = vrot.slane %v1220_v16, 4  ;;  %v1228_v20 = vsel %vm638_vm5, %v1220_v16, %v1227_v15  ;;  %v1248_v21 = vperm.slane %v1240_v18, %v1828_v60  ;;  %v1180_v22 = vpop.f32.mrf.mxu3  ;;  %v1643_v15 = vld [vmem:[%s2075_s6] ss:$0 sm:$0xff] }
 0x440   : > { %v1236_v23 = vperm.slane %v1228_v20, %v1828_v60  ;;  %v1238_v24 = vsel %vm638_vm5, %v1237_v17, %v1212_v7  ;;  %v1161_v25 = vpop.f32.mrf.mxu2 }
 0x441   : > { %v1226_v27 = vsel %vm638_vm5, %v1225_v19, %v1208_v37  ;;  %v1244_v28 = vperm.slane %v1238_v24, %v1828_v60  ;;  %v1255_v31 = vrot.slane %v1248_v21, 4  ;;  %v1199_v32 = vpop.f32.mrf.mxu0 }
 0x442   : > { %v1232_v33 = vperm.slane %v1226_v27, %v1828_v60  ;;  %v1251_v34 = vrot.slane %v1236_v23, 4  ;;  %v1618_v27 = vld [vmem:[%s2076_s7 + $0x8] sm:$0xff] }
 0x443   : > { %v1253_v35 = vrot.slane %v1244_v28, 4  ;;  %v1256_v38 = vsel %vm638_vm5, 0.0, %v1255_v31  ;;  %v1268_v39 = vsel %vm638_vm5, %v1255_v31, %v1244_v28  ;;  %1416 = vmatpush.bf16.msra.mxu2 %v1618_v27  ;;  %v1622_v28 = vld [vmem:[%s2078_s9 + $0x18] sm:$0xff] }
 0x444   : > { %v1249_v40 = vrot.slane %v1232_v33, 4  ;;  %v1252_v41 = vsel %vm638_vm5, 0.0, %v1251_v34  ;;  %v1272_v42 = vperm.slane %v1268_v39, %v1822_v44  ;;  %v1273_v43 = vrot.slane %v1256_v38, 4  ;;  %1460 = vmatpush.bf16.msra.mxu3 %v1622_v28 }
 0x445   : > { %v1254_v45 = vsel %vm638_vm5, 0.0, %v1253_v35  ;;  %v1262_v46 = vrot.slane %v1252_v41, 4  ;;  %v1257_v47 = vsel %vm638_vm5, %v1251_v34, %v1232_v33  ;;  %v1621_v33 = vld [vmem:[%s2078_s9 + $0x10] sm:$0xff]  ;;  %v1620_v35 = vld [vmem:[%s2078_s9 + $0x8] sm:$0xff] }
 0x446   : > { %v1250_v48 = vsel %vm638_vm5, 0.0, %v1249_v40  ;;  %v1261_v49 = vperm.slane %v1257_v47, %v1822_v44  ;;  %v1274_v50 = vsel %vm638_vm5, %v1273_v43, %v1254_v45  ;;  %v1293_v51 = vrot.slane %v1272_v42, 4  ;;  %v1644_v43 = vld [vmem:[%s2082_s13] ss:$0 sm:$0xff] }
 0x447   : > { %v1263_v52 = vsel %vm638_vm5, %v1262_v46, %v1250_v48  ;;  %v1278_v53 = vperm.slane %v1274_v50, %v1822_v44  ;;  %v1645_v47 = vld [vmem:[%s2083_s14] ss:$0 sm:$0xff] }
 0x448   : > { %v1267_v54 = vperm.slane %v1263_v52, %v1822_v44  ;;  %v1281_v55 = vrot.slane %v1261_v49, 4  ;;  %1461 = vmatpush.bf16.msra.mxu3 %v1621_v33  ;;  %v1646_v52 = vld [vmem:[%s2077_s8] ss:$0 sm:$0xff] }
 0x449   : > { %v1294_v56 = vsel %vm638_vm5, %v1278_v53, %v1293_v51  ;;  %v1291_v57 = vrot.slane %v1278_v53, 4  ;;  %v1619_v51 = vld [vmem:[%s2078_s9] sm:$0xff] }
 0x44a   : > { %v1282_v58 = vsel %vm638_vm5, %v1267_v54, %v1281_v55  ;;  %v1302_v59 = vperm.slane %v1294_v56, %v1828_v60  ;;  %v1279_v61 = vrot.slane %v1267_v54, 4 }
 0x44b   : > { %v1290_v26 = vperm.slane %v1282_v58, %v1828_v60  ;;  %v1292_v62 = vsel %vm638_vm5, %v1291_v57, %v1272_v42  ;;  %v1647_v58 = vld [vmem:[%s2079_s10] ss:$0 sm:$0xff] }
 0x44c   : > { %v1307_v63 = vrot.slane %v1302_v59, 4  ;;  %v1280_v0 = vsel %vm638_vm5, %v1279_v61, %v1261_v49  ;;  %v1298_v2 = vperm.slane %v1292_v62, %v1828_v60  ;;  %1462 = vmatpush.bf16.msra.mxu3 %v1620_v35 }
 0x44d   : > { %v1309_v3 = vrot.slane %v1290_v26, 4  ;;  %v1286_v44 = vperm.slane %v1280_v0, %v1828_v60  ;;  %v1616_v60 = vld [vmem:[%s2074_s5 + $0x8] sm:$0xff] }
 0x44e   : > { %v1308_v29 = vsel %vm638_vm5, %v1307_v63, %v1290_v26  ;;  %v1303_v4 = vrot.slane %v1298_v2, 4  ;;  %1353 = vmatpush.bf16.msra.mxu1 %v1616_v60 }
 0x44f   : > { %1316 = vrot.lane.b32.xlu2 %v1308_v29, %s1684_s30  ;;  %v1310_v5 = vsel %vm638_vm5, %v1302_v59, %v1309_v3  ;;  %v1305_v30 = vrot.slane %v1286_v44, 4 }
 0x450   : > { %1320 = vrot.lane.b32.xlu0 %v1310_v5, %s1685_s16  ;;  %v1304_v6 = vsel %vm638_vm5, %v1303_v4, %v1286_v44  ;;  %1463 = vmatpush.bf16.msra.mxu3 %v1619_v51 }
 0x451   : > { %v1306_v7 = vsel %vm638_vm5, %v1298_v2, %v1305_v30 }
 0x452   : > { %1312 = vrot.lane.b32.xlu1 %v1306_v7, %s1686_s17  ;;  %1354 = vmatpush.bf16.msra.mxu1 %v1615_v8 }
 0x4a9   : > { %v1317_v11 = vpop.permute.xlu2 %1316 }
 0x4c2   : > { %v1321_v12 = vpop.permute.xlu0 %1320 }
 0x4c4   : > { %v1313_v10 = vpop.permute.xlu1 %1312 }
 0x4c5   : > { %v1323_v37 = vsel %vm995_vm6, %v1304_v6, %v1313_v10 }
 0x4c6   : > { %v1325_v13 = vsel %vm1324_vm8, %v1323_v37, %v1317_v11 }
 0x4c7   : > { %v1327_v36 = vsel %vm1326_vm9, %v1325_v13, %v1321_v12 }
 0x4c8   : > { %v1328_v14 = vpack.c.bf16 %v1327_v36, %v1327_v36 }
 0x4ca   : > { %1584 = vmatmul.msk.bf16.vlgmr.msra.gmra.mxu1 %vm557_vm0, %v1328_v14 }
 0x547   : > { %v1356_v16 = vpop.f32.mrf.mxu1 }
 0x548   : > { %v1357_v17 = vadd.f32 %v1643_v15, %v1356_v16 }
 0x54a   : > { %v1360_v18 = vadd.f32 %v1357_v17, %v1781_v1  ;;  %v1617_v1 = vld [vmem:[%s2076_s7] sm:$0xff] }
 0x54b   : > { %1417 = vmatpush.bf16.msra.mxu2 %v1617_v1 }
 0x54c   : > { %v1361_v19 = vsel %vm557_vm0, %v1360_v18, 0.0 }
 0x54d   : > { %1362 = vadd.xlane.f32.xlu1 %v1361_v19 }
 0x54f   : > { %v1358_v20 = vpop.f32.mrf.mxu1 }
 0x5c0   : > { %v1363_v21 = vpop.xlane.xlu1 %1362 }
 0x5c1   : > { %v1364_v22 = vmul.f32 %v1363_v21, %v1785_v9 }
 0x5c3   : > { %v1365_v23 = vsub.f32 %v1360_v18, %v1364_v22 }
 0x5c5   : > { %v1366_v24 = vmul.f32 %v1365_v23, %v1365_v23 }
 0x5c7   : > { %v1367_v25 = vsel %vm557_vm0, %v1366_v24, 0.0 }
 0x5c8   : > { %1368 = vadd.xlane.f32.xlu0 %v1367_v25 }
 0x63b   : > { %v1369_v31 = vpop.xlane.xlu0 %1368 }
 0x63c   : > { %v1370_v32 = vmul.f32 %v1369_v31, %v1785_v9 }
 0x63e   : > { %v1371_v34 = vadd.f32 1e-06, %v1370_v32 }
 0x640   : > { %1668 = vrsqrt.f32 %v1371_v34  ;;  %vm1378_vm11 = vweird.f32 %v1371_v34 }
 0x646   : > { %v1669_v38 = vpop.eup %1668 }
 0x647   : > { %v1373_v39 = vmul.f32 %v1669_v38, %v1371_v34  ;;  %vm1379_vm10 = vweird.f32 %v1669_v38 }
 0x648   : > { %vm1380_vm12 = vmor %vm1378_vm11, %vm1379_vm10 }
 0x649   : > { %v1374_v40 = vmul.f32 %v1669_v38, %v1373_v39 }
 0x64b   : > { %v1375_v41 = vmul.f32 0.5, %v1374_v40 }
 0x64d   : > { %v1376_v42 = vsub.f32 1.5, %v1375_v41 }
 0x64f   : > { %v1377_v9 = vmul.f32 %v1669_v38, %v1376_v42 }
 0x651   : > { %v1381_v45 = vsel %vm1380_vm12, %v1669_v38, %v1377_v9 }
 0x652   : > { %v1382_v46 = vmul.f32 %v1381_v45, %v1365_v23 }
 0x654   : > { %v1386_v48 = vmul.f32 %v1644_v43, %v1382_v46 }
 0x656   : > { %v1390_v49 = vadd.f32 %v1645_v47, %v1386_v48 }
 0x658   : > { %v1391_v50 = vpack.c.bf16 %v1390_v49, %v1390_v49 }
 0x65a   : > { %1593 = vmatmul.msk.bf16.vlgmr.msra.gmra.mxu2 %vm557_vm0, %v1391_v50 }
 0x6dd   : > { %v1419_v53 = vpop.f32.mrf.mxu2 }
 0x6de   : > { %v1420_v54 = vadd.f32 %v1646_v52, %v1419_v53 }
 0x6e0   : > { %v1423_v55 = vmax.f32 %v1420_v54, 0.0 }
 0x6e2   : > { %v1424_v56 = vpack.c.bf16 %v1423_v55, %v1423_v55 }
 0x6e4   : > { %1610 = vmatmul.msk.bf16.vlgmr.msra.gmra.mxu3 %vm1452_vm13, %v1424_v56 }
 0x6e5   : > { %v1421_v57 = vpop.f32.mrf.mxu2 }
 0x767   : > { %v1465_v59 = vpop.f32.mrf.mxu3 }
 0x768   : > { %v1466_v61 = vadd.f32 %v1647_v58, %v1465_v59 }
 0x76a   : > { %v1469_v26 = vadd.f32 %v1466_v61, %v1360_v18 }
 0x76c   : > { %v1470_v62 = vpack.c.bf16 %v1469_v26, %v1469_v26 }
 0x76e   : > { %1472 = vst.msk [vmem:[%s523_s22] sm:$0xf] %vm1471_vm14, %v1470_v62 }
 0x76f   : > { %v1467_v63 = vpop.f32.mrf.mxu3 }
 0x770 PF: > { %s25_s18 = sadd.s32 1, %s1676_s18  }
 0x771   : > { %p22_p4 = scmp.ge.s32.totalorder %s25_s18, 4  }
 0x773   :  { %24 = sbr.rel (!%p22_p4) target bundleno = 1 (0x1), region = 116 }

</bundles_post_ra>
